<compile_context>
chip_gen: v7x
topology: tpu7x:2x2x1
jax: 0.10.0
libtpu: 0.0.40
codegen_flags: <defaults>
</compile_context>

<pallas_src>
import jax
import jax.numpy as jnp
import numpy as np
from jax.experimental import pallas as pl
from jax.experimental.pallas import tpu as pltpu

EPS = 1e-5      # nn.BatchNorm2d default eps
LANE = 128      # TPU lane width; channel / K dims padded to a multiple of this
SUB = 8         # sublane width


def _round_up(x, m):
    return (x + m - 1) // m * m


def _vmem_limit_bytes():
    """Explicit scoped-VMEM request: ~3/4 of physical, capped at 100 MiB."""
    try:
        cap = int(pltpu.get_tpu_info().vmem_capacity_bytes)
    except Exception:
        cap = 64 << 20            # conservative fallback (v7x physical VMEM)
    return int(min(cap * 3 // 4, 100 << 20))


def _pick_tile_n(n, hw, per_image_bytes, const_bytes, budget):
    """Largest batch tile (divisor of n, 8-aligned M tile) fitting the budget."""
    ok = [d for d in range(1, n + 1)
          if n % d == 0 and (d == n or (d * hw) % SUB == 0)]
    fits = [d for d in ok if const_bytes + d * per_image_bytes <= budget]
    return max(fits) if fits else min(ok)


# ------------------------------ Pallas kernel ------------------------------ #
def _make_kernel(*, stride, tile_n, hout, wout, cin_p, cout_p,
                 m_total, has_proj, packed):
    tile_m = tile_n * hout * wout
    inv_m = 1.0 / m_total
    ks = 3

    def kernel(*refs):
        (x_ref, w1_ref, g1_ref, b1_ref,
         w2_ref, g2_ref, b2_ref, ws_ref) = refs[:8]
        if has_proj:
            gs_ref, bs_ref = refs[8], refs[9]
        o_ref, h_ref, st_ref = refs[-3], refs[-2], refs[-1]

        bn_pass = pl.program_id(0)   # 0: BN1/BNsc stats, 1: BN2 stats, 2: apply
        tile = pl.program_id(1)

        # -------------------------------------------------------------------
        # One-time init: zero the stats accumulator and ONLY the 1-px border
        # of the conv2 halo scratch (the interior is fully rewritten per use).
        # -------------------------------------------------------------------
        @pl.when((bn_pass == 0) & (tile == 0))
        def _init():
            st_ref[...] = jnp.zeros_like(st_ref)
            zr = jnp.zeros((tile_n, 1, wout + 2, cout_p), h_ref.dtype)
            zc = jnp.zeros((tile_n, hout + 2, 1, cout_p), h_ref.dtype)
            h_ref[:, 0:1, :, :] = zr
            h_ref[:, hout + 1:hout + 2, :, :] = zr
            h_ref[:, :, 0:1, :] = zc
            h_ref[:, :, wout + 1:wout + 2, :] = zc

        # -------------------------------------------------------------------
        # conv1 + 1x1 shortcut operands
        # -------------------------------------------------------------------
        if packed:
            # All 9 taps packed along K: conv1 and the shortcut are single
            # lane-dense MXU matmuls (ws / identity selector is folded onto
            # the centre-tap rows of the packed K axis).
            x_flat = x_ref[...].reshape(tile_m, -1)

            def conv1():
                return jnp.dot(x_flat, w1_ref[...],
                               preferred_element_type=jnp.float32)

            def shortcut_raw():
                return jnp.dot(x_flat, ws_ref[...],
                               preferred_element_type=jnp.float32)
        else:
            # Stride-phase decomposition: tap (kh, kw) is a contiguous window
            # of phase (kh % s, kw % s).
            def window(kh, kw):
                p, a = kh % stride, kh // stride
                q, b = kw % stride, kw // stride
                win = x_ref[:, p * stride + q, a:a + hout, b:b + wout, :]
                return win.reshape(tile_m, cin_p)

            def conv1():
                acc = jnp.zeros((tile_m, cout_p), jnp.float32)
                for kh in range(ks):
                    for kw in range(ks):
                        acc = acc + jnp.dot(window(kh, kw),
                                            w1_ref[kh * ks + kw],
                                            preferred_element_type=jnp.float32)
                # TODO(synk): on v7x use MXU-resident accumulation
                # (pltpu.matmul_push_rhs / matmul_acc_lhs) instead of VALU adds.
                return acc

            def shortcut_raw():
                # x[:, ::s, ::s, :] is exactly the centre (1,1) tap window.
                return jnp.dot(window(1, 1), ws_ref[...],
                               preferred_element_type=jnp.float32)

        # -------------------------------------------------------------------
        # BatchNorm: statistics accumulated across ALL tiles in st_ref
        # (rows 0/1: BN1, rows 2/3: BN2, rows 4/5: BN_sc), applied globally.
        # -------------------------------------------------------------------
        def add_stats(y, row):
            st_ref[row:row + 1, :] += jnp.sum(y, axis=0, keepdims=True)
            st_ref[row + 1:row + 2, :] += jnp.sum(y * y, axis=0, keepdims=True)

        def bn(y, row, g_ref, b_ref):
            mean = st_ref[row:row + 1, :] * inv_m
            var = st_ref[row + 1:row + 2, :] * inv_m - mean * mean
            scale = g_ref[...] * jax.lax.rsqrt(var + EPS)   # rsqrt -> EUP slot
            return (y - mean) * scale + b_ref[...]

        def bn1_relu_to_scratch():
            a = jnp.maximum(bn(conv1(), 0, g1_ref, b1_ref), 0.0)
            h_ref[:, 1:1 + hout, 1:1 + wout, :] = (
                a.reshape(tile_n, hout, wout, cout_p).astype(h_ref.dtype))

        def conv2():
            # TODO(synk): form the kw-shifted windows with pltpu.roll (XLU) /
            # flat border masking to avoid 9 materialized window copies.
            acc = jnp.zeros((tile_m, cout_p), jnp.float32)
            for kh in range(ks):
                for kw in range(ks):
                    win = h_ref[:, kh:kh + hout, kw:kw + wout, :]
                    acc = acc + jnp.dot(win.reshape(tile_m, cout_p),
                                        w2_ref[kh * ks + kw],
                                        preferred_element_type=jnp.float32)
            return acc

        # ---- pass 0: BN1 (+ shortcut BN) statistics ------------------------
        @pl.when(bn_pass == 0)
        def _pass0():
            add_stats(conv1(), 0)
            if has_proj:
                add_stats(shortcut_raw(), 4)

        # ---- pass 1: BN2 statistics ----------------------------------------
        @pl.when(bn_pass == 1)
        def _pass1():
            bn1_relu_to_scratch()
            add_stats(conv2(), 2)

        # ---- pass 2: apply + deferred shortcut + residual add + ReLU -------
        @pl.when(bn_pass == 2)
        def _pass2():
            bn1_relu_to_scratch()
            left = bn(conv2(), 2, g2_ref, b2_ref)
            sc = shortcut_raw()               # deferred: minimal live range
            if has_proj:
                sc = bn(sc, 4, gs_ref, bs_ref)
            o_ref[...] = jnp.maximum(left + sc, 0.0).astype(o_ref.dtype)

    return kernel


# ------------------------------- data folding ------------------------------- #
def _pad_vec(v, cout_p):
    return jnp.pad(v.reshape(1, -1).astype(jnp.float32),
                   ((0, 0), (0, cout_p - v.shape[0])))


def _fold_w_taps(w_oihw, cin_p, cout_p):
    """(Cout,Cin,KH,KW) -> (KH*KW, cin_p, cout_p), tap-major, zero padded."""
    cout, cin, kh, kw = w_oihw.shape
    w = jnp.transpose(w_oihw, (2, 3, 1, 0)).reshape(kh * kw, cin, cout)
    return jnp.pad(w, ((0, 0), (0, cin_p - cin),
                       (0, cout_p - cout))).astype(jnp.float32)


def _fold_w_packed(w_oihw, k_p, cout_p):
    """(Cout,Cin,3,3) -> (k_p, cout_p) with all taps packed along K."""
    cout, cin, kh, kw = w_oihw.shape
    w = jnp.transpose(w_oihw, (2, 3, 1, 0)).reshape(kh * kw * cin, cout)
    return jnp.pad(w, ((0, k_p - kh * kw * cin),
                       (0, cout_p - cout))).astype(jnp.float32)


def _fold_ws_packed(ws_oi11, cin, k_p, cout_p):
    """1x1 shortcut weight folded onto the centre-tap rows of the packed K."""
    cout = ws_oi11.shape[0]
    w = jnp.transpose(ws_oi11.reshape(cout, cin), (1, 0)).astype(jnp.float32)
    z = jnp.zeros((k_p, cout_p), jnp.float32)
    return z.at[4 * cin:5 * cin, :cout].set(w)


def _build_packed_input(x_nhwc, stride, k_p):
    """Taps packed along the channel axis.  With 9*Cin <= 128 this is the same
    number of bytes as padding Cin to the 128-lane width, but conv1 becomes
    ONE matmul instead of 9."""
    n, h, w, cin = x_nhwc.shape
    hout = (h + 2 - 3) // stride + 1
    wout = (w + 2 - 3) // stride + 1
    xp = jnp.pad(x_nhwc, ((0, 0), (1, 1), (1, 1), (0, 0)))
    taps = []
    for kh in range(3):
        for kw in range(3):
            taps.append(xp[:, kh:kh + stride * (hout - 1) + 1:stride,
                           kw:kw + stride * (wout - 1) + 1:stride, :])
    xk = jnp.concatenate(taps, axis=-1)                    # (n, ho, wo, 9*cin)
    xk = jnp.pad(xk, ((0, 0), (0, 0), (0, 0), (0, k_p - 9 * cin)))
    return xk, hout, wout


def _build_phase_input(x_nhwc, stride, cin_p):
    """Stride-phase decomposition (same total bytes as the padded input)."""
    n, h, w, cin = x_nhwc.shape
    hout = (h + 2 - 3) // stride + 1
    wout = (w + 2 - 3) // stride + 1
    xp = jnp.pad(x_nhwc, ((0, 0), (1, 1), (1, 1), (0, cin_p - cin)))
    ph_len = hout + (3 - 1) // stride
    pw_len = wout + (3 - 1) // stride
    phases = []
    for p in range(stride):
        for q in range(stride):
            ph = xp[:, p::stride, q::stride, :][:, :ph_len, :pw_len, :]
            ph = jnp.pad(ph, ((0, 0), (0, ph_len - ph.shape[1]),
                              (0, pw_len - ph.shape[2]), (0, 0)))
            phases.append(ph)
    return jnp.stack(phases, axis=1), hout, wout           # (n, s*s, PH, PW, cin_p)


# ------------------------------- JAX wrapper -------------------------------- #
def residual_block_forward(x_nchw, params, stride, *,
                           mxu_dtype=jnp.float32, tile_n=None):
    """ResidualBlock forward (train-mode BN) as one tiled, fused Pallas call.

    mxu_dtype: jnp.float32 (default; matches the f32 reference within 1e-4) or
    jnp.bfloat16 for v5e/v6e/v7x MXU throughput (f32 accumulation / BN math).
    tile_n: batch-tile size (None -> chosen from the VMEM budget).
    """
    n, cin, h, w = x_nchw.shape
    cout = params["w1"].shape[0]
    has_proj = (stride != 1) or (cin != cout)
    cin_p = _round_up(cin, LANE)
    cout_p = _round_up(cout, LANE)
    packed = (9 * cin) <= LANE        # K-pack all 9 taps into one MXU pass
    esize = jnp.dtype(mxu_dtype).itemsize

    x_nhwc = jnp.transpose(x_nchw, (0, 2, 3, 1)).astype(jnp.float32)
    # TODO(synk): keep activations channel-padded NHWC (pre-packed) between
    # blocks so this wrapper relayout is not paid once per layer.

    ws_param = params["ws"] if has_proj else (
        jnp.eye(cout, dtype=jnp.float32).reshape(cout, cin, 1, 1))

    if packed:
        k_p = _round_up(9 * cin, LANE)
        x_in, hout, wout = _build_packed_input(x_nhwc, stride, k_p)
        w1f = _fold_w_packed(params["w1"], k_p, cout_p)
        wsf = _fold_ws_packed(ws_param, cin, k_p, cout_p)
        per_image_in = hout * wout * k_p * esize
    else:
        x_in, hout, wout = _build_phase_input(x_nhwc, stride, cin_p)
        w1f = _fold_w_taps(params["w1"], cin_p, cout_p)
        wsf = _fold_w_taps(ws_param, cin_p, cout_p)[0]
        per_image_in = (stride * stride * x_in.shape[2] * x_in.shape[3]
                        * cin_p * esize)

    w2f = _fold_w_taps(params["w2"], cout_p, cout_p)
    m_total = n * hout * wout

    inputs = [x_in.astype(mxu_dtype),
              w1f.astype(mxu_dtype),
              _pad_vec(params["g1"], cout_p), _pad_vec(params["b1"], cout_p),
              w2f.astype(mxu_dtype),
              _pad_vec(params["g2"], cout_p), _pad_vec(params["b2"], cout_p),
              wsf.astype(mxu_dtype)]
    if has_proj:
        inputs += [_pad_vec(params["gs"], cout_p),
                   _pad_vec(params["bs"], cout_p)]

    # ---- VMEM budget -> batch-tile size ------------------------------------
    vmem_limit = _vmem_limit_bytes()
    const_bytes = 2 * sum(int(np.prod(a.shape)) * a.dtype.itemsize
                          for a in inputs[1:])
    per_image = (2 * per_image_in                                # x tile, 2 bufs
                 + (hout + 2) * (wout + 2) * cout_p * esize      # conv2 halo scratch
                 + 6 * hout * wout * cout_p * 4)                 # f32 live values + out
    if tile_n is None:
        tile_n = _pick_tile_n(n, hout * wout, per_image, const_bytes,
                              vmem_limit * 3 // 4)
    assert n % tile_n == 0
    num_tiles = n // tile_n
    tile_m = tile_n * hout * wout

    kernel = _make_kernel(stride=stride, tile_n=tile_n, hout=hout, wout=wout,
                          cin_p=cin_p, cout_p=cout_p, m_total=m_total,
                          has_proj=has_proj, packed=packed)

    n_rest = x_in.ndim - 1
    x_spec = pl.BlockSpec((tile_n,) + tuple(x_in.shape[1:]),
                          lambda bp, t: (t,) + (0,) * n_rest)

    def _const_spec(a):
        nd = a.ndim
        # TODO(synk): pipeline_mode=pl.Buffered(1) to single-buffer these
        # grid-invariant operands and reclaim VMEM for bigger tiles.
        return pl.BlockSpec(a.shape, lambda bp, t: (0,) * nd)

    in_specs = [x_spec] + [_const_spec(a) for a in inputs[1:]]
    out_spec = pl.BlockSpec((tile_m, cout_p), lambda bp, t: (t, 0))

    out = pl.pallas_call(
        kernel,
        out_shape=jax.ShapeDtypeStruct((m_total, cout_p), jnp.float32),
        grid_spec=pltpu.PrefetchScalarGridSpec(
            num_scalar_prefetch=0,
            # (BN pass, batch tile); pass-major order so BN statistics are
            # finalized before they are applied.
            grid=(3, num_tiles),
            in_specs=in_specs,
            out_specs=out_spec,
            scratch_shapes=[
                pltpu.VMEM((tile_n, hout + 2, wout + 2, cout_p), mxu_dtype),
                pltpu.VMEM((8, cout_p), jnp.float32),   # s1/s2: BN1, BN2, BN_sc
            ]),
        compiler_params=pltpu.CompilerParams(
            # Both axes 'arbitrary': BN statistics accumulate in VMEM scratch
            # across batch tiles, so tiles must run sequentially on one core.
            # TODO(synk): for v7x dual-TC, mark the tile axis 'parallel' and
            # reduce the per-core BN partials across cores before the apply
            # pass (CMEM / semaphores).
            dimension_semantics=("arbitrary", "arbitrary"),
            vmem_limit_bytes=vmem_limit),
    )(*inputs)

    out = out.reshape(n, hout, wout, cout_p)[..., :cout]   # strip lane padding
    return jnp.transpose(out, (0, 3, 1, 2))                # NHWC -> NCHW


# ---------------------------- pure-JAX reference ---------------------------- #
def _ref_conv(x, w, stride, padding):
    return jax.lax.conv_general_dilated(
        x, w, (stride, stride), ((padding, padding), (padding, padding)),
        dimension_numbers=("NCHW", "OIHW", "NCHW"))


def _ref_bn(y, gamma, beta):
    mean = jnp.mean(y, axis=(0, 2, 3), keepdims=True)
    var = jnp.var(y, axis=(0, 2, 3), keepdims=True)   # biased (train mode)
    yh = (y - mean) / jnp.sqrt(var + EPS)
    return yh * gamma.reshape(1, -1, 1, 1) + beta.reshape(1, -1, 1, 1)


def _ref_forward(x, params, stride):
    h = jax.nn.relu(_ref_bn(_ref_conv(x, params["w1"], stride, 1),
                            params["g1"], params["b1"]))
    left = _ref_bn(_ref_conv(h, params["w2"], 1, 1), params["g2"], params["b2"])
    cin, cout = x.shape[1], params["w1"].shape[0]
    if stride != 1 or cin != cout:
        sc = _ref_bn(_ref_conv(x, params["ws"], stride, 0),
                     params["gs"], params["bs"])
    else:
        sc = x
    return jax.nn.relu(left + sc)


# --------------------------------- main ------------------------------------ #
if __name__ == "__main__":
    keys = jax.random.split(jax.random.PRNGKey(0), 17)

    # --- test 1: projection shortcut (stride=2, Cin != Cout), 2 batch tiles --
    n, cin, h, w = 2, 4, 16, 16
    cout, stride = 8, 2
    params1 = {
        "w1": 0.5 * jax.random.normal(keys[0], (cout, cin, 3, 3), jnp.float32),
        "g1": 1.0 + 0.1 * jax.random.normal(keys[1], (cout,), jnp.float32),
        "b1": 0.1 * jax.random.normal(keys[2], (cout,), jnp.float32),
        "w2": 0.5 * jax.random.normal(keys[3], (cout, cout, 3, 3), jnp.float32),
        "g2": 1.0 + 0.1 * jax.random.normal(keys[4], (cout,), jnp.float32),
        "b2": 0.1 * jax.random.normal(keys[5], (cout,), jnp.float32),
        "ws": 0.5 * jax.random.normal(keys[6], (cout, cin, 1, 1), jnp.float32),
        "gs": 1.0 + 0.1 * jax.random.normal(keys[7], (cout,), jnp.float32),
        "bs": 0.1 * jax.random.normal(keys[8], (cout,), jnp.float32),
    }
    x1 = jax.random.normal(keys[9], (n, cin, h, w), jnp.float32)

    out1 = jax.block_until_ready(
        residual_block_forward(x1, params1, stride, tile_n=1))  # multi-tile BN
    ref1 = jax.block_until_ready(_ref_forward(x1, params1, stride))
    assert out1.shape == (n, cout, h // stride, w // stride)
    np.testing.assert_allclose(np.asarray(out1), np.asarray(ref1),
                               rtol=1e-4, atol=1e-4)

    # --- test 2: identity shortcut (stride=1, Cin == Cout), auto tile size ---
    c2 = 8
    params2 = {
        "w1": 0.5 * jax.random.normal(keys[10], (c2, c2, 3, 3), jnp.float32),
        "g1": 1.0 + 0.1 * jax.random.normal(keys[11], (c2,), jnp.float32),
        "b1": 0.1 * jax.random.normal(keys[12], (c2,), jnp.float32),
        "w2": 0.5 * jax.random.normal(keys[13], (c2, c2, 3, 3), jnp.float32),
        "g2": 1.0 + 0.1 * jax.random.normal(keys[14], (c2,), jnp.float32),
        "b2": 0.1 * jax.random.normal(keys[15], (c2,), jnp.float32),
    }
    x2 = jax.random.normal(keys[16], (n, c2, h, w), jnp.float32)

    out2 = jax.block_until_ready(residual_block_forward(x2, params2, 1))
    ref2 = jax.block_until_ready(_ref_forward(x2, params2, 1))
    assert out2.shape == (n, c2, h, w)
    np.testing.assert_allclose(np.asarray(out2), np.asarray(ref2),
                               rtol=1e-4, atol=1e-4)

    print("KERNEL_OK")
</pallas_src>

<mosaic_0001>
module attributes {stable_mosaic.version = 11 : i64} {
  func.func @kernel(%arg0: i32, %arg1: i32, %arg2: memref<1x8x8x128xf32, #tpu.memory_space<vmem>>, %arg3: memref<128x128xf32, #tpu.memory_space<vmem>>, %arg4: memref<1x128xf32, #tpu.memory_space<vmem>>, %arg5: memref<1x128xf32, #tpu.memory_space<vmem>>, %arg6: memref<9x128x128xf32, #tpu.memory_space<vmem>>, %arg7: memref<1x128xf32, #tpu.memory_space<vmem>>, %arg8: memref<1x128xf32, #tpu.memory_space<vmem>>, %arg9: memref<128x128xf32, #tpu.memory_space<vmem>>, %arg10: memref<1x128xf32, #tpu.memory_space<vmem>>, %arg11: memref<1x128xf32, #tpu.memory_space<vmem>>, %arg12: memref<64x128xf32, #tpu.memory_space<vmem>>, %arg13: memref<1x10x10x128xf32, #tpu.memory_space<vmem>>, %arg14: memref<8x128xf32, #tpu.memory_space<vmem>>) attributes {dimension_semantics = [#tpu.dimension_semantics<arbitrary>, #tpu.dimension_semantics<arbitrary>], iteration_bounds = array<i64: 3, 2>, scalar_prefetch = 0 : i64, scratch_operands = 2 : i64, tpu.core_type = #tpu.core_type<tc>, window_params = [{transform_indices = @transform_0, window_bounds = array<i64: 1, 8, 8, 128>}, {pipeline_mode = #tpu.pipeline_mode<synchronous>, transform_indices = @transform_1, window_bounds = array<i64: 128, 128>}, {pipeline_mode = #tpu.pipeline_mode<synchronous>, transform_indices = @transform_2, window_bounds = array<i64: 1, 128>}, {pipeline_mode = #tpu.pipeline_mode<synchronous>, transform_indices = @transform_3, window_bounds = array<i64: 1, 128>}, {pipeline_mode = #tpu.pipeline_mode<synchronous>, transform_indices = @transform_4, window_bounds = array<i64: 9, 128, 128>}, {pipeline_mode = #tpu.pipeline_mode<synchronous>, transform_indices = @transform_5, window_bounds = array<i64: 1, 128>}, {pipeline_mode = #tpu.pipeline_mode<synchronous>, transform_indices = @transform_6, window_bounds = array<i64: 1, 128>}, {pipeline_mode = #tpu.pipeline_mode<synchronous>, transform_indices = @transform_7, window_bounds = array<i64: 128, 128>}, {pipeline_mode = #tpu.pipeline_mode<synchronous>, transform_indices = @transform_8, window_bounds = array<i64: 1, 128>}, {pipeline_mode = #tpu.pipeline_mode<synchronous>, transform_indices = @transform_9, window_bounds = array<i64: 1, 128>}, {transform_indices = @transform_10, window_bounds = array<i64: 64, 128>}]} {
    %c0_i32 = arith.constant 0 : i32
    %0 = arith.cmpi eq, %arg0, %c0_i32 : i32
    %c0_i32_0 = arith.constant 0 : i32
    %1 = arith.cmpi eq, %arg1, %c0_i32_0 : i32
    %2 = arith.andi %0, %1 : i1
    %3 = arith.extui %2 : i1 to i32
    %c0_i32_1 = arith.constant 0 : i32
    %4 = arith.cmpi ne, %3, %c0_i32_1 : i32
    scf.if %4 {
      %cst = arith.constant 0.000000e+00 : f32
      %16 = vector.broadcast %cst : f32 to vector<8x128xf32>
      %c0_9 = arith.constant 0 : index
      %c0_10 = arith.constant 0 : index
      %17 = vector.load %arg14[%c0_9, %c0_10] : memref<8x128xf32, #tpu.memory_space<vmem>>, vector<8x128xf32>
      tpu.vector_store %arg14[%c0_9, %c0_10], %16 {strides = array<i32>} : memref<8x128xf32, #tpu.memory_space<vmem>>, vector<8x128xf32>,
      %cst_11 = arith.constant 0.000000e+00 : f32
      %18 = vector.broadcast %cst_11 : f32 to vector<1x1x10x128xf32>
      %cst_12 = arith.constant 0.000000e+00 : f32
      %19 = vector.broadcast %cst_12 : f32 to vector<1x10x1x128xf32>
      %c0_13 = arith.constant 0 : index
      %c0_14 = arith.constant 0 : index
      %c0_15 = arith.constant 0 : index
      %c0_16 = arith.constant 0 : index
      %20 = vector.load %arg13[%c0_13, %c0_14, %c0_15, %c0_16] : memref<1x10x10x128xf32, #tpu.memory_space<vmem>>, vector<1x1x10x128xf32>
      tpu.vector_store %arg13[%c0_13, %c0_14, %c0_15, %c0_16], %18 {strides = array<i32>} : memref<1x10x10x128xf32, #tpu.memory_space<vmem>>, vector<1x1x10x128xf32>,
      %c0_17 = arith.constant 0 : index
      %c9 = arith.constant 9 : index
      %c0_18 = arith.constant 0 : index
      %c0_19 = arith.constant 0 : index
      %21 = vector.load %arg13[%c0_17, %c9, %c0_18, %c0_19] : memref<1x10x10x128xf32, #tpu.memory_space<vmem>>, vector<1x1x10x128xf32>
      tpu.vector_store %arg13[%c0_17, %c9, %c0_18, %c0_19], %18 {strides = array<i32>} : memref<1x10x10x128xf32, #tpu.memory_space<vmem>>, vector<1x1x10x128xf32>,
      %c0_20 = arith.constant 0 : index
      %c0_21 = arith.constant 0 : index
      %c0_22 = arith.constant 0 : index
      %c0_23 = arith.constant 0 : index
      %22 = vector.load %arg13[%c0_20, %c0_21, %c0_22, %c0_23] : memref<1x10x10x128xf32, #tpu.memory_space<vmem>>, vector<1x10x1x128xf32>
      tpu.vector_store %arg13[%c0_20, %c0_21, %c0_22, %c0_23], %19 {strides = array<i32>} : memref<1x10x10x128xf32, #tpu.memory_space<vmem>>, vector<1x10x1x128xf32>,
      %c0_24 = arith.constant 0 : index
      %c0_25 = arith.constant 0 : index
      %c9_26 = arith.constant 9 : index
      %c0_27 = arith.constant 0 : index
      %23 = vector.load %arg13[%c0_24, %c0_25, %c9_26, %c0_27] : memref<1x10x10x128xf32, #tpu.memory_space<vmem>>, vector<1x10x1x128xf32>
      tpu.vector_store %arg13[%c0_24, %c0_25, %c9_26, %c0_27], %19 {strides = array<i32>} : memref<1x10x10x128xf32, #tpu.memory_space<vmem>>, vector<1x10x1x128xf32>,
    } else {
    }
    %c0 = arith.constant 0 : index
    %c0_2 = arith.constant 0 : index
    %c0_3 = arith.constant 0 : index
    %c0_4 = arith.constant 0 : index
    %5 = vector.load %arg2[%c0, %c0_2, %c0_3, %c0_4] : memref<1x8x8x128xf32, #tpu.memory_space<vmem>>, vector<1x8x8x128xf32>
    %6 = vector.shape_cast %5 : vector<1x8x8x128xf32> to vector<64x128xf32>
    %c0_i32_5 = arith.constant 0 : i32
    %7 = arith.cmpi eq, %arg0, %c0_i32_5 : i32
    %8 = arith.extui %7 : i1 to i32
    %c0_i32_6 = arith.constant 0 : i32
    %9 = arith.cmpi ne, %8, %c0_i32_6 : i32
    scf.if %9 {
      %c0_9 = arith.constant 0 : index
      %c0_10 = arith.constant 0 : index
      %16 = vector.load %arg3[%c0_9, %c0_10] : memref<128x128xf32, #tpu.memory_space<vmem>>, vector<128x128xf32>
      %cst = arith.constant dense<0.000000e+00> : vector<64x128xf32>
      %17 = tpu.matmul %6, %16, %cst {dimension_numbers = #tpu.dot_dimension_numbers<[1], [0], [0], [1], [0, 0, 1, 1], [], []>} : vector<64x128xf32>, vector<128x128xf32>, vector<64x128xf32> -> vector<64x128xf32>
      %c0_11 = arith.constant 0 : index
      %c0_12 = arith.constant 0 : index
      %18 = vector.load %arg14[%c0_11, %c0_12] : memref<8x128xf32, #tpu.memory_space<vmem>>, vector<1x128xf32>
      %cst_13 = arith.constant dense<0.000000e+00> : vector<128xf32>
      %19 = vector.multi_reduction <add>, %17, %cst_13 [0] : vector<64x128xf32> to vector<128xf32>
      %20 = vector.shape_cast %19 : vector<128xf32> to vector<1x128xf32>
      %21 = arith.addf %18, %20 : vector<1x128xf32>
      %c0_14 = arith.constant 0 : index
      %c0_15 = arith.constant 0 : index
      %22 = vector.load %arg14[%c0_14, %c0_15] : memref<8x128xf32, #tpu.memory_space<vmem>>, vector<1x128xf32>
      tpu.vector_store %arg14[%c0_14, %c0_15], %21 {strides = array<i32>} : memref<8x128xf32, #tpu.memory_space<vmem>>, vector<1x128xf32>,
      %c1 = arith.constant 1 : index
      %c0_16 = arith.constant 0 : index
      %23 = vector.load %arg14[%c1, %c0_16] : memref<8x128xf32, #tpu.memory_space<vmem>>, vector<1x128xf32>
      %24 = arith.mulf %17, %17 : vector<64x128xf32>
      %cst_17 = arith.constant dense<0.000000e+00> : vector<128xf32>
      %25 = vector.multi_reduction <add>, %24, %cst_17 [0] : vector<64x128xf32> to vector<128xf32>
      %26 = vector.shape_cast %25 : vector<128xf32> to vector<1x128xf32>
      %27 = arith.addf %23, %26 : vector<1x128xf32>
      %c1_18 = arith.constant 1 : index
      %c0_19 = arith.constant 0 : index
      %28 = vector.load %arg14[%c1_18, %c0_19] : memref<8x128xf32, #tpu.memory_space<vmem>>, vector<1x128xf32>
      tpu.vector_store %arg14[%c1_18, %c0_19], %27 {strides = array<i32>} : memref<8x128xf32, #tpu.memory_space<vmem>>, vector<1x128xf32>,
      %c0_20 = arith.constant 0 : index
      %c0_21 = arith.constant 0 : index
      %29 = vector.load %arg9[%c0_20, %c0_21] : memref<128x128xf32, #tpu.memory_space<vmem>>, vector<128x128xf32>
      %cst_22 = arith.constant dense<0.000000e+00> : vector<64x128xf32>
      %30 = tpu.matmul %6, %29, %cst_22 {dimension_numbers = #tpu.dot_dimension_numbers<[1], [0], [0], [1], [0, 0, 1, 1], [], []>} : vector<64x128xf32>, vector<128x128xf32>, vector<64x128xf32> -> vector<64x128xf32>
      %c4 = arith.constant 4 : index
      %c0_23 = arith.constant 0 : index
      %31 = vector.load %arg14[%c4, %c0_23] : memref<8x128xf32, #tpu.memory_space<vmem>>, vector<1x128xf32>
      %cst_24 = arith.constant dense<0.000000e+00> : vector<128xf32>
      %32 = vector.multi_reduction <add>, %30, %cst_24 [0] : vector<64x128xf32> to vector<128xf32>
      %33 = vector.shape_cast %32 : vector<128xf32> to vector<1x128xf32>
      %34 = arith.addf %31, %33 : vector<1x128xf32>
      %c4_25 = arith.constant 4 : index
      %c0_26 = arith.constant 0 : index
      %35 = vector.load %arg14[%c4_25, %c0_26] : memref<8x128xf32, #tpu.memory_space<vmem>>, vector<1x128xf32>
      tpu.vector_store %arg14[%c4_25, %c0_26], %34 {strides = array<i32>} : memref<8x128xf32, #tpu.memory_space<vmem>>, vector<1x128xf32>,
      %c5 = arith.constant 5 : index
      %c0_27 = arith.constant 0 : index
      %36 = vector.load %arg14[%c5, %c0_27] : memref<8x128xf32, #tpu.memory_space<vmem>>, vector<1x128xf32>
      %37 = arith.mulf %30, %30 : vector<64x128xf32>
      %cst_28 = arith.constant dense<0.000000e+00> : vector<128xf32>
      %38 = vector.multi_reduction <add>, %37, %cst_28 [0] : vector<64x128xf32> to vector<128xf32>
      %39 = vector.shape_cast %38 : vector<128xf32> to vector<1x128xf32>
      %40 = arith.addf %36, %39 : vector<1x128xf32>
      %c5_29 = arith.constant 5 : index
      %c0_30 = arith.constant 0 : index
      %41 = vector.load %arg14[%c5_29, %c0_30] : memref<8x128xf32, #tpu.memory_space<vmem>>, vector<1x128xf32>
      tpu.vector_store %arg14[%c5_29, %c0_30], %40 {strides = array<i32>} : memref<8x128xf32, #tpu.memory_space<vmem>>, vector<1x128xf32>,
    } else {
    }
    %c1_i32 = arith.constant 1 : i32
    %10 = arith.cmpi eq, %arg0, %c1_i32 : i32
    %11 = arith.extui %10 : i1 to i32
    %c0_i32_7 = arith.constant 0 : i32
    %12 = arith.cmpi ne, %11, %c0_i32_7 : i32
    scf.if %12 {
      %c0_9 = arith.constant 0 : index
      %c0_10 = arith.constant 0 : index
      %16 = vector.load %arg3[%c0_9, %c0_10] : memref<128x128xf32, #tpu.memory_space<vmem>>, vector<128x128xf32>
      %cst = arith.constant dense<0.000000e+00> : vector<64x128xf32>
      %17 = tpu.matmul %6, %16, %cst {dimension_numbers = #tpu.dot_dimension_numbers<[1], [0], [0], [1], [0, 0, 1, 1], [], []>} : vector<64x128xf32>, vector<128x128xf32>, vector<64x128xf32> -> vector<64x128xf32>
      %c0_11 = arith.constant 0 : index
      %c0_12 = arith.constant 0 : index
      %18 = vector.load %arg14[%c0_11, %c0_12] : memref<8x128xf32, #tpu.memory_space<vmem>>, vector<1x128xf32>
      %cst_13 = arith.constant 7.812500e-03 : f32
      %19 = vector.broadcast %cst_13 : f32 to vector<1x128xf32>
      %20 = arith.mulf %18, %19 : vector<1x128xf32>
      %c1 = arith.constant 1 : index
      %c0_14 = arith.constant 0 : index
      %21 = vector.load %arg14[%c1, %c0_14] : memref<8x128xf32, #tpu.memory_space<vmem>>, vector<1x128xf32>
      %cst_15 = arith.constant 7.812500e-03 : f32
      %22 = vector.broadcast %cst_15 : f32 to vector<1x128xf32>
      %23 = arith.mulf %21, %22 : vector<1x128xf32>
      %24 = arith.mulf %20, %20 : vector<1x128xf32>
      %25 = arith.subf %23, %24 : vector<1x128xf32>
      %c0_16 = arith.constant 0 : index
      %c0_17 = arith.constant 0 : index
      %26 = vector.load %arg4[%c0_16, %c0_17] : memref<1x128xf32, #tpu.memory_space<vmem>>, vector<1x128xf32>
      %cst_18 = arith.constant 9.99999974E-6 : f32
      %27 = vector.broadcast %cst_18 : f32 to vector<1x128xf32>
      %28 = arith.addf %25, %27 : vector<1x128xf32>
      %29 = math.rsqrt %28 : vector<1x128xf32>
      %30 = arith.mulf %26, %29 : vector<1x128xf32>
      %31 = vector.broadcast %20 : vector<1x128xf32> to vector<64x128xf32>
      %32 = arith.subf %17, %31 : vector<64x128xf32>
      %33 = vector.broadcast %30 : vector<1x128xf32> to vector<64x128xf32>
      %34 = arith.mulf %32, %33 : vector<64x128xf32>
      %c0_19 = arith.constant 0 : index
      %c0_20 = arith.constant 0 : index
      %35 = vector.load %arg5[%c0_19, %c0_20] : memref<1x128xf32, #tpu.memory_space<vmem>>, vector<1x128xf32>
      %36 = vector.broadcast %35 : vector<1x128xf32> to vector<64x128xf32>
      %37 = arith.addf %34, %36 : vector<64x128xf32>
      %cst_21 = arith.constant 0.000000e+00 : f32
      %38 = vector.broadcast %cst_21 : f32 to vector<64x128xf32>
      %39 = arith.maximumf %37, %38 : vector<64x128xf32>
      %40 = vector.shape_cast %39 : vector<64x128xf32> to vector<1x8x8x128xf32>
      %c0_22 = arith.constant 0 : index
      %c1_23 = arith.constant 1 : index
      %c1_24 = arith.constant 1 : index
      %c0_25 = arith.constant 0 : index
      %41 = vector.load %arg13[%c0_22, %c1_23, %c1_24, %c0_25] : memref<1x10x10x128xf32, #tpu.memory_space<vmem>>, vector<1x8x8x128xf32>
      tpu.vector_store %arg13[%c0_22, %c1_23, %c1_24, %c0_25], %40 {strides = array<i32>} : memref<1x10x10x128xf32, #tpu.memory_space<vmem>>, vector<1x8x8x128xf32>,
      %cst_26 = arith.constant 0.000000e+00 : f32
      %42 = vector.broadcast %cst_26 : f32 to vector<64x128xf32>
      %c0_27 = arith.constant 0 : index
      %c0_28 = arith.constant 0 : index
      %c0_29 = arith.constant 0 : index
      %c0_30 = arith.constant 0 : index
      %43 = vector.load %arg13[%c0_27, %c0_28, %c0_29, %c0_30] : memref<1x10x10x128xf32, #tpu.memory_space<vmem>>, vector<1x8x8x128xf32>
      %44 = vector.shape_cast %43 : vector<1x8x8x128xf32> to vector<64x128xf32>
      %c0_31 = arith.constant 0 : index
      %c0_32 = arith.constant 0 : index
      %c0_33 = arith.constant 0 : index
      %45 = vector.load %arg6[%c0_31, %c0_32, %c0_33] : memref<9x128x128xf32, #tpu.memory_space<vmem>>, vector<1x128x128xf32>
      %46 = vector.shape_cast %45 : vector<1x128x128xf32> to vector<128x128xf32>
      %cst_34 = arith.constant dense<0.000000e+00> : vector<64x128xf32>
      %47 = tpu.matmul %44, %46, %cst_34 {dimension_numbers = #tpu.dot_dimension_numbers<[1], [0], [0], [1], [0, 0, 1, 1], [], []>} : vector<64x128xf32>, vector<128x128xf32>, vector<64x128xf32> -> vector<64x128xf32>
      %48 = arith.addf %42, %47 : vector<64x128xf32>
      %c0_35 = arith.constant 0 : index
      %c0_36 = arith.constant 0 : index
      %c1_37 = arith.constant 1 : index
      %c0_38 = arith.constant 0 : index
      %49 = vector.load %arg13[%c0_35, %c0_36, %c1_37, %c0_38] : memref<1x10x10x128xf32, #tpu.memory_space<vmem>>, vector<1x8x8x128xf32>
      %50 = vector.shape_cast %49 : vector<1x8x8x128xf32> to vector<64x128xf32>
      %c1_39 = arith.constant 1 : index
      %c0_40 = arith.constant 0 : index
      %c0_41 = arith.constant 0 : index
      %51 = vector.load %arg6[%c1_39, %c0_40, %c0_41] : memref<9x128x128xf32, #tpu.memory_space<vmem>>, vector<1x128x128xf32>
      %52 = vector.shape_cast %51 : vector<1x128x128xf32> to vector<128x128xf32>
      %cst_42 = arith.constant dense<0.000000e+00> : vector<64x128xf32>
      %53 = tpu.matmul %50, %52, %cst_42 {dimension_numbers = #tpu.dot_dimension_numbers<[1], [0], [0], [1], [0, 0, 1, 1], [], []>} : vector<64x128xf32>, vector<128x128xf32>, vector<64x128xf32> -> vector<64x128xf32>
      %54 = arith.addf %48, %53 : vector<64x128xf32>
      %c0_43 = arith.constant 0 : index
      %c0_44 = arith.constant 0 : index
      %c2 = arith.constant 2 : index
      %c0_45 = arith.constant 0 : index
      %55 = vector.load %arg13[%c0_43, %c0_44, %c2, %c0_45] : memref<1x10x10x128xf32, #tpu.memory_space<vmem>>, vector<1x8x8x128xf32>
      %56 = vector.shape_cast %55 : vector<1x8x8x128xf32> to vector<64x128xf32>
      %c2_46 = arith.constant 2 : index
      %c0_47 = arith.constant 0 : index
      %c0_48 = arith.constant 0 : index
      %57 = vector.load %arg6[%c2_46, %c0_47, %c0_48] : memref<9x128x128xf32, #tpu.memory_space<vmem>>, vector<1x128x128xf32>
      %58 = vector.shape_cast %57 : vector<1x128x128xf32> to vector<128x128xf32>
      %cst_49 = arith.constant dense<0.000000e+00> : vector<64x128xf32>
      %59 = tpu.matmul %56, %58, %cst_49 {dimension_numbers = #tpu.dot_dimension_numbers<[1], [0], [0], [1], [0, 0, 1, 1], [], []>} : vector<64x128xf32>, vector<128x128xf32>, vector<64x128xf32> -> vector<64x128xf32>
      %60 = arith.addf %54, %59 : vector<64x128xf32>
      %c0_50 = arith.constant 0 : index
      %c1_51 = arith.constant 1 : index
      %c0_52 = arith.constant 0 : index
      %c0_53 = arith.constant 0 : index
      %61 = vector.load %arg13[%c0_50, %c1_51, %c0_52, %c0_53] : memref<1x10x10x128xf32, #tpu.memory_space<vmem>>, vector<1x8x8x128xf32>
      %62 = vector.shape_cast %61 : vector<1x8x8x128xf32> to vector<64x128xf32>
      %c3 = arith.constant 3 : index
      %c0_54 = arith.constant 0 : index
      %c0_55 = arith.constant 0 : index
      %63 = vector.load %arg6[%c3, %c0_54, %c0_55] : memref<9x128x128xf32, #tpu.memory_space<vmem>>, vector<1x128x128xf32>
      %64 = vector.shape_cast %63 : vector<1x128x128xf32> to vector<128x128xf32>
      %cst_56 = arith.constant dense<0.000000e+00> : vector<64x128xf32>
      %65 = tpu.matmul %62, %64, %cst_56 {dimension_numbers = #tpu.dot_dimension_numbers<[1], [0], [0], [1], [0, 0, 1, 1], [], []>} : vector<64x128xf32>, vector<128x128xf32>, vector<64x128xf32> -> vector<64x128xf32>
      %66 = arith.addf %60, %65 : vector<64x128xf32>
      %c0_57 = arith.constant 0 : index
      %c1_58 = arith.constant 1 : index
      %c1_59 = arith.constant 1 : index
      %c0_60 = arith.constant 0 : index
      %67 = vector.load %arg13[%c0_57, %c1_58, %c1_59, %c0_60] : memref<1x10x10x128xf32, #tpu.memory_space<vmem>>, vector<1x8x8x128xf32>
      %68 = vector.shape_cast %67 : vector<1x8x8x128xf32> to vector<64x128xf32>
      %c4 = arith.constant 4 : index
      %c0_61 = arith.constant 0 : index
      %c0_62 = arith.constant 0 : index
      %69 = vector.load %arg6[%c4, %c0_61, %c0_62] : memref<9x128x128xf32, #tpu.memory_space<vmem>>, vector<1x128x128xf32>
      %70 = vector.shape_cast %69 : vector<1x128x128xf32> to vector<128x128xf32>
      %cst_63 = arith.constant dense<0.000000e+00> : vector<64x128xf32>
      %71 = tpu.matmul %68, %70, %cst_63 {dimension_numbers = #tpu.dot_dimension_numbers<[1], [0], [0], [1], [0, 0, 1, 1], [], []>} : vector<64x128xf32>, vector<128x128xf32>, vector<64x128xf32> -> vector<64x128xf32>
      %72 = arith.addf %66, %71 : vector<64x128xf32>
      %c0_64 = arith.constant 0 : index
      %c1_65 = arith.constant 1 : index
      %c2_66 = arith.constant 2 : index
      %c0_67 = arith.constant 0 : index
      %73 = vector.load %arg13[%c0_64, %c1_65, %c2_66, %c0_67] : memref<1x10x10x128xf32, #tpu.memory_space<vmem>>, vector<1x8x8x128xf32>
      %74 = vector.shape_cast %73 : vector<1x8x8x128xf32> to vector<64x128xf32>
      %c5 = arith.constant 5 : index
      %c0_68 = arith.constant 0 : index
      %c0_69 = arith.constant 0 : index
      %75 = vector.load %arg6[%c5, %c0_68, %c0_69] : memref<9x128x128xf32, #tpu.memory_space<vmem>>, vector<1x128x128xf32>
      %76 = vector.shape_cast %75 : vector<1x128x128xf32> to vector<128x128xf32>
      %cst_70 = arith.constant dense<0.000000e+00> : vector<64x128xf32>
      %77 = tpu.matmul %74, %76, %cst_70 {dimension_numbers = #tpu.dot_dimension_numbers<[1], [0], [0], [1], [0, 0, 1, 1], [], []>} : vector<64x128xf32>, vector<128x128xf32>, vector<64x128xf32> -> vector<64x128xf32>
      %78 = arith.addf %72, %77 : vector<64x128xf32>
      %c0_71 = arith.constant 0 : index
      %c2_72 = arith.constant 2 : index
      %c0_73 = arith.constant 0 : index
      %c0_74 = arith.constant 0 : index
      %79 = vector.load %arg13[%c0_71, %c2_72, %c0_73, %c0_74] : memref<1x10x10x128xf32, #tpu.memory_space<vmem>>, vector<1x8x8x128xf32>
      %80 = vector.shape_cast %79 : vector<1x8x8x128xf32> to vector<64x128xf32>
      %c6 = arith.constant 6 : index
      %c0_75 = arith.constant 0 : index
      %c0_76 = arith.constant 0 : index
      %81 = vector.load %arg6[%c6, %c0_75, %c0_76] : memref<9x128x128xf32, #tpu.memory_space<vmem>>, vector<1x128x128xf32>
      %82 = vector.shape_cast %81 : vector<1x128x128xf32> to vector<128x128xf32>
      %cst_77 = arith.constant dense<0.000000e+00> : vector<64x128xf32>
      %83 = tpu.matmul %80, %82, %cst_77 {dimension_numbers = #tpu.dot_dimension_numbers<[1], [0], [0], [1], [0, 0, 1, 1], [], []>} : vector<64x128xf32>, vector<128x128xf32>, vector<64x128xf32> -> vector<64x128xf32>
      %84 = arith.addf %78, %83 : vector<64x128xf32>
      %c0_78 = arith.constant 0 : index
      %c2_79 = arith.constant 2 : index
      %c1_80 = arith.constant 1 : index
      %c0_81 = arith.constant 0 : index
      %85 = vector.load %arg13[%c0_78, %c2_79, %c1_80, %c0_81] : memref<1x10x10x128xf32, #tpu.memory_space<vmem>>, vector<1x8x8x128xf32>
      %86 = vector.shape_cast %85 : vector<1x8x8x128xf32> to vector<64x128xf32>
      %c7 = arith.constant 7 : index
      %c0_82 = arith.constant 0 : index
      %c0_83 = arith.constant 0 : index
      %87 = vector.load %arg6[%c7, %c0_82, %c0_83] : memref<9x128x128xf32, #tpu.memory_space<vmem>>, vector<1x128x128xf32>
      %88 = vector.shape_cast %87 : vector<1x128x128xf32> to vector<128x128xf32>
      %cst_84 = arith.constant dense<0.000000e+00> : vector<64x128xf32>
      %89 = tpu.matmul %86, %88, %cst_84 {dimension_numbers = #tpu.dot_dimension_numbers<[1], [0], [0], [1], [0, 0, 1, 1], [], []>} : vector<64x128xf32>, vector<128x128xf32>, vector<64x128xf32> -> vector<64x128xf32>
      %90 = arith.addf %84, %89 : vector<64x128xf32>
      %c0_85 = arith.constant 0 : index
      %c2_86 = arith.constant 2 : index
      %c2_87 = arith.constant 2 : index
      %c0_88 = arith.constant 0 : index
      %91 = vector.load %arg13[%c0_85, %c2_86, %c2_87, %c0_88] : memref<1x10x10x128xf32, #tpu.memory_space<vmem>>, vector<1x8x8x128xf32>
      %92 = vector.shape_cast %91 : vector<1x8x8x128xf32> to vector<64x128xf32>
      %c8 = arith.constant 8 : index
      %c0_89 = arith.constant 0 : index
      %c0_90 = arith.constant 0 : index
      %93 = vector.load %arg6[%c8, %c0_89, %c0_90] : memref<9x128x128xf32, #tpu.memory_space<vmem>>, vector<1x128x128xf32>
      %94 = vector.shape_cast %93 : vector<1x128x128xf32> to vector<128x128xf32>
      %cst_91 = arith.constant dense<0.000000e+00> : vector<64x128xf32>
      %95 = tpu.matmul %92, %94, %cst_91 {dimension_numbers = #tpu.dot_dimension_numbers<[1], [0], [0], [1], [0, 0, 1, 1], [], []>} : vector<64x128xf32>, vector<128x128xf32>, vector<64x128xf32> -> vector<64x128xf32>
      %96 = arith.addf %90, %95 : vector<64x128xf32>
      %c2_92 = arith.constant 2 : index
      %c0_93 = arith.constant 0 : index
      %97 = vector.load %arg14[%c2_92, %c0_93] : memref<8x128xf32, #tpu.memory_space<vmem>>, vector<1x128xf32>
      %cst_94 = arith.constant dense<0.000000e+00> : vector<128xf32>
      %98 = vector.multi_reduction <add>, %96, %cst_94 [0] : vector<64x128xf32> to vector<128xf32>
      %99 = vector.shape_cast %98 : vector<128xf32> to vector<1x128xf32>
      %100 = arith.addf %97, %99 : vector<1x128xf32>
      %c2_95 = arith.constant 2 : index
      %c0_96 = arith.constant 0 : index
      %101 = vector.load %arg14[%c2_95, %c0_96] : memref<8x128xf32, #tpu.memory_space<vmem>>, vector<1x128xf32>
      tpu.vector_store %arg14[%c2_95, %c0_96], %100 {strides = array<i32>} : memref<8x128xf32, #tpu.memory_space<vmem>>, vector<1x128xf32>,
      %c3_97 = arith.constant 3 : index
      %c0_98 = arith.constant 0 : index
      %102 = vector.load %arg14[%c3_97, %c0_98] : memref<8x128xf32, #tpu.memory_space<vmem>>, vector<1x128xf32>
      %103 = arith.mulf %96, %96 : vector<64x128xf32>
      %cst_99 = arith.constant dense<0.000000e+00> : vector<128xf32>
      %104 = vector.multi_reduction <add>, %103, %cst_99 [0] : vector<64x128xf32> to vector<128xf32>
      %105 = vector.shape_cast %104 : vector<128xf32> to vector<1x128xf32>
      %106 = arith.addf %102, %105 : vector<1x128xf32>
      %c3_100 = arith.constant 3 : index
      %c0_101 = arith.constant 0 : index
      %107 = vector.load %arg14[%c3_100, %c0_101] : memref<8x128xf32, #tpu.memory_space<vmem>>, vector<1x128xf32>
      tpu.vector_store %arg14[%c3_100, %c0_101], %106 {strides = array<i32>} : memref<8x128xf32, #tpu.memory_space<vmem>>, vector<1x128xf32>,
    } else {
    }
    %c2_i32 = arith.constant 2 : i32
    %13 = arith.cmpi eq, %arg0, %c2_i32 : i32
    %14 = arith.extui %13 : i1 to i32
    %c0_i32_8 = arith.constant 0 : i32
    %15 = arith.cmpi ne, %14, %c0_i32_8 : i32
    scf.if %15 {
      %c0_9 = arith.constant 0 : index
      %c0_10 = arith.constant 0 : index
      %16 = vector.load %arg3[%c0_9, %c0_10] : memref<128x128xf32, #tpu.memory_space<vmem>>, vector<128x128xf32>
      %cst = arith.constant dense<0.000000e+00> : vector<64x128xf32>
      %17 = tpu.matmul %6, %16, %cst {dimension_numbers = #tpu.dot_dimension_numbers<[1], [0], [0], [1], [0, 0, 1, 1], [], []>} : vector<64x128xf32>, vector<128x128xf32>, vector<64x128xf32> -> vector<64x128xf32>
      %c0_11 = arith.constant 0 : index
      %c0_12 = arith.constant 0 : index
      %18 = vector.load %arg14[%c0_11, %c0_12] : memref<8x128xf32, #tpu.memory_space<vmem>>, vector<1x128xf32>
      %cst_13 = arith.constant 7.812500e-03 : f32
      %19 = vector.broadcast %cst_13 : f32 to vector<1x128xf32>
      %20 = arith.mulf %18, %19 : vector<1x128xf32>
      %c1 = arith.constant 1 : index
      %c0_14 = arith.constant 0 : index
      %21 = vector.load %arg14[%c1, %c0_14] : memref<8x128xf32, #tpu.memory_space<vmem>>, vector<1x128xf32>
      %cst_15 = arith.constant 7.812500e-03 : f32
      %22 = vector.broadcast %cst_15 : f32 to vector<1x128xf32>
      %23 = arith.mulf %21, %22 : vector<1x128xf32>
      %24 = arith.mulf %20, %20 : vector<1x128xf32>
      %25 = arith.subf %23, %24 : vector<1x128xf32>
      %c0_16 = arith.constant 0 : index
      %c0_17 = arith.constant 0 : index
      %26 = vector.load %arg4[%c0_16, %c0_17] : memref<1x128xf32, #tpu.memory_space<vmem>>, vector<1x128xf32>
      %cst_18 = arith.constant 9.99999974E-6 : f32
      %27 = vector.broadcast %cst_18 : f32 to vector<1x128xf32>
      %28 = arith.addf %25, %27 : vector<1x128xf32>
      %29 = math.rsqrt %28 : vector<1x128xf32>
      %30 = arith.mulf %26, %29 : vector<1x128xf32>
      %31 = vector.broadcast %20 : vector<1x128xf32> to vector<64x128xf32>
      %32 = arith.subf %17, %31 : vector<64x128xf32>
      %33 = vector.broadcast %30 : vector<1x128xf32> to vector<64x128xf32>
      %34 = arith.mulf %32, %33 : vector<64x128xf32>
      %c0_19 = arith.constant 0 : index
      %c0_20 = arith.constant 0 : index
      %35 = vector.load %arg5[%c0_19, %c0_20] : memref<1x128xf32, #tpu.memory_space<vmem>>, vector<1x128xf32>
      %36 = vector.broadcast %35 : vector<1x128xf32> to vector<64x128xf32>
      %37 = arith.addf %34, %36 : vector<64x128xf32>
      %cst_21 = arith.constant 0.000000e+00 : f32
      %38 = vector.broadcast %cst_21 : f32 to vector<64x128xf32>
      %39 = arith.maximumf %37, %38 : vector<64x128xf32>
      %40 = vector.shape_cast %39 : vector<64x128xf32> to vector<1x8x8x128xf32>
      %c0_22 = arith.constant 0 : index
      %c1_23 = arith.constant 1 : index
      %c1_24 = arith.constant 1 : index
      %c0_25 = arith.constant 0 : index
      %41 = vector.load %arg13[%c0_22, %c1_23, %c1_24, %c0_25] : memref<1x10x10x128xf32, #tpu.memory_space<vmem>>, vector<1x8x8x128xf32>
      tpu.vector_store %arg13[%c0_22, %c1_23, %c1_24, %c0_25], %40 {strides = array<i32>} : memref<1x10x10x128xf32, #tpu.memory_space<vmem>>, vector<1x8x8x128xf32>,
      %cst_26 = arith.constant 0.000000e+00 : f32
      %42 = vector.broadcast %cst_26 : f32 to vector<64x128xf32>
      %c0_27 = arith.constant 0 : index
      %c0_28 = arith.constant 0 : index
      %c0_29 = arith.constant 0 : index
      %c0_30 = arith.constant 0 : index
      %43 = vector.load %arg13[%c0_27, %c0_28, %c0_29, %c0_30] : memref<1x10x10x128xf32, #tpu.memory_space<vmem>>, vector<1x8x8x128xf32>
      %44 = vector.shape_cast %43 : vector<1x8x8x128xf32> to vector<64x128xf32>
      %c0_31 = arith.constant 0 : index
      %c0_32 = arith.constant 0 : index
      %c0_33 = arith.constant 0 : index
      %45 = vector.load %arg6[%c0_31, %c0_32, %c0_33] : memref<9x128x128xf32, #tpu.memory_space<vmem>>, vector<1x128x128xf32>
      %46 = vector.shape_cast %45 : vector<1x128x128xf32> to vector<128x128xf32>
      %cst_34 = arith.constant dense<0.000000e+00> : vector<64x128xf32>
      %47 = tpu.matmul %44, %46, %cst_34 {dimension_numbers = #tpu.dot_dimension_numbers<[1], [0], [0], [1], [0, 0, 1, 1], [], []>} : vector<64x128xf32>, vector<128x128xf32>, vector<64x128xf32> -> vector<64x128xf32>
      %48 = arith.addf %42, %47 : vector<64x128xf32>
      %c0_35 = arith.constant 0 : index
      %c0_36 = arith.constant 0 : index
      %c1_37 = arith.constant 1 : index
      %c0_38 = arith.constant 0 : index
      %49 = vector.load %arg13[%c0_35, %c0_36, %c1_37, %c0_38] : memref<1x10x10x128xf32, #tpu.memory_space<vmem>>, vector<1x8x8x128xf32>
      %50 = vector.shape_cast %49 : vector<1x8x8x128xf32> to vector<64x128xf32>
      %c1_39 = arith.constant 1 : index
      %c0_40 = arith.constant 0 : index
      %c0_41 = arith.constant 0 : index
      %51 = vector.load %arg6[%c1_39, %c0_40, %c0_41] : memref<9x128x128xf32, #tpu.memory_space<vmem>>, vector<1x128x128xf32>
      %52 = vector.shape_cast %51 : vector<1x128x128xf32> to vector<128x128xf32>
      %cst_42 = arith.constant dense<0.000000e+00> : vector<64x128xf32>
      %53 = tpu.matmul %50, %52, %cst_42 {dimension_numbers = #tpu.dot_dimension_numbers<[1], [0], [0], [1], [0, 0, 1, 1], [], []>} : vector<64x128xf32>, vector<128x128xf32>, vector<64x128xf32> -> vector<64x128xf32>
      %54 = arith.addf %48, %53 : vector<64x128xf32>
      %c0_43 = arith.constant 0 : index
      %c0_44 = arith.constant 0 : index
      %c2 = arith.constant 2 : index
      %c0_45 = arith.constant 0 : index
      %55 = vector.load %arg13[%c0_43, %c0_44, %c2, %c0_45] : memref<1x10x10x128xf32, #tpu.memory_space<vmem>>, vector<1x8x8x128xf32>
      %56 = vector.shape_cast %55 : vector<1x8x8x128xf32> to vector<64x128xf32>
      %c2_46 = arith.constant 2 : index
      %c0_47 = arith.constant 0 : index
      %c0_48 = arith.constant 0 : index
      %57 = vector.load %arg6[%c2_46, %c0_47, %c0_48] : memref<9x128x128xf32, #tpu.memory_space<vmem>>, vector<1x128x128xf32>
      %58 = vector.shape_cast %57 : vector<1x128x128xf32> to vector<128x128xf32>
      %cst_49 = arith.constant dense<0.000000e+00> : vector<64x128xf32>
      %59 = tpu.matmul %56, %58, %cst_49 {dimension_numbers = #tpu.dot_dimension_numbers<[1], [0], [0], [1], [0, 0, 1, 1], [], []>} : vector<64x128xf32>, vector<128x128xf32>, vector<64x128xf32> -> vector<64x128xf32>
      %60 = arith.addf %54, %59 : vector<64x128xf32>
      %c0_50 = arith.constant 0 : index
      %c1_51 = arith.constant 1 : index
      %c0_52 = arith.constant 0 : index
      %c0_53 = arith.constant 0 : index
      %61 = vector.load %arg13[%c0_50, %c1_51, %c0_52, %c0_53] : memref<1x10x10x128xf32, #tpu.memory_space<vmem>>, vector<1x8x8x128xf32>
      %62 = vector.shape_cast %61 : vector<1x8x8x128xf32> to vector<64x128xf32>
      %c3 = arith.constant 3 : index
      %c0_54 = arith.constant 0 : index
      %c0_55 = arith.constant 0 : index
      %63 = vector.load %arg6[%c3, %c0_54, %c0_55] : memref<9x128x128xf32, #tpu.memory_space<vmem>>, vector<1x128x128xf32>
      %64 = vector.shape_cast %63 : vector<1x128x128xf32> to vector<128x128xf32>
      %cst_56 = arith.constant dense<0.000000e+00> : vector<64x128xf32>
      %65 = tpu.matmul %62, %64, %cst_56 {dimension_numbers = #tpu.dot_dimension_numbers<[1], [0], [0], [1], [0, 0, 1, 1], [], []>} : vector<64x128xf32>, vector<128x128xf32>, vector<64x128xf32> -> vector<64x128xf32>
      %66 = arith.addf %60, %65 : vector<64x128xf32>
      %c0_57 = arith.constant 0 : index
      %c1_58 = arith.constant 1 : index
      %c1_59 = arith.constant 1 : index
      %c0_60 = arith.constant 0 : index
      %67 = vector.load %arg13[%c0_57, %c1_58, %c1_59, %c0_60] : memref<1x10x10x128xf32, #tpu.memory_space<vmem>>, vector<1x8x8x128xf32>
      %68 = vector.shape_cast %67 : vector<1x8x8x128xf32> to vector<64x128xf32>
      %c4 = arith.constant 4 : index
      %c0_61 = arith.constant 0 : index
      %c0_62 = arith.constant 0 : index
      %69 = vector.load %arg6[%c4, %c0_61, %c0_62] : memref<9x128x128xf32, #tpu.memory_space<vmem>>, vector<1x128x128xf32>
      %70 = vector.shape_cast %69 : vector<1x128x128xf32> to vector<128x128xf32>
      %cst_63 = arith.constant dense<0.000000e+00> : vector<64x128xf32>
      %71 = tpu.matmul %68, %70, %cst_63 {dimension_numbers = #tpu.dot_dimension_numbers<[1], [0], [0], [1], [0, 0, 1, 1], [], []>} : vector<64x128xf32>, vector<128x128xf32>, vector<64x128xf32> -> vector<64x128xf32>
      %72 = arith.addf %66, %71 : vector<64x128xf32>
      %c0_64 = arith.constant 0 : index
      %c1_65 = arith.constant 1 : index
      %c2_66 = arith.constant 2 : index
      %c0_67 = arith.constant 0 : index
      %73 = vector.load %arg13[%c0_64, %c1_65, %c2_66, %c0_67] : memref<1x10x10x128xf32, #tpu.memory_space<vmem>>, vector<1x8x8x128xf32>
      %74 = vector.shape_cast %73 : vector<1x8x8x128xf32> to vector<64x128xf32>
      %c5 = arith.constant 5 : index
      %c0_68 = arith.constant 0 : index
      %c0_69 = arith.constant 0 : index
      %75 = vector.load %arg6[%c5, %c0_68, %c0_69] : memref<9x128x128xf32, #tpu.memory_space<vmem>>, vector<1x128x128xf32>
      %76 = vector.shape_cast %75 : vector<1x128x128xf32> to vector<128x128xf32>
      %cst_70 = arith.constant dense<0.000000e+00> : vector<64x128xf32>
      %77 = tpu.matmul %74, %76, %cst_70 {dimension_numbers = #tpu.dot_dimension_numbers<[1], [0], [0], [1], [0, 0, 1, 1], [], []>} : vector<64x128xf32>, vector<128x128xf32>, vector<64x128xf32> -> vector<64x128xf32>
      %78 = arith.addf %72, %77 : vector<64x128xf32>
      %c0_71 = arith.constant 0 : index
      %c2_72 = arith.constant 2 : index
      %c0_73 = arith.constant 0 : index
      %c0_74 = arith.constant 0 : index
      %79 = vector.load %arg13[%c0_71, %c2_72, %c0_73, %c0_74] : memref<1x10x10x128xf32, #tpu.memory_space<vmem>>, vector<1x8x8x128xf32>
      %80 = vector.shape_cast %79 : vector<1x8x8x128xf32> to vector<64x128xf32>
      %c6 = arith.constant 6 : index
      %c0_75 = arith.constant 0 : index
      %c0_76 = arith.constant 0 : index
      %81 = vector.load %arg6[%c6, %c0_75, %c0_76] : memref<9x128x128xf32, #tpu.memory_space<vmem>>, vector<1x128x128xf32>
      %82 = vector.shape_cast %81 : vector<1x128x128xf32> to vector<128x128xf32>
      %cst_77 = arith.constant dense<0.000000e+00> : vector<64x128xf32>
      %83 = tpu.matmul %80, %82, %cst_77 {dimension_numbers = #tpu.dot_dimension_numbers<[1], [0], [0], [1], [0, 0, 1, 1], [], []>} : vector<64x128xf32>, vector<128x128xf32>, vector<64x128xf32> -> vector<64x128xf32>
      %84 = arith.addf %78, %83 : vector<64x128xf32>
      %c0_78 = arith.constant 0 : index
      %c2_79 = arith.constant 2 : index
      %c1_80 = arith.constant 1 : index
      %c0_81 = arith.constant 0 : index
      %85 = vector.load %arg13[%c0_78, %c2_79, %c1_80, %c0_81] : memref<1x10x10x128xf32, #tpu.memory_space<vmem>>, vector<1x8x8x128xf32>
      %86 = vector.shape_cast %85 : vector<1x8x8x128xf32> to vector<64x128xf32>
      %c7 = arith.constant 7 : index
      %c0_82 = arith.constant 0 : index
      %c0_83 = arith.constant 0 : index
      %87 = vector.load %arg6[%c7, %c0_82, %c0_83] : memref<9x128x128xf32, #tpu.memory_space<vmem>>, vector<1x128x128xf32>
      %88 = vector.shape_cast %87 : vector<1x128x128xf32> to vector<128x128xf32>
      %cst_84 = arith.constant dense<0.000000e+00> : vector<64x128xf32>
      %89 = tpu.matmul %86, %88, %cst_84 {dimension_numbers = #tpu.dot_dimension_numbers<[1], [0], [0], [1], [0, 0, 1, 1], [], []>} : vector<64x128xf32>, vector<128x128xf32>, vector<64x128xf32> -> vector<64x128xf32>
      %90 = arith.addf %84, %89 : vector<64x128xf32>
      %c0_85 = arith.constant 0 : index
      %c2_86 = arith.constant 2 : index
      %c2_87 = arith.constant 2 : index
      %c0_88 = arith.constant 0 : index
      %91 = vector.load %arg13[%c0_85, %c2_86, %c2_87, %c0_88] : memref<1x10x10x128xf32, #tpu.memory_space<vmem>>, vector<1x8x8x128xf32>
      %92 = vector.shape_cast %91 : vector<1x8x8x128xf32> to vector<64x128xf32>
      %c8 = arith.constant 8 : index
      %c0_89 = arith.constant 0 : index
      %c0_90 = arith.constant 0 : index
      %93 = vector.load %arg6[%c8, %c0_89, %c0_90] : memref<9x128x128xf32, #tpu.memory_space<vmem>>, vector<1x128x128xf32>
      %94 = vector.shape_cast %93 : vector<1x128x128xf32> to vector<128x128xf32>
      %cst_91 = arith.constant dense<0.000000e+00> : vector<64x128xf32>
      %95 = tpu.matmul %92, %94, %cst_91 {dimension_numbers = #tpu.dot_dimension_numbers<[1], [0], [0], [1], [0, 0, 1, 1], [], []>} : vector<64x128xf32>, vector<128x128xf32>, vector<64x128xf32> -> vector<64x128xf32>
      %96 = arith.addf %90, %95 : vector<64x128xf32>
      %c2_92 = arith.constant 2 : index
      %c0_93 = arith.constant 0 : index
      %97 = vector.load %arg14[%c2_92, %c0_93] : memref<8x128xf32, #tpu.memory_space<vmem>>, vector<1x128xf32>
      %cst_94 = arith.constant 7.812500e-03 : f32
      %98 = vector.broadcast %cst_94 : f32 to vector<1x128xf32>
      %99 = arith.mulf %97, %98 : vector<1x128xf32>
      %c3_95 = arith.constant 3 : index
      %c0_96 = arith.constant 0 : index
      %100 = vector.load %arg14[%c3_95, %c0_96] : memref<8x128xf32, #tpu.memory_space<vmem>>, vector<1x128xf32>
      %cst_97 = arith.constant 7.812500e-03 : f32
      %101 = vector.broadcast %cst_97 : f32 to vector<1x128xf32>
      %102 = arith.mulf %100, %101 : vector<1x128xf32>
      %103 = arith.mulf %99, %99 : vector<1x128xf32>
      %104 = arith.subf %102, %103 : vector<1x128xf32>
      %c0_98 = arith.constant 0 : index
      %c0_99 = arith.constant 0 : index
      %105 = vector.load %arg7[%c0_98, %c0_99] : memref<1x128xf32, #tpu.memory_space<vmem>>, vector<1x128xf32>
      %cst_100 = arith.constant 9.99999974E-6 : f32
      %106 = vector.broadcast %cst_100 : f32 to vector<1x128xf32>
      %107 = arith.addf %104, %106 : vector<1x128xf32>
      %108 = math.rsqrt %107 : vector<1x128xf32>
      %109 = arith.mulf %105, %108 : vector<1x128xf32>
      %110 = vector.broadcast %99 : vector<1x128xf32> to vector<64x128xf32>
      %111 = arith.subf %96, %110 : vector<64x128xf32>
      %112 = vector.broadcast %109 : vector<1x128xf32> to vector<64x128xf32>
      %113 = arith.mulf %111, %112 : vector<64x128xf32>
      %c0_101 = arith.constant 0 : index
      %c0_102 = arith.constant 0 : index
      %114 = vector.load %arg8[%c0_101, %c0_102] : memref<1x128xf32, #tpu.memory_space<vmem>>, vector<1x128xf32>
      %115 = vector.broadcast %114 : vector<1x128xf32> to vector<64x128xf32>
      %116 = arith.addf %113, %115 : vector<64x128xf32>
      %c0_103 = arith.constant 0 : index
      %c0_104 = arith.constant 0 : index
      %117 = vector.load %arg9[%c0_103, %c0_104] : memref<128x128xf32, #tpu.memory_space<vmem>>, vector<128x128xf32>
      %cst_105 = arith.constant dense<0.000000e+00> : vector<64x128xf32>
      %118 = tpu.matmul %6, %117, %cst_105 {dimension_numbers = #tpu.dot_dimension_numbers<[1], [0], [0], [1], [0, 0, 1, 1], [], []>} : vector<64x128xf32>, vector<128x128xf32>, vector<64x128xf32> -> vector<64x128xf32>
      %c4_106 = arith.constant 4 : index
      %c0_107 = arith.constant 0 : index
      %119 = vector.load %arg14[%c4_106, %c0_107] : memref<8x128xf32, #tpu.memory_space<vmem>>, vector<1x128xf32>
      %cst_108 = arith.constant 7.812500e-03 : f32
      %120 = vector.broadcast %cst_108 : f32 to vector<1x128xf32>
      %121 = arith.mulf %119, %120 : vector<1x128xf32>
      %c5_109 = arith.constant 5 : index
      %c0_110 = arith.constant 0 : index
      %122 = vector.load %arg14[%c5_109, %c0_110] : memref<8x128xf32, #tpu.memory_space<vmem>>, vector<1x128xf32>
      %cst_111 = arith.constant 7.812500e-03 : f32
      %123 = vector.broadcast %cst_111 : f32 to vector<1x128xf32>
      %124 = arith.mulf %122, %123 : vector<1x128xf32>
      %125 = arith.mulf %121, %121 : vector<1x128xf32>
      %126 = arith.subf %124, %125 : vector<1x128xf32>
      %c0_112 = arith.constant 0 : index
      %c0_113 = arith.constant 0 : index
      %127 = vector.load %arg10[%c0_112, %c0_113] : memref<1x128xf32, #tpu.memory_space<vmem>>, vector<1x128xf32>
      %cst_114 = arith.constant 9.99999974E-6 : f32
      %128 = vector.broadcast %cst_114 : f32 to vector<1x128xf32>
      %129 = arith.addf %126, %128 : vector<1x128xf32>
      %130 = math.rsqrt %129 : vector<1x128xf32>
      %131 = arith.mulf %127, %130 : vector<1x128xf32>
      %132 = vector.broadcast %121 : vector<1x128xf32> to vector<64x128xf32>
      %133 = arith.subf %118, %132 : vector<64x128xf32>
      %134 = vector.broadcast %131 : vector<1x128xf32> to vector<64x128xf32>
      %135 = arith.mulf %133, %134 : vector<64x128xf32>
      %c0_115 = arith.constant 0 : index
      %c0_116 = arith.constant 0 : index
      %136 = vector.load %arg11[%c0_115, %c0_116] : memref<1x128xf32, #tpu.memory_space<vmem>>, vector<1x128xf32>
      %137 = vector.broadcast %136 : vector<1x128xf32> to vector<64x128xf32>
      %138 = arith.addf %135, %137 : vector<64x128xf32>
      %139 = arith.addf %116, %138 : vector<64x128xf32>
      %cst_117 = arith.constant 0.000000e+00 : f32
      %140 = vector.broadcast %cst_117 : f32 to vector<64x128xf32>
      %141 = arith.maximumf %139, %140 : vector<64x128xf32>
      %c0_118 = arith.constant 0 : index
      %c0_119 = arith.constant 0 : index
      %142 = vector.load %arg12[%c0_118, %c0_119] : memref<64x128xf32, #tpu.memory_space<vmem>>, vector<64x128xf32>
      tpu.vector_store %arg12[%c0_118, %c0_119], %141 {strides = array<i32>} : memref<64x128xf32, #tpu.memory_space<vmem>>, vector<64x128xf32>,
    } else {
    }
    return
  }
  func.func @transform_0(%arg0: i32, %arg1: i32) -> (i32, i32, i32, i32) {
    %c0_i32 = arith.constant 0 : i32
    %c0_i32_0 = arith.constant 0 : i32
    %c0_i32_1 = arith.constant 0 : i32
    %c0_i32_2 = arith.constant 0 : i32
    return %arg1, %c0_i32, %c0_i32_0, %c0_i32_1 : i32, i32, i32, i32
  }
  func.func @transform_1(%arg0: i32, %arg1: i32) -> (i32, i32) {
    %c0_i32 = arith.constant 0 : i32
    %c0_i32_0 = arith.constant 0 : i32
    %c0_i32_1 = arith.constant 0 : i32
    return %c0_i32, %c0_i32_0 : i32, i32
  }
  func.func @transform_2(%arg0: i32, %arg1: i32) -> (i32, i32) {
    %c0_i32 = arith.constant 0 : i32
    %c0_i32_0 = arith.constant 0 : i32
    %c0_i32_1 = arith.constant 0 : i32
    return %c0_i32, %c0_i32_0 : i32, i32
  }
  func.func @transform_3(%arg0: i32, %arg1: i32) -> (i32, i32) {
    %c0_i32 = arith.constant 0 : i32
    %c0_i32_0 = arith.constant 0 : i32
    %c0_i32_1 = arith.constant 0 : i32
    return %c0_i32, %c0_i32_0 : i32, i32
  }
  func.func @transform_4(%arg0: i32, %arg1: i32) -> (i32, i32, i32) {
    %c0_i32 = arith.constant 0 : i32
    %c0_i32_0 = arith.constant 0 : i32
    %c0_i32_1 = arith.constant 0 : i32
    %c0_i32_2 = arith.constant 0 : i32
    return %c0_i32, %c0_i32_0, %c0_i32_1 : i32, i32, i32
  }
  func.func @transform_5(%arg0: i32, %arg1: i32) -> (i32, i32) {
    %c0_i32 = arith.constant 0 : i32
    %c0_i32_0 = arith.constant 0 : i32
    %c0_i32_1 = arith.constant 0 : i32
    return %c0_i32, %c0_i32_0 : i32, i32
  }
  func.func @transform_6(%arg0: i32, %arg1: i32) -> (i32, i32) {
    %c0_i32 = arith.constant 0 : i32
    %c0_i32_0 = arith.constant 0 : i32
    %c0_i32_1 = arith.constant 0 : i32
    return %c0_i32, %c0_i32_0 : i32, i32
  }
  func.func @transform_7(%arg0: i32, %arg1: i32) -> (i32, i32) {
    %c0_i32 = arith.constant 0 : i32
    %c0_i32_0 = arith.constant 0 : i32
    %c0_i32_1 = arith.constant 0 : i32
    return %c0_i32, %c0_i32_0 : i32, i32
  }
  func.func @transform_8(%arg0: i32, %arg1: i32) -> (i32, i32) {
    %c0_i32 = arith.constant 0 : i32
    %c0_i32_0 = arith.constant 0 : i32
    %c0_i32_1 = arith.constant 0 : i32
    return %c0_i32, %c0_i32_0 : i32, i32
  }
  func.func @transform_9(%arg0: i32, %arg1: i32) -> (i32, i32) {
    %c0_i32 = arith.constant 0 : i32
    %c0_i32_0 = arith.constant 0 : i32
    %c0_i32_1 = arith.constant 0 : i32
    return %c0_i32, %c0_i32_0 : i32, i32
  }
  func.func @transform_10(%arg0: i32, %arg1: i32) -> (i32, i32) {
    %c0_i32 = arith.constant 0 : i32
    %c0_i32_0 = arith.constant 0 : i32
    return %arg1, %c0_i32 : i32, i32
  }
}

</mosaic_0001>

<bundles_post_ra>
// kernel: tpu_custom_call.1
= control target key start
LH: loop header
LB: loop body
LE: loop exit
PB: predicated region body
PF: predicated region fallthrough
CT: control target
= control target key end

     0   :  { %s7712_s0 = inlined_call_operand.hbm [shape: f32[2,8,8,128], index: 0, kind: input, shape index: {}]   ;;  %s7713_s1 = inlined_call_operand.hbm [shape: f32[128,128], index: 1, kind: input, shape index: {}]   ;;  %s7714_s2 = inlined_call_operand.vmem [shape: f32[1,128], index: 2, kind: input, shape index: {}]   ;;  %s7715_s3 = inlined_call_operand.vmem [shape: f32[1,128], index: 3, kind: input, shape index: {}]   ;;  %s7716_s4 = inlined_call_operand.hbm [shape: f32[9,128,128], index: 4, kind: input, shape index: {}]   ;;  %s7717_s5 = inlined_call_operand.vmem [shape: f32[1,128], index: 5, kind: input, shape index: {}]   ;;  %s7718_s6 = inlined_call_operand.vmem [shape: f32[1,128], index: 6, kind: input, shape index: {}]   ;;  %s7719_s7 = inlined_call_operand.hbm [shape: f32[128,128], index: 7, kind: input, shape index: {}]   ;;  %s7720_s8 = inlined_call_operand.vmem [shape: f32[1,128], index: 8, kind: input, shape index: {}]   ;;  %s7721_s9 = inlined_call_operand.vmem [shape: f32[1,128], index: 9, kind: input, shape index: {}]   ;;  %s7722_s10 = inlined_call_operand.hbm [shape: f32[128,128], index: 10, kind: output, shape index: {}]  }
   0x1   :  { %7730 = sst [smem:[#allocation19_spill]] %s7714_s2 }
   0x2   :  { %7731 = sst [smem:[#allocation20_spill]] %s7715_s3 }
   0x3   :  { %7732 = sst [smem:[#allocation21_spill]] %s7717_s5 }
   0x4   :  { %7733 = sst [smem:[#allocation22_spill]] %s7718_s6 }
   0x5   :  { %7734 = sst [smem:[#allocation23_spill]] %s7720_s8 }
   0x6   :  { %7735 = sst [smem:[#allocation24_spill]] %s7721_s9 }
   0x7   :  { %7736 = sst [smem:[#allocation25_spill]] %s7722_s10 }
   0x8   :  { %15 = vsyncpa [#allocation5], 0 }
   0x9   :  { %17 = vsyncpa [#allocation5 + $0x1], 0 }
   0xa   :  { %18 = vsyncpa [#allocation8], 0 }
   0xb   :  { %19 = vsyncpa [#allocation11], 0 }
   0xc   :  { %20 = vsyncpa [#allocation6], 0 }
   0xd   :  { %22 = vsyncpa [#allocation6 + $0x1], 0  ;;  %s6919_s13 = smov 0   ;;  %s6921_s14 = smov 0  }
   0xe   :  { %s6923_s15 = smov 0   ;;  %s6925_s16 = smov 0  }
   0xf   :  { %s6927_s17 = smov 0   ;;  %s6929_s18 = smov 0  }
  0x10   :  { %s6931_s19 = smov 0   ;;  %s6933_s20 = smov 0  }
  0x11 LB: > { %7737 = sst [smem:[#allocation17_spill]] %s6824_s13  ;;  %s4052_s21 = sadd.s32 4294967295, %s6852_s20   ;;  %s6852_s20 = sphi %s6933_s20, %s28_s20   ;;  %s6848_s19 = sphi %s6931_s19, %s7770_s19   ;;  %s6844_s18 = sphi %s6929_s18, %s7769_s18   ;;  %s6840_s17 = sphi %s6927_s17, %s7768_s17   ;;  %s6836_s16 = sphi %s6925_s16, %s7767_s16   ;;  %s6832_s15 = sphi %s6923_s15, %s7766_s15   ;;  %s6828_s14 = sphi %s6921_s14, %s7765_s14   ;;  %s6824_s13 = sphi %s6919_s13, %s7764_s13  }
  0x12   : > { %s4053_s22 = sadd.s32 4294967294, %s6852_s20   ;;  %p60_p0 = scmp.ne.s32.totalorder %s6828_s14, %s6824_s13 }
  0x13   : > { %p6963_p1 = scmp.eq.s32.totalorder %s4052_s21, 0  ;;  %p6967_p2 = scmp.eq.s32.totalorder %s4052_s21, 5 }
  0x14   : > { %p279_p3 = scmp.eq.s32.totalorder %s4053_s22, 5  ;;  %p4054_p5 = scmp.ge.s32.totalorder %s6852_s20, 1 }
  0x15   : > { %s7738_s23 = scalar_select %p6963_p1, 1, 0 }
  0x16   : > { %s7739_s24 = scalar_select %p6967_p2, 1, 0 }
  0x17   : > { %p6973_p4 = por %p6963_p1, %p60_p0  ;;  %p6978_p6 = por %p279_p3, %p60_p0 }
  0x18   : > { %p286_p7 = scmp.lt.s32.totalorder %s6852_s20, 7  ;;  %s6854_s28 = smov [#allocation7]  }
  0x19   : > { %s7740_s25 = scalar_select %p6973_p4, 1, 0 }
  0x1a   : > { %s7741_s26 = scalar_select %p6978_p6, 1, 0 }
  0x1b   : > { %p6983_p8 = pnand %p4054_p5, %p286_p7  ;;  %s298_s29 = sshll.u32 %s6854_s28, 4  ;;  %s6987_s29 = int_to_ptr.vmem [resolvable:$true] %s298_s29 }
  0x1c   : > { %7742 = sst [smem:[#allocation18_spill]] %s7741_s26  ;;  %s6855_s11 = smov [#allocation9]  }
  0x1d   : > { %s7743_s27 = scalar_select %p6983_p8, 1, 0 }
  0x1e   : > { %p6526_p9 = pneg %p6983_p8  ;;  %s317_s12 = sshll.u32 %s6855_s11, 4  ;;  %s6997_s12 = int_to_ptr.vmem [resolvable:$true] %s317_s12 }
  0x1f   : > { %s6856_s21 = smov [#allocation10]   ;;  %s6632_s28 = scalar_lea.hbm %s7713_s1, 2048 }
  0x20   : > { %p6993_p10 = pnand %p6526_p9, %p6963_p1  ;;  %s6999_s22 = sshll.u32 %s6856_s21, 4  ;;  %s337_s22 = int_to_ptr.vmem [resolvable:$true] %s6999_s22 }
  0x21   : > { %p6633_p11 = scmp.ne.s32.totalorder %s7713_s1, %s6632_s28  ;;  %p6639_p3 = scmp.lt.u32.totalorder %s6632_s28, %s7713_s1 }
  0x22   : > { %p7009_p12 = pneg %p6993_p10 }
  0x24   : > { %p6635_p13 = pnand %p7009_p12, %p6633_p11 }
  0x26   : > { %p6636_p0 = pneg %p6635_p13 }
  0x28   : > { %p6641_p5 = pnand %p6639_p3, %p6636_p0 }
  0x2a   : > { %6644 = shalt.err (!%p6641_p5)
}
  0x2b   : > { %s6645_s6 = scalar_lea.vmem %s6987_s29, 2048  ;;  %p6653_p1 = scmp.lt.s32.totalorder %s6987_s29, %s6987_s29 }
  0x2c   : > { %p6646_p7 = scmp.ne.s32.totalorder %s6987_s29, %s6645_s6  ;;  %p6654_p4 = scmp.lt.s32.totalorder %s6645_s6, %s6645_s6 }
  0x2e   : > { %p6648_p9 = pnand %p6646_p7, %p7009_p12  ;;  %p6655_p11 = por %p6654_p4, %p6653_p1 }
  0x30   : > { %p6649_p6 = pneg %p6648_p9 }
  0x32   : > { %p6656_p13 = pnand %p6655_p11, %p6649_p6 }
  0x34   : > { %6659 = shalt.err (!%p6656_p13)
}
  0x35   : > { %s6857_s10 = smov 128   ;;  %s6858_s13 = smov 8  }
  0x36   : > { %6529 = dma.hbm_to_vmem [thread:$0]  (!%p6993_p10), %s7713_s1, 2048, %s6987_s29, [#allocation8], %s6857_s10, %s6857_s10, %s6858_s13  }
  0x37   : > { %s6660_s6 = scalar_lea.hbm %s7716_s4, 18432 }
  0x38   : > { %p6661_p1 = scmp.ne.s32.totalorder %s7716_s4, %s6660_s6  ;;  %p6667_p0 = scmp.lt.u32.totalorder %s6660_s6, %s7716_s4 }
  0x3a   : > { %p6663_p4 = pnand %p6661_p1, %p7009_p12 }
  0x3c   : > { %p6664_p6 = pneg %p6663_p4 }
  0x3e   : > { %p6669_p3 = pnand %p6667_p0, %p6664_p6 }
  0x40   : > { %6672 = shalt.err (!%p6669_p3)
}
  0x41   : > { %s6673_s29 = scalar_lea.vmem %s6997_s12, 18432  ;;  %p6681_p11 = scmp.lt.s32.totalorder %s6997_s12, %s6997_s12 }
  0x42   : > { %p6674_p5 = scmp.ne.s32.totalorder %s6997_s12, %s6673_s29  ;;  %p6682_p13 = scmp.lt.s32.totalorder %s6673_s29, %s6673_s29 }
  0x44   : > { %p6676_p7 = pnand %p6674_p5, %p7009_p12  ;;  %p6683_p1 = por %p6682_p13, %p6681_p11 }
  0x46   : > { %p6677_p9 = pneg %p6676_p7 }
  0x48   : > { %p6684_p4 = pnand %p6683_p1, %p6677_p9 }
  0x4a   : > { %6687 = shalt.err (!%p6684_p4)
}
  0x4b   : > { %6532 = dma.hbm_to_vmem [thread:$0]  (!%p6993_p10), %s7716_s4, 18432, %s6997_s12, [#allocation8], %s6857_s10, %s6857_s10, %s6858_s13  }
  0x4c   : > { %s6688_s26 = scalar_lea.hbm %s7719_s7, 2048 }
  0x4d   : > { %p6689_p6 = scmp.ne.s32.totalorder %s7719_s7, %s6688_s26  ;;  %p6695_p5 = scmp.lt.u32.totalorder %s6688_s26, %s7719_s7 }
  0x4f   : > { %p6691_p0 = pnand %p6689_p6, %p7009_p12 }
  0x51   : > { %p6692_p3 = pneg %p6691_p0 }
  0x53   : > { %p6697_p7 = pnand %p6695_p5, %p6692_p3 }
  0x55   : > { %6700 = shalt.err (!%p6697_p7)
}
  0x56   : > { %s6701_s29 = scalar_lea.vmem %s337_s22, 2048  ;;  %p6709_p1 = scmp.lt.s32.totalorder %s337_s22, %s337_s22 }
  0x57   : > { %p6702_p9 = scmp.ne.s32.totalorder %s337_s22, %s6701_s29  ;;  %p6710_p4 = scmp.lt.s32.totalorder %s6701_s29, %s6701_s29 }
  0x59   : > { %p6704_p11 = pnand %p6702_p9, %p7009_p12  ;;  %p6711_p8 = por %p6710_p4, %p6709_p1 }
  0x5b   : > { %p6705_p13 = pneg %p6704_p11 }
  0x5d   : > { %p6712_p2 = pnand %p6711_p8, %p6705_p13 }
  0x5f   : > { %6715 = shalt.err (!%p6712_p2)
}
  0x60   : > { %6535 = dma.hbm_to_vmem [thread:$0]  (!%p6993_p10), %s7719_s7, 2048, %s337_s22, [#allocation11], %s6857_s10, %s6857_s10, %s6858_s13  }
  0x61   : > { %s37_s9 = sadd.s32 1, %s6844_s18  ;;  %s40_s30 = sadd.s32 1, %s6848_s19 }
  0x62   : > { %p38_p2 = scmp.ge.s32.totalorder %s37_s9, 2  ;;  %s47_s3 = sadd.s32 1, %s6832_s15 }
  0x63   : > { %p54_p8 = scmp.ne.s32.totalorder %s6832_s15, %s6828_s14  ;;  %p55_p12 = scmp.eq.s32.totalorder %s6852_s20, 0 }
  0x64   : > { %s7772_s9 = smov (%p38_p2, %s37_s9), 0  ;;  %s7774_s30 = smov (!%p38_p2, %s40_s30), %s6848_s19 }
  0x65   : > { %s44_s5 = ssub.s32 %s6844_s18, %s7772_s9  ;;  %p42_p6 = scmp.ge.s32.totalorder %s7774_s30, 3 }
  0x66   : > { %p45_p0 = scmp.eq.s32.totalorder %s44_s5, 0  ;;  %p56_p3 = por %p55_p12, %p54_p8 }
  0x67   : > { %p7746_p5 = scmp.ne.s32.totalorder %s7739_s24, 0  ;;  %s7776_s30 = smov (%p42_p6, %s7774_s30), 0 }
  0x68   : > { %s7101_s8 = scalar_select %p45_p0, %s6832_s15, %s47_s3  }
  0x69   : > { %p7094_p7 = por %p7746_p5, %p54_p8  ;;  %p6547_p10 = scmp.lt.s32.totalorder %s6852_s20, 6 }
  0x6a   : > { %s356_s26 = sand.u32 1, %s6832_s15   ;;  %s4080_s11 = sshll.u32 %s6844_s18, 10 }
  0x6b   : > { %s4059_s28 = sshll.u32 %s356_s26, 6  ;;  %s7109_s29 = scalar_lea.hbm %s7712_s0, %s4080_s11 }
  0x6c   : > { %s360_s24 = scalar_lea.vmem [#allocation4], %s4059_s28  ;;  %p7113_p9 = pnand %p6547_p10, %p56_p3 }
  0x6d   : > { %s367_s12 = sshll.u32 %s360_s24, 4  ;;  %s7117_s3 = scalar_lea.sflag [#allocation5], %s356_s26  ;;  %s7111_s12 = int_to_ptr.vmem [resolvable:$true] %s367_s12 }
  0x6e   : > { %s6716_s5 = scalar_lea.hbm %s7109_s29, 1024  ;;  %p6718_p13 = pneg %p7113_p9 }
  0x6f   : > { %p6717_p11 = scmp.ne.s32.totalorder %s7109_s29, %s6716_s5  ;;  %s6721_s21 = scalar_lea.hbm %s7712_s0, 2048 }
  0x70   : > { %p6722_p2 = scmp.lt.u32.totalorder %s7109_s29, %s7712_s0  ;;  %p6723_p8 = scmp.lt.u32.totalorder %s6721_s21, %s6716_s5 }
  0x71   : > { %p6719_p1 = pnand %p6718_p13, %p6717_p11  ;;  %p6725_p6 = scmp.lt.u32.totalorder %s6716_s5, %s7109_s29 }
  0x72   : > { %p6724_p12 = por %p6723_p8, %p6722_p2 }
  0x73   : > { %p6720_p4 = pneg %p6719_p1 }
  0x74   : > { %p6726_p0 = por %p6725_p6, %p6724_p12 }
  0x76   : > { %p6727_p3 = pnand %p6726_p0, %p6720_p4 }
  0x78   : > { %6730 = shalt.err (!%p6727_p3)
}
  0x79   : > { %s6731_s26 = scalar_lea.vmem %s7111_s12, 1024  ;;  %s6859_s28 = smov [#allocation4]  }
  0x7a   : > { %p6732_p5 = scmp.ne.s32.totalorder %s7111_s12, %s6731_s26  ;;  %s6736_s11 = sshll.u32 %s6859_s28, 4  ;;  %s6737_s11 = int_to_ptr.vmem [resolvable:$false] %s6736_s11 }
  0x7b   : > { %s6738_s6 = scalar_lea.vmem %s6737_s11, 2048  ;;  %p6739_p1 = scmp.lt.s32.totalorder %s7111_s12, %s6737_s11 }
  0x7c   : > { %p6734_p10 = pnand %p6732_p5, %p6718_p13  ;;  %p6740_p2 = scmp.lt.s32.totalorder %s6738_s6, %s6731_s26 }
  0x7e   : > { %p6735_p11 = pneg %p6734_p10  ;;  %p6741_p8 = por %p6740_p2, %p6739_p1 }
  0x80   : > { %p6742_p12 = pnand %p6741_p8, %p6735_p11 }
  0x82   : > { %6745 = shalt.err (!%p6742_p12)
}
  0x83   : > { %6539 = dma.hbm_to_vmem [thread:$0]  (!%p7113_p9), %s7109_s29, 1024, %s7111_s12, %s7117_s3, %s6857_s10, %s6857_s10, %s6858_s13  }
  0x84   : > { %p7749_p13 = scmp.ne.s32.totalorder %s7743_s27, 0 }
  0x85   : > { %s7151_s5 = sand.u32 (!%p7749_p13), 1, %s6828_s14   ;;  %p7750_p4 = scmp.ne.s32.totalorder (!%p7749_p13), %s7740_s25, 0 }
  0x86   : > { %379 = sbr.rel (%p7749_p13) target bundleno = 1773 (0x6ed), region = 60  ;;  %s4063_s21 = sshll.u32 (!%p7749_p13), %s7151_s5, 6 }
  0x87   : > { %s382_s24 = scalar_lea.sflag (!%p7749_p13), [#allocation5], %s7151_s5  ;;  %s7155_s26 = scalar_lea.vmem (!%p7749_p13), [#allocation4], %s4063_s21 }
  0x8d   : > { %6807 = dma.done.wait (%p7750_p4), %s382_s24, 1024  }
  0x8e   : > { %6809 = vsyncadd (%p7750_p4), %s382_s24, 4294966272  ;;  %p7751_p9 = scmp.ne.s32.totalorder %s7738_s23, 0 }
  0x90   : > { %6811 = dma.done.wait (%p7751_p9), [#allocation8], 20480  }
  0x91   : > { %6813 = vsyncadd (%p7751_p9), [#allocation8], 4294946816 }
  0x92   : > { %6815 = dma.done.wait (%p7751_p9), [#allocation11], 2048  }
  0x93   : > { %6817 = vsyncadd (%p7751_p9), [#allocation11], 4294965248  ;;  %p435_p6 = scmp.eq.s32.totalorder %s6840_s17, 0  ;;  %p436_p0 = scmp.eq.s32.totalorder %s6836_s16, 0 }
  0x94   : > { %s7171_s27 = scalar_lea.vmem [#allocation12], %s4063_s21 }
  0x95   : > { %p437_p3 = pnand %p436_p0, %p435_p6 }
  0x96   : > { %v6860_v0 = vmov (!%p437_p3), 0.0  }
  0x97   : > { %440 = sbr.rel (%p437_p3) target bundleno = 164 (0xa4), region = 80  ;;  %442 = vst [vmem:[#allocation2] sm:$0xff] (!%p437_p3), %v6860_v0  ;;  %441 = vst [vmem:[#allocation3] sm:$0xff] (!%p437_p3), %v6860_v0 }
  0x98   : > { %443 = vst [vmem:[#allocation2 + $0x8] sm:$0x3] (!%p437_p3), %v6860_v0  ;;  %445 = vst [vmem:[#allocation2 + $0x90] sm:$0xff] (!%p437_p3), %v6860_v0 }
  0x99   : > { %446 = vst [vmem:[#allocation2 + $0x98] sm:$0x3] (!%p437_p3), %v6860_v0  ;;  %448 = vst [vmem:[#allocation2 + $0x10] sm:$0x1] (!%p437_p3), %v6860_v0 }
  0x9a   : > { %449 = vst [vmem:[#allocation2 + $0x20] sm:$0x1] (!%p437_p3), %v6860_v0  ;;  %450 = vst [vmem:[#allocation2 + $0x30] sm:$0x1] (!%p437_p3), %v6860_v0 }
  0x9b   : > { %451 = vst [vmem:[#allocation2 + $0x40] sm:$0x1] (!%p437_p3), %v6860_v0  ;;  %452 = vst [vmem:[#allocation2 + $0x50] sm:$0x1] (!%p437_p3), %v6860_v0 }
  0x9c   : > { %453 = vst [vmem:[#allocation2 + $0x60] sm:$0x1] (!%p437_p3), %v6860_v0  ;;  %454 = vst [vmem:[#allocation2 + $0x70] sm:$0x1] (!%p437_p3), %v6860_v0 }
  0x9d   : > { %455 = vst [vmem:[#allocation2 + $0x80] sm:$0x1] (!%p437_p3), %v6860_v0  ;;  %458 = vst [vmem:[#allocation2 + $0x19] sm:$0x1] (!%p437_p3), %v6860_v0 }
  0x9e   : > { %459 = vst [vmem:[#allocation2 + $0x29] sm:$0x1] %v6860_v0  ;;  %460 = vst [vmem:[#allocation2 + $0x39] sm:$0x1] %v6860_v0 }
  0x9f   : > { %461 = vst [vmem:[#allocation2 + $0x49] sm:$0x1] %v6860_v0  ;;  %462 = vst [vmem:[#allocation2 + $0x59] sm:$0x1] %v6860_v0 }
  0xa0   : > { %463 = vst [vmem:[#allocation2 + $0x69] sm:$0x1] %v6860_v0  ;;  %464 = vst [vmem:[#allocation2 + $0x79] sm:$0x1] %v6860_v0 }
  0xa1   : > { %465 = vst [vmem:[#allocation2 + $0x89] sm:$0x1] %v6860_v0  ;;  %447 = vst [vmem:[#allocation2] sm:$0x1] %v6860_v0 }
  0xa2   : > { %456 = vst [vmem:[#allocation2 + $0x90] sm:$0x1] %v6860_v0  ;;  %457 = vst [vmem:[#allocation2 + $0x9] sm:$0x1] %v6860_v0 }
  0xa3   : > { %466 = vst [vmem:[#allocation2 + $0x99] sm:$0x1] %v6860_v0 }
  0xa4 PF: > { %v7174_v1 = vld [vmem:[%s7155_s26] sm:$0xff]  ;;  %v7177_v2 = vld [vmem:[%s7155_s26 + $0x8] sm:$0xff]  ;;  %v7180_v3 = vld [vmem:[%s7155_s26 + $0x10] sm:$0xff]  ;;  %p4068_p5 = scmp.ne.s32.totalorder %s6840_s17, 0 }
  0xa5   : > { %v7183_v4 = vld [vmem:[%s7155_s26 + $0x18] sm:$0xff]  ;;  %v7186_v5 = vld [vmem:[%s7155_s26 + $0x20] sm:$0xff]  ;;  %v7189_v6 = vld [vmem:[%s7155_s26 + $0x28] sm:$0xff]  ;;  %4666 = vmatprep.mubr.f32.mxu0 (!%p4068_p5), %v7174_v1  ;;  %4710 = vmatprep.mubr.f32.mxu1 (!%p4068_p5), %v7174_v1 }
  0xa6   : > { %v7192_v7 = vld [vmem:[%s7155_s26 + $0x30] sm:$0xff]  ;;  %v7195_v8 = vld [vmem:[%s7155_s26 + $0x38] sm:$0xff]  ;;  %477 = sbr.rel (%p4068_p5) target bundleno = 449 (0x1c1), region = 84  ;;  %v478_v9 = vld [vmem:[#allocation7] sm:$0xff] (!%p4068_p5) }
  0xa7   : > { %v479_v10 = vld [vmem:[#allocation7 + $0x8] sm:$0xff] (!%p4068_p5)  ;;  %v639_v11 = vld [vmem:[#allocation10] sm:$0xff] (!%p4068_p5)  ;;  %v480_v14 = vld [vmem:[#allocation7 + $0x10] sm:$0xff] (!%p4068_p5) }
  0xa8   : > { %v5646_v12 = vpack.c.bf16 (!%p4068_p5), %v479_v10, %v478_v9  ;;  %v640_v13 = vld [vmem:[#allocation10 + $0x8] sm:$0xff] (!%p4068_p5)  ;;  %v481_v15 = vld [vmem:[#allocation7 + $0x18] sm:$0xff] (!%p4068_p5)  ;;  %v641_v18 = vld [vmem:[#allocation10 + $0x10] sm:$0xff] (!%p4068_p5) }
  0xa9   : > { %v5678_v16 = vpack.c.bf16 (!%p4068_p5), %v640_v13, %v639_v11  ;;  %v5650_v17 = vpack.c.bf16 (!%p4068_p5), %v481_v15, %v480_v14  ;;  %v642_v19 = vld [vmem:[#allocation10 + $0x18] sm:$0xff] (!%p4068_p5)  ;;  %v482_v20 = vld [vmem:[#allocation7 + $0x20] sm:$0xff] (!%p4068_p5)  ;;  %v483_v22 = vld [vmem:[#allocation7 + $0x28] sm:$0xff] (!%p4068_p5) }
  0xaa   : > { %5647 = vmatprep.subr.bf16.mxu0 (!%p4068_p5), %v5646_v12  ;;  %v5682_v21 = vpack.c.bf16 (!%p4068_p5), %v642_v19, %v641_v18  ;;  %v643_v23 = vld [vmem:[#allocation10 + $0x20] sm:$0xff] (!%p4068_p5)  ;;  %v644_v24 = vld [vmem:[#allocation10 + $0x28] sm:$0xff] (!%p4068_p5)  ;;  %v5654_v25 = vpack.c.bf16 (!%p4068_p5), %v483_v22, %v482_v20  ;;  %v484_v27 = vld [vmem:[#allocation7 + $0x30] sm:$0xff] (!%p4068_p5) }
  0xab   : > { %5679 = vmatprep.subr.bf16.mxu1 (!%p4068_p5), %v5678_v16  ;;  %5649 = vmatpush3.bf16.msra.mxu0 (!%p4068_p5), %v5646_v12  ;;  %v5686_v26 = vpack.c.bf16 (!%p4068_p5), %v644_v24, %v643_v23  ;;  %v485_v28 = vld [vmem:[#allocation7 + $0x38] sm:$0xff] (!%p4068_p5)  ;;  %v645_v29 = vld [vmem:[#allocation10 + $0x30] sm:$0xff] (!%p4068_p5)  ;;  %v486_v33 = vld [vmem:[#allocation7 + $0x40] sm:$0xff] (!%p4068_p5) }
  0xac   : > { %5681 = vmatpush3.bf16.msra.mxu1 (!%p4068_p5), %v5678_v16  ;;  %5651 = vmatprep.subr.bf16.mxu0 (!%p4068_p5), %v5650_v17  ;;  %v646_v30 = vld [vmem:[#allocation10 + $0x38] sm:$0xff] (!%p4068_p5)  ;;  %v5658_v31 = vpack.c.bf16 (!%p4068_p5), %v485_v28, %v484_v27  ;;  %v487_v34 = vld [vmem:[#allocation7 + $0x48] sm:$0xff] (!%p4068_p5)  ;;  %v647_v35 = vld [vmem:[#allocation10 + $0x40] sm:$0xff] (!%p4068_p5) }
  0xad   : > { %5683 = vmatprep.subr.bf16.mxu1 %v5682_v21  ;;  %v5690_v32 = vpack.c.bf16 %v646_v30, %v645_v29  ;;  %v648_v36 = vld [vmem:[#allocation10 + $0x48] sm:$0xff]  ;;  %v5662_v37 = vpack.c.bf16 %v487_v34, %v486_v33  ;;  %v488_v39 = vld [vmem:[#allocation7 + $0x50] sm:$0xff]  ;;  %v489_v40 = vld [vmem:[#allocation7 + $0x58] sm:$0xff] }
  0xae   : > { %v5694_v38 = vpack.c.bf16 %v648_v36, %v647_v35  ;;  %v649_v41 = vld [vmem:[#allocation10 + $0x50] sm:$0xff]  ;;  %v650_v42 = vld [vmem:[#allocation10 + $0x58] sm:$0xff]  ;;  %v5666_v43 = vpack.c.bf16 %v489_v40, %v488_v39  ;;  %v490_v45 = vld [vmem:[#allocation7 + $0x60] sm:$0xff] }
  0xaf   : > { %5653 = vmatpush3.bf16.msra.mxu0 %v5650_v17  ;;  %v5698_v44 = vpack.c.bf16 %v650_v42, %v649_v41  ;;  %v491_v46 = vld [vmem:[#allocation7 + $0x68] sm:$0xff]  ;;  %v651_v47 = vld [vmem:[#allocation10 + $0x60] sm:$0xff]  ;;  %v492_v51 = vld [vmem:[#allocation7 + $0x70] sm:$0xff] }
  0xb0   : > { %5685 = vmatpush3.bf16.msra.mxu1 %v5682_v21  ;;  %5655 = vmatprep.subr.bf16.mxu0 %v5654_v25  ;;  %v652_v48 = vld [vmem:[#allocation10 + $0x68] sm:$0xff]  ;;  %v5670_v49 = vpack.c.bf16 %v491_v46, %v490_v45  ;;  %v493_v52 = vld [vmem:[#allocation7 + $0x78] sm:$0xff]  ;;  %v653_v53 = vld [vmem:[#allocation10 + $0x70] sm:$0xff] }
  0xb1   : > { %5687 = vmatprep.subr.bf16.mxu1 %v5686_v26  ;;  %v5702_v50 = vpack.c.bf16 %v652_v48, %v651_v47  ;;  %v654_v54 = vld [vmem:[#allocation10 + $0x78] sm:$0xff]  ;;  %v5674_v55 = vpack.c.bf16 %v493_v52, %v492_v51 }
  0xb2   : > { %v5706_v56 = vpack.c.bf16 %v654_v54, %v653_v53 }
  0xb3   : > { %5657 = vmatpush3.bf16.msra.mxu0 %v5654_v25 }
  0xb4   : > { %5689 = vmatpush3.bf16.msra.mxu1 %v5686_v26  ;;  %5659 = vmatprep.subr.bf16.mxu0 %v5658_v31 }
  0xb5   : > { %5691 = vmatprep.subr.bf16.mxu1 %v5690_v32 }
  0xb7   : > { %5661 = vmatpush3.bf16.msra.mxu0 %v5658_v31 }
  0xb8   : > { %5693 = vmatpush3.bf16.msra.mxu1 %v5690_v32  ;;  %5663 = vmatprep.subr.bf16.mxu0 %v5662_v37 }
  0xb9   : > { %5695 = vmatprep.subr.bf16.mxu1 %v5694_v38 }
  0xbb   : > { %5665 = vmatpush3.bf16.msra.mxu0 %v5662_v37 }
  0xbc   : > { %5697 = vmatpush3.bf16.msra.mxu1 %v5694_v38  ;;  %5667 = vmatprep.subr.bf16.mxu0 %v5666_v43 }
  0xbd   : > { %5699 = vmatprep.subr.bf16.mxu1 %v5698_v44 }
  0xbf   : > { %5669 = vmatpush3.bf16.msra.mxu0 %v5666_v43 }
  0xc0   : > { %5701 = vmatpush3.bf16.msra.mxu1 %v5698_v44  ;;  %5671 = vmatprep.subr.bf16.mxu0 %v5670_v49 }
  0xc1   : > { %5703 = vmatprep.subr.bf16.mxu1 %v5702_v50 }
  0xc3   : > { %5673 = vmatpush3.bf16.msra.mxu0 %v5670_v49 }
  0xc4   : > { %5705 = vmatpush3.bf16.msra.mxu1 %v5702_v50  ;;  %5675 = vmatprep.subr.bf16.mxu0 %v5674_v55 }
  0xc5   : > { %5707 = vmatprep.subr.bf16.mxu1 %v5706_v56 }
  0xc7   : > { %5677 = vmatpush3.bf16.msra.mxu0 %v5674_v55 }
  0xc8   : > { %5709 = vmatpush3.bf16.msra.mxu1 %v5706_v56 }
  0xca   : > { %4667 = vmatmul.mubr.f32.vlgmr.msra.gmra.mrb[0].mxu0 %v7177_v2 }
  0xcb   : > { %4711 = vmatmul.mubr.f32.vlgmr.msra.gmra.mrb[0].mxu1 %v7177_v2  ;;  %4669 = vmatprep.mubr.f32.mxu0 %v7180_v3 }
  0xcc   : > { %4713 = vmatprep.mubr.f32.mxu1 %v7180_v3 }
  0xce   : > { %4670 = vmatmul.mubr.f32.gmra.mrb[2].mxu0 %v7183_v4 }
  0xcf   : > { %4714 = vmatmul.mubr.f32.gmra.mrb[2].mxu1 %v7183_v4  ;;  %4672 = vmatprep.mubr.f32.mxu0 %v7186_v5 }
  0xd0   : > { %4716 = vmatprep.mubr.f32.mxu1 %v7186_v5 }
  0xd2   : > { %4673 = vmatmul.mubr.f32.gmra.mrb[4].mxu0 %v7189_v6 }
  0xd3   : > { %4717 = vmatmul.mubr.f32.gmra.mrb[4].mxu1 %v7189_v6  ;;  %4675 = vmatprep.mubr.f32.mxu0 %v7192_v7 }
  0xd4   : > { %4719 = vmatprep.mubr.f32.mxu1 %v7192_v7 }
  0xd6   : > { %4676 = vmatmul.mubr.f32.gmra.mrb[6].mxu0 %v7195_v8 }
  0xd7   : > { %4720 = vmatmul.mubr.f32.gmra.mrb[6].mxu1 %v7195_v8 }
 0x19d   : > { %v4668_v57 = vpop.f32.mrb[0].mxu0 }
 0x19e   : > { %v617_v58 = vmul.f32 %v4668_v57, %v4668_v57  ;;  %v4712_v59 = vpop.f32.mrb[0].mxu1  ;;  %v560_v60 = vpop.f32.mrb[1].mxu0 }
 0x19f   : > { %v778_v61 = vmul.f32 %v4712_v59, %v4712_v59  ;;  %v600_v62 = vadd.f32 %v4668_v57, %v560_v60  ;;  %v616_v63 = vmul.f32 %v560_v60, %v560_v60  ;;  %v721_v0 = vpop.f32.mrb[1].mxu1 }
 0x1a0   : > { %v761_v9 = vadd.f32 %v4712_v59, %v721_v0  ;;  %v777_v10 = vmul.f32 %v721_v0, %v721_v0 }
 0x1a1   : > { %v624_v11 = vadd.f32 %v617_v58, %v616_v63  ;;  %v4671_v12 = vpop.f32.mrb[2].mxu0 }
 0x1a2   : > { %v785_v13 = vadd.f32 %v778_v61, %v777_v10  ;;  %v4715_v14 = vpop.f32.mrb[2].mxu1  ;;  %v570_v15 = vpop.f32.mrb[3].mxu0  ;;  %v619_v21 = vmul.f32 %v4671_v12, %v4671_v12 }
 0x1a3   : > { %v601_v16 = vadd.f32 %v600_v62, %v570_v15  ;;  %v618_v17 = vmul.f32 %v570_v15, %v570_v15  ;;  %v731_v18 = vpop.f32.mrb[3].mxu1  ;;  %v780_v25 = vmul.f32 %v4715_v14, %v4715_v14 }
 0x1a4   : > { %v762_v19 = vadd.f32 %v761_v9, %v731_v18  ;;  %v779_v20 = vmul.f32 %v731_v18, %v731_v18 }
 0x1a5   : > { %v625_v22 = vadd.f32 %v624_v11, %v618_v17  ;;  %v4674_v23 = vpop.f32.mrb[4].mxu0  ;;  %v602_v24 = vadd.f32 %v4671_v12, %v601_v16 }
 0x1a6   : > { %v786_v26 = vadd.f32 %v785_v13, %v779_v20  ;;  %v4718_v27 = vpop.f32.mrb[4].mxu1  ;;  %v580_v28 = vpop.f32.mrb[5].mxu0  ;;  %v763_v29 = vadd.f32 %v4715_v14, %v762_v19  ;;  %v621_v37 = vmul.f32 %v4674_v23, %v4674_v23 }
 0x1a7   : > { %v603_v30 = vadd.f32 %v602_v24, %v580_v28  ;;  %v620_v31 = vmul.f32 %v580_v28, %v580_v28  ;;  %v626_v32 = vadd.f32 %v625_v22, %v619_v21  ;;  %v741_v33 = vpop.f32.mrb[5].mxu1  ;;  %v782_v41 = vmul.f32 %v4718_v27, %v4718_v27  ;;  %v599_v21 = vld [vmem:[#allocation3] sm:$0x1] }
 0x1a8   : > { %v764_v34 = vadd.f32 %v763_v29, %v741_v33  ;;  %v781_v35 = vmul.f32 %v741_v33, %v741_v33  ;;  %v787_v36 = vadd.f32 %v786_v26, %v780_v25  ;;  %v760_v26 = vld [vmem:[#allocation3 + $0x4] sm:$0x1] }
 0x1a9   : > { %v627_v38 = vadd.f32 %v626_v32, %v620_v31  ;;  %v4677_v39 = vpop.f32.mrb[6].mxu0  ;;  %v604_v40 = vadd.f32 %v4674_v23, %v603_v30  ;;  %v776_v32 = vld [vmem:[#allocation3 + $0x5] sm:$0x1] }
 0x1aa   : > { %v788_v42 = vadd.f32 %v787_v36, %v781_v35  ;;  %v4721_v43 = vpop.f32.mrb[6].mxu1  ;;  %v590_v44 = vpop.f32.mrb[7].mxu0  ;;  %v765_v45 = vadd.f32 %v4718_v27, %v764_v34  ;;  %v623_v53 = vmul.f32 %v4677_v39, %v4677_v39  ;;  %v615_v27 = vld [vmem:[#allocation3 + $0x1] sm:$0x1] }
 0x1ab   : > { %v605_v46 = vadd.f32 %v604_v40, %v590_v44  ;;  %v622_v47 = vmul.f32 %v590_v44, %v590_v44  ;;  %v628_v48 = vadd.f32 %v627_v38, %v621_v37  ;;  %v751_v49 = vpop.f32.mrb[7].mxu1  ;;  %v784_v56 = vmul.f32 %v4721_v43, %v4721_v43 }
 0x1ac   : > { %v766_v50 = vadd.f32 %v765_v45, %v751_v49  ;;  %v783_v51 = vmul.f32 %v751_v49, %v751_v49  ;;  %v789_v52 = vadd.f32 %v788_v42, %v782_v41 }
 0x1ad   : > { %v606_v54 = vadd.f32 %v4677_v39, %v605_v46  ;;  %v629_v55 = vadd.f32 %v628_v48, %v622_v47 }
 0x1ae   : > { %v767_v57 = vadd.f32 %v4721_v43, %v766_v50  ;;  %v790_v58 = vadd.f32 %v789_v52, %v783_v51 }
 0x1af   : > { %v607_v59 = vrot.slane %v606_v54, 4  ;;  %v630_v60 = vadd.f32 %v629_v55, %v623_v53 }
 0x1b0   : > { %v768_v61 = vrot.slane %v767_v57, 4  ;;  %v791_v62 = vadd.f32 %v790_v58, %v784_v56 }
 0x1b1   : > { %v608_v63 = vadd.f32 %v607_v59, %v606_v54  ;;  %v631_v0 = vrot.slane %v630_v60, 4 }
 0x1b2   : > { %v769_v9 = vadd.f32 %v768_v61, %v767_v57  ;;  %v792_v10 = vrot.slane %v791_v62, 4 }
 0x1b3   : > { %v609_v11 = vrot.slane %v608_v63, 2  ;;  %v632_v12 = vadd.f32 %v631_v0, %v630_v60 }
 0x1b4   : > { %v770_v13 = vrot.slane %v769_v9, 2  ;;  %v793_v14 = vadd.f32 %v792_v10, %v791_v62 }
 0x1b5   : > { %v610_v15 = vadd.f32 %v609_v11, %v608_v63  ;;  %v633_v16 = vrot.slane %v632_v12, 2 }
 0x1b6   : > { %v771_v17 = vadd.f32 %v770_v13, %v769_v9  ;;  %v794_v18 = vrot.slane %v793_v14, 2 }
 0x1b7   : > { %v611_v19 = vrot.slane %v610_v15, 1  ;;  %v634_v20 = vadd.f32 %v633_v16, %v632_v12 }
 0x1b8   : > { %v772_v22 = vrot.slane %v771_v17, 1  ;;  %v795_v23 = vadd.f32 %v794_v18, %v793_v14 }
 0x1b9   : > { %v612_v24 = vadd.f32 %v611_v19, %v610_v15  ;;  %v635_v25 = vrot.slane %v634_v20, 1 }
 0x1ba   : > { %v773_v28 = vadd.f32 %v772_v22, %v771_v17  ;;  %v796_v29 = vrot.slane %v795_v23, 1 }
 0x1bb   : > { %v613_v30 = vadd.f32 %v612_v24, %v599_v21  ;;  %v636_v31 = vadd.f32 %v635_v25, %v634_v20 }
 0x1bc   : > { %v774_v33 = vadd.f32 %v773_v28, %v760_v26  ;;  %v797_v34 = vadd.f32 %v796_v29, %v795_v23 }
 0x1bd   : > { %614 = vst [vmem:[#allocation3] sm:$0x1] %v613_v30  ;;  %v637_v35 = vadd.f32 %v636_v31, %v615_v27 }
 0x1be   : > { %775 = vst [vmem:[#allocation3 + $0x4] sm:$0x1] %v774_v33  ;;  %v798_v36 = vadd.f32 %v797_v34, %v776_v32 }
 0x1bf   : > { %638 = vst [vmem:[#allocation3 + $0x1] sm:$0x1] %v637_v35 }
 0x1c0   : > { %799 = vst [vmem:[#allocation3 + $0x5] sm:$0x1] %v798_v36 }
 0x1c1 PF: > { %p4069_p10 = scmp.ne.s32.totalorder %s6840_s17, 1 }
 0x1c2   : > { %v804_v37 = vld [vmem:[#allocation7] sm:$0xff] (!%p4069_p10)  ;;  %v805_v38 = vld [vmem:[#allocation7 + $0x8] sm:$0xff] (!%p4069_p10)  ;;  %v806_v39 = vld [vmem:[#allocation7 + $0x10] sm:$0xff] (!%p4069_p10)  ;;  %4754 = vmatprep.mubr.f32.mxu0 (!%p4069_p10), %v7174_v1  ;;  %s7752_s10 = sld [smem:[#allocation19_spill]] (!%p4069_p10)  ;;  %s7753_s12 = sld [smem:[#allocation20_spill]] (!%p4069_p10) }
 0x1c3   : > { %803 = sbr.rel (%p4069_p10) target bundleno = 1084 (0x43c), region = 88  ;;  %v5710_v40 = vpack.c.bf16 (!%p4069_p10), %v805_v38, %v804_v37  ;;  %v807_v41 = vld [vmem:[#allocation7 + $0x18] sm:$0xff] (!%p4069_p10)  ;;  %v808_v43 = vld [vmem:[#allocation7 + $0x20] sm:$0xff] (!%p4069_p10)  ;;  %v809_v44 = vld [vmem:[#allocation7 + $0x28] sm:$0xff] (!%p4069_p10) }
 0x1c4   : > { %v5714_v42 = vpack.c.bf16 (!%p4069_p10), %v807_v41, %v806_v39  ;;  %v5718_v45 = vpack.c.bf16 (!%p4069_p10), %v809_v44, %v808_v43  ;;  %v810_v46 = vld [vmem:[#allocation7 + $0x30] sm:$0xff] (!%p4069_p10)  ;;  %v811_v47 = vld [vmem:[#allocation7 + $0x38] sm:$0xff] (!%p4069_p10)  ;;  %v1537_v48 = vld [vmem:[#allocation9 + $0x200] sm:$0xff] (!%p4069_p10) }
 0x1c5   : > { %5711 = vmatprep.subr.bf16.mxu0 (!%p4069_p10), %v5710_v40  ;;  %v1538_v49 = vld [vmem:[#allocation9 + $0x208] sm:$0xff] (!%p4069_p10)  ;;  %v1539_v51 = vld [vmem:[#allocation9 + $0x210] sm:$0xff] (!%p4069_p10)  ;;  %v1540_v52 = vld [vmem:[#allocation9 + $0x218] sm:$0xff] (!%p4069_p10)  ;;  %v5722_v55 = vpack.c.bf16 (!%p4069_p10), %v811_v47, %v810_v46 }
 0x1c6   : > { %5713 = vmatpush3.bf16.msra.mxu0 (!%p4069_p10), %v5710_v40  ;;  %v5870_v50 = vpack.c.bf16 (!%p4069_p10), %v1538_v49, %v1537_v48  ;;  %v5874_v53 = vpack.c.bf16 (!%p4069_p10), %v1540_v52, %v1539_v51  ;;  %v1541_v54 = vld [vmem:[#allocation9 + $0x220] sm:$0xff] (!%p4069_p10)  ;;  %v1542_v56 = vld [vmem:[#allocation9 + $0x228] sm:$0xff] (!%p4069_p10)  ;;  %v1543_v60 = vld [vmem:[#allocation9 + $0x230] sm:$0xff] (!%p4069_p10) }
 0x1c7   : > { %5715 = vmatprep.subr.bf16.mxu0 (!%p4069_p10), %v5714_v42  ;;  %v812_v57 = vld [vmem:[#allocation7 + $0x40] sm:$0xff] (!%p4069_p10)  ;;  %v813_v58 = vld [vmem:[#allocation7 + $0x48] sm:$0xff] (!%p4069_p10)  ;;  %v5878_v59 = vpack.c.bf16 (!%p4069_p10), %v1542_v56, %v1541_v54  ;;  %v1544_v61 = vld [vmem:[#allocation9 + $0x238] sm:$0xff] (!%p4069_p10) }
 0x1c8   : > { %5871 = vmatprep.subr.bf16.mxu1 (!%p4069_p10), %v5870_v50  ;;  %v5726_v62 = vpack.c.bf16 (!%p4069_p10), %v813_v58, %v812_v57  ;;  %v814_v63 = vld [vmem:[#allocation7 + $0x50] sm:$0xff] (!%p4069_p10)  ;;  %v815_v0 = vld [vmem:[#allocation7 + $0x58] sm:$0xff] (!%p4069_p10)  ;;  %v5882_v9 = vpack.c.bf16 (!%p4069_p10), %v1544_v61, %v1543_v60  ;;  %v816_v11 = vld [vmem:[#allocation7 + $0x60] sm:$0xff] (!%p4069_p10) }
 0x1c9   : > { %5873 = vmatpush3.bf16.msra.mxu1 (!%p4069_p10), %v5870_v50  ;;  %v5730_v10 = vpack.c.bf16 (!%p4069_p10), %v815_v0, %v814_v63  ;;  %v817_v12 = vld [vmem:[#allocation7 + $0x68] sm:$0xff] (!%p4069_p10)  ;;  %v818_v14 = vld [vmem:[#allocation7 + $0x70] sm:$0xff] (!%p4069_p10)  ;;  %v819_v15 = vld [vmem:[#allocation7 + $0x78] sm:$0xff] (!%p4069_p10) }
 0x1ca   : > { %5717 = vmatpush3.bf16.msra.mxu0 %v5714_v42  ;;  %5875 = vmatprep.subr.bf16.mxu1 %v5874_v53  ;;  %v5734_v13 = vpack.c.bf16 %v817_v12, %v816_v11  ;;  %v5738_v16 = vpack.c.bf16 %v819_v15, %v818_v14  ;;  %v1026_v17 = vld [vmem:[#allocation9 + $0x80] sm:$0xff]  ;;  %v1027_v18 = vld [vmem:[#allocation9 + $0x88] sm:$0xff]  ;;  %v1028_v20 = vld [vmem:[#allocation9 + $0x90] sm:$0xff]  ;;  %v935_v11 = vlaneseq }
 0x1cb   : > { %5719 = vmatprep.subr.bf16.mxu0 %v5718_v45  ;;  %v5742_v19 = vpack.c.bf16 %v1027_v18, %v1026_v17  ;;  %v1029_v21 = vld [vmem:[#allocation9 + $0x98] sm:$0xff]  ;;  %v1030_v23 = vld [vmem:[#allocation9 + $0xa0] sm:$0xff]  ;;  %v1031_v24 = vld [vmem:[#allocation9 + $0xa8] sm:$0xff] }
 0x1cc   : > { %v5746_v22 = vpack.c.bf16 %v1029_v21, %v1028_v20  ;;  %v5750_v25 = vpack.c.bf16 %v1031_v24, %v1030_v23  ;;  %v1032_v26 = vld [vmem:[#allocation9 + $0xb0] sm:$0xff]  ;;  %v1033_v27 = vld [vmem:[#allocation9 + $0xb8] sm:$0xff]  ;;  %v1034_v29 = vld [vmem:[#allocation9 + $0xc0] sm:$0xff]  ;;  %v936_v12 = vshrl.u32 %v935_v11, 7 }
 0x1cd   : > { %5877 = vmatpush3.bf16.msra.mxu1 %v5874_v53  ;;  %v5754_v28 = vpack.c.bf16 %v1033_v27, %v1032_v26  ;;  %v1035_v30 = vld [vmem:[#allocation9 + $0xc8] sm:$0xff]  ;;  %v1545_v32 = vld [vmem:[#allocation9 + $0x240] sm:$0xff]  ;;  %v1036_v35 = vld [vmem:[#allocation9 + $0xd0] sm:$0xff] }
 0x1ce   : > { %5721 = vmatpush3.bf16.msra.mxu0 %v5718_v45  ;;  %5879 = vmatprep.subr.bf16.mxu1 %v5878_v59  ;;  %v5758_v31 = vpack.c.bf16 %v1035_v30, %v1034_v29  ;;  %v1546_v33 = vld [vmem:[#allocation9 + $0x248] sm:$0xff]  ;;  %v1037_v36 = vld [vmem:[#allocation9 + $0xd8] sm:$0xff]  ;;  %v1547_v38 = vld [vmem:[#allocation9 + $0x250] sm:$0xff]  ;;  %v937_v15 = vsub.s32 0, %v936_v12 }
 0x1cf   : > { %5723 = vmatprep.subr.bf16.mxu0 %v5722_v55  ;;  %v5886_v34 = vpack.c.bf16 %v1546_v33, %v1545_v32  ;;  %v5762_v37 = vpack.c.bf16 %v1037_v36, %v1036_v35  ;;  %v1548_v39 = vld [vmem:[#allocation9 + $0x258] sm:$0xff]  ;;  %v1038_v41 = vld [vmem:[#allocation9 + $0xe0] sm:$0xff]  ;;  %v1039_v42 = vld [vmem:[#allocation9 + $0xe8] sm:$0xff] }
 0x1d0   : > { %v5890_v40 = vpack.c.bf16 %v1548_v39, %v1547_v38  ;;  %v5766_v43 = vpack.c.bf16 %v1039_v42, %v1038_v41  ;;  %v1549_v44 = vld [vmem:[#allocation9 + $0x260] sm:$0xff]  ;;  %v1550_v45 = vld [vmem:[#allocation9 + $0x268] sm:$0xff]  ;;  %v1040_v47 = vld [vmem:[#allocation9 + $0xf0] sm:$0xff] }
 0x1d1   : > { %5881 = vmatpush3.bf16.msra.mxu1 %v5878_v59  ;;  %v5894_v46 = vpack.c.bf16 %v1550_v45, %v1549_v44  ;;  %v1041_v48 = vld [vmem:[#allocation9 + $0xf8] sm:$0xff]  ;;  %v1551_v50 = vld [vmem:[#allocation9 + $0x270] sm:$0xff]  ;;  %v1001_v53 = vld [vmem:[#allocation9] sm:$0xff] }
 0x1d2   : > { %5725 = vmatpush3.bf16.msra.mxu0 %v5722_v55  ;;  %5883 = vmatprep.subr.bf16.mxu1 %v5882_v9  ;;  %v5770_v49 = vpack.c.bf16 %v1041_v48, %v1040_v47  ;;  %v1552_v51 = vld [vmem:[#allocation9 + $0x278] sm:$0xff]  ;;  %v1002_v54 = vld [vmem:[#allocation9 + $0x8] sm:$0xff]  ;;  %v1675_v57 = vld [vmem:[#allocation9 + $0x280] sm:$0xff] }
 0x1d3   : > { %5727 = vmatprep.subr.bf16.mxu0 %v5726_v62  ;;  %v5898_v52 = vpack.c.bf16 %v1552_v51, %v1551_v50  ;;  %v5774_v55 = vpack.c.bf16 %v1002_v54, %v1001_v53  ;;  %v1017_v56 = vld [vmem:[#allocation2 + $0x1] sm:$0xff]  ;;  %v1676_v58 = vld [vmem:[#allocation9 + $0x288] sm:$0xff]  ;;  %v925_v60 = vld [vmem:[#allocation3] sm:$0x1] }
 0x1d4   : > { %v7223_v59 = vpack.c.bf16 %v1676_v58, %v1675_v57  ;;  %v926_v61 = vmul.f32 0.0078125, %v925_v60  ;;  %v931_v14 = vld [vmem:[%s7752_s10] sm:$0x1]  ;;  %v1003_v30 = vld [vmem:[#allocation9 + $0x10] sm:$0xff]  ;;  %v1005_v45 = vld [vmem:[#allocation9 + $0x20] sm:$0xff] }
 0x1d5   : > { %5885 = vmatpush3.bf16.msra.mxu1 %v5882_v9  ;;  %v1677_v36 = vld [vmem:[#allocation9 + $0x290] sm:$0xff]  ;;  %v1680_v53 = vld [vmem:[#allocation9 + $0x2a8] sm:$0xff] }
 0x1d6   : > { %5729 = vmatpush3.bf16.msra.mxu0 %v5726_v62  ;;  %5887 = vmatprep.subr.bf16.mxu1 %v5886_v34  ;;  %v927_v62 = vld [vmem:[#allocation3 + $0x1] sm:$0x1]  ;;  %v929_v0 = vmul.f32 %v926_v61, %v926_v61  ;;  %v7229_v17 = vrot.slane %v926_v61, %v937_v15 }
 0x1d7   : > { %5731 = vmatprep.subr.bf16.mxu0 %v5730_v10  ;;  %v928_v63 = vmul.f32 0.0078125, %v927_v62  ;;  %v1007_v62 = vld [vmem:[#allocation9 + $0x30] sm:$0xff] }
 0x1d9   : > { %5889 = vmatpush3.bf16.msra.mxu1 %v5886_v34  ;;  %v930_v9 = vsub.f32 %v928_v63, %v929_v0  ;;  %v1008_v63 = vld [vmem:[#allocation9 + $0x38] sm:$0xff] }
 0x1da   : > { %5733 = vmatpush3.bf16.msra.mxu0 %v5730_v10  ;;  %5891 = vmatprep.subr.bf16.mxu1 %v5890_v40 }
 0x1db   : > { %5735 = vmatprep.subr.bf16.mxu0 %v5734_v13  ;;  %v932_v10 = vadd.f32 1e-05, %v930_v9 }
 0x1dd   : > { %5893 = vmatpush3.bf16.msra.mxu1 %v5890_v40  ;;  %6624 = vrsqrt.f32 %v932_v10 }
 0x1de   : > { %5737 = vmatpush3.bf16.msra.mxu0 %v5734_v13  ;;  %5895 = vmatprep.subr.bf16.mxu1 %v5894_v46 }
 0x1df   : > { %5739 = vmatprep.subr.bf16.mxu0 %v5738_v16 }
 0x1e1   : > { %5897 = vmatpush3.bf16.msra.mxu1 %v5894_v46  ;;  %v1006_v46 = vld [vmem:[#allocation9 + $0x28] sm:$0xff] }
 0x1e2   : > { %5741 = vmatpush3.bf16.msra.mxu0 %v5738_v16  ;;  %5899 = vmatprep.subr.bf16.mxu1 %v5898_v52  ;;  %v5782_v58 = vpack.c.bf16 %v1006_v46, %v1005_v45  ;;  %v1689_v45 = vld [vmem:[#allocation9 + $0x2f0] sm:$0xff]  ;;  %v1690_v46 = vld [vmem:[#allocation9 + $0x2f8] sm:$0xff] }
 0x1e3   : > { %5743 = vmatprep.subr.bf16.mxu0 %v5742_v19 }
 0x1e5   : > { %4755 = vmatmul.mubr.f32.vlgmr.msra.gmra.mrb[0].mxu0 %v7177_v2  ;;  %5901 = vmatpush3.bf16.msra.mxu1 %v5898_v52  ;;  %v1679_v52 = vld [vmem:[#allocation9 + $0x2a0] sm:$0xff] }
 0x1e6   : > { %4757 = vmatprep.mubr.f32.mxu0 %v7180_v3  ;;  %5745 = vmatpush3.bf16.msra.mxu0 %v5742_v19  ;;  %v5910_v10 = vpack.c.bf16 %v1680_v53, %v1679_v52  ;;  %v1814_v52 = vld [vmem:[#allocation9 + $0x300] sm:$0xff]  ;;  %v1815_v53 = vld [vmem:[#allocation9 + $0x308] sm:$0xff] }
 0x1e7   : > { %5747 = vmatprep.subr.bf16.mxu0 %v5746_v22  ;;  %5903 = vmatprep.subr.bf16.mxu1 %v7223_v59  ;;  %v6625_v13 = vpop.eup %6624 }
 0x1e8   : > { %v934_v16 = vmul.f32 %v6625_v13, %v931_v14  ;;  %v1681_v13 = vld [vmem:[#allocation9 + $0x2b0] sm:$0xff]  ;;  %v1682_v14 = vld [vmem:[#allocation9 + $0x2b8] sm:$0xff] }
 0x1e9   : > { %4758 = vmatmul.mubr.f32.gmra.mrb[2].mxu0 %v7183_v4 }
 0x1ea   : > { %4760 = vmatprep.mubr.f32.mxu0 %v7186_v5  ;;  %5749 = vmatpush3.bf16.msra.mxu0 %v5746_v22  ;;  %v7231_v18 = vrot.slane %v934_v16, %v937_v15  ;;  %v7237_v22 = vld [vmem:[%s7753_s12] ss:$0 sm:$0xff]  ;;  %v5786_v16 = vpack.c.bf16 %v1008_v63, %v1007_v62 }
 0x1eb   : > { %5751 = vmatprep.subr.bf16.mxu0 %v5750_v25 }
 0x1ed   : > { %4761 = vmatmul.mubr.f32.gmra.mrb[4].mxu0 %v7189_v6 }
 0x1ee   : > { %4763 = vmatprep.mubr.f32.mxu0 %v7192_v7  ;;  %5753 = vmatpush3.bf16.msra.mxu0 %v5750_v25 }
 0x1ef   : > { %5755 = vmatprep.subr.bf16.mxu0 %v5754_v28 }
 0x1f1   : > { %4764 = vmatmul.mubr.f32.gmra.mrb[6].mxu0 %v7195_v8 }
 0x1f2   : > { %5757 = vmatpush3.bf16.msra.mxu0 %v5754_v28  ;;  %4798 = vmatprep.mubr.f32.mxu0 %v1017_v56 }
 0x1f3   : > { %5759 = vmatprep.subr.bf16.mxu0 %v5758_v31 }
 0x1f6   : > { %5761 = vmatpush3.bf16.msra.mxu0 %v5758_v31  ;;  %v1004_v31 = vld [vmem:[#allocation9 + $0x18] sm:$0xff] }
 0x1f7   : > { %5763 = vmatprep.subr.bf16.mxu0 %v5762_v37  ;;  %v5778_v41 = vpack.c.bf16 %v1004_v31, %v1003_v30  ;;  %v1685_v30 = vld [vmem:[#allocation9 + $0x2d0] sm:$0xff]  ;;  %v1686_v31 = vld [vmem:[#allocation9 + $0x2d8] sm:$0xff] }
 0x1fa   : > { %5765 = vmatpush3.bf16.msra.mxu0 %v5762_v37  ;;  %v1678_v37 = vld [vmem:[#allocation9 + $0x298] sm:$0xff] }
 0x1fb   : > { %5767 = vmatprep.subr.bf16.mxu0 %v5766_v43 }
 0x1fe   : > { %5769 = vmatpush3.bf16.msra.mxu0 %v5766_v43 }
 0x1ff   : > { %5771 = vmatprep.subr.bf16.mxu0 %v5770_v49 }
 0x202   : > { %5773 = vmatpush3.bf16.msra.mxu0 %v5770_v49  ;;  %v5906_v49 = vpack.c.bf16 %v1678_v37, %v1677_v36  ;;  %v1013_v36 = vld [vmem:[#allocation9 + $0x60] sm:$0xff]  ;;  %v1014_v37 = vld [vmem:[#allocation9 + $0x68] sm:$0xff] }
 0x203   : > { %5775 = vmatprep.subr.bf16.mxu0 %v5774_v55 }
 0x2b8   : > { %v4756_v19 = vpop.f32.mrb[0].mxu0 }
 0x2b9   : > { %v940_v20 = vsub.f32 %v4756_v19, %v7229_v17  ;;  %v886_v21 = vpop.f32.mrb[1].mxu0  ;;  %v1009_v19 = vld [vmem:[#allocation9 + $0x40] sm:$0xff] }
 0x2ba   : > { %v939_v23 = vsub.f32 %v886_v21, %v7229_v17 }
 0x2bb   : > { %v954_v24 = vmul.f32 %v7231_v18, %v940_v20  ;;  %v1010_v20 = vld [vmem:[#allocation9 + $0x48] sm:$0xff] }
 0x2bc   : > { %v953_v25 = vmul.f32 %v7231_v18, %v939_v23  ;;  %v4759_v26 = vpop.f32.mrb[2].mxu0 }
 0x2bd   : > { %v969_v27 = vadd.f32 %v7237_v22, %v954_v24  ;;  %v942_v28 = vsub.f32 %v4759_v26, %v7229_v17  ;;  %v896_v29 = vpop.f32.mrb[3].mxu0  ;;  %v1683_v24 = vld [vmem:[#allocation9 + $0x2c0] sm:$0xff] }
 0x2be   : > { %v968_v32 = vadd.f32 %v7237_v22, %v953_v25  ;;  %v941_v33 = vsub.f32 %v896_v29, %v7229_v17  ;;  %v1684_v25 = vld [vmem:[#allocation9 + $0x2c8] sm:$0xff] }
 0x2bf   : > { %v7246_v34 = vmax.f32 %v969_v27, 0.0  ;;  %v956_v35 = vmul.f32 %v7231_v18, %v942_v28  ;;  %v5790_v27 = vpack.c.bf16 %v1010_v20, %v1009_v19  ;;  %v1012_v28 = vld [vmem:[#allocation9 + $0x58] sm:$0xff]  ;;  %v5918_v29 = vpack.c.bf16 %v1684_v25, %v1683_v24  ;;  %v1267_v20 = vld [vmem:[#allocation9 + $0x130] sm:$0xff] }
 0x2c0   : > { %v976_v38 = vmax.f32 %v968_v32, 0.0  ;;  %v955_v39 = vmul.f32 %v7231_v18, %v941_v33  ;;  %v4762_v40 = vpop.f32.mrb[4].mxu0 }
 0x2c1   : > { %986 = vst [vmem:[#allocation2 + $0x21] sm:$0xff] %v7246_v34  ;;  %v971_v42 = vadd.f32 %v7237_v22, %v956_v35  ;;  %v944_v43 = vsub.f32 %v4762_v40, %v7229_v17  ;;  %v906_v44 = vpop.f32.mrb[5].mxu0  ;;  %v993_v35 = vld [vmem:[#allocation2] sm:$0xff]  ;;  %v1688_v40 = vld [vmem:[#allocation9 + $0x2e8] sm:$0xff] }
 0x2c2   : > { %985 = vst [vmem:[#allocation2 + $0x11] sm:$0xff] %v976_v38  ;;  %v970_v47 = vadd.f32 %v7237_v22, %v955_v39  ;;  %v943_v48 = vsub.f32 %v906_v44, %v7229_v17  ;;  %4799 = vmatmul.mubr.f32.vlgmr.msra.gmra.mrb[8].mxu0 %v976_v38  ;;  %4974 = vmatprep.mubr.f32.mxu1 %v976_v38  ;;  %v1687_v39 = vld [vmem:[#allocation9 + $0x2e0] sm:$0xff] }
 0x2c3   : > { %v7255_v50 = vmax.f32 %v971_v42, 0.0  ;;  %v958_v51 = vmul.f32 %v7231_v18, %v944_v43  ;;  %5777 = vmatpush3.bf16.msra.mxu0 %v5774_v55  ;;  %4801 = vmatprep.mubr.f32.mxu0 %v7246_v34  ;;  %v5922_v38 = vpack.c.bf16 %v1686_v31, %v1685_v30  ;;  %v1015_v42 = vld [vmem:[#allocation9 + $0x70] sm:$0xff]  ;;  %v1016_v43 = vld [vmem:[#allocation9 + $0x78] sm:$0xff]  ;;  %v5926_v44 = vpack.c.bf16 %v1688_v40, %v1687_v39  ;;  %v1269_v31 = vld [vmem:[#allocation9 + $0x140] sm:$0xff] }
 0x2c4   : > { %v7259_v54 = vmax.f32 %v970_v47, 0.0  ;;  %v957_v56 = vmul.f32 %v7231_v18, %v943_v48  ;;  %v4765_v57 = vpop.f32.mrb[6].mxu0  ;;  %4975 = vmatmul.mubr.f32.vlgmr.msra.gmra.mrb[0].mxu1 %v7246_v34  ;;  %5779 = vmatprep.subr.bf16.mxu0 %v5778_v41  ;;  %v5802_v47 = vpack.c.bf16 %v1016_v43, %v1015_v42  ;;  %v1261_v48 = vld [vmem:[#allocation9 + $0x100] sm:$0xff]  ;;  %v1823_v39 = vld [vmem:[#allocation9 + $0x348] sm:$0xff] }
 0x2c5   : > { %988 = vst [vmem:[#allocation2 + $0x41] sm:$0xff] %v7255_v50  ;;  %v973_v60 = vadd.f32 %v7237_v22, %v958_v51  ;;  %v946_v61 = vsub.f32 %v4765_v57, %v7229_v17  ;;  %v916_v55 = vpop.f32.mrb[7].mxu0  ;;  %5905 = vmatpush3.bf16.msra.mxu1 %v7223_v59  ;;  %v5930_v51 = vpack.c.bf16 %v1690_v46, %v1689_v45  ;;  %v1263_v57 = vld [vmem:[#allocation9 + $0x110] sm:$0xff]  ;;  %v1252_v42 = vld [vmem:[#allocation2 + $0x2] sm:$0xff] }
 0x2c6   : > { %987 = vst [vmem:[#allocation2 + $0x31] sm:$0xff] %v7259_v54  ;;  %v972_v0 = vadd.f32 %v7237_v22, %v957_v56  ;;  %v945_v9 = vsub.f32 %v916_v55, %v7229_v17  ;;  %4977 = vmatprep.mubr.f32.mxu1 %v7259_v54  ;;  %5907 = vmatprep.subr.bf16.mxu1 %v5906_v49  ;;  %v1817_v55 = vld [vmem:[#allocation9 + $0x318] sm:$0xff] }
 0x2c7   : > { %v7271_v11 = vmax.f32 %v973_v60, 0.0  ;;  %v960_v12 = vmul.f32 %v7231_v18, %v946_v61  ;;  %5781 = vmatpush3.bf16.msra.mxu0 %v5778_v41  ;;  %v5798_v41 = vpack.c.bf16 %v1014_v37, %v1013_v36  ;;  %v5934_v60 = vpack.c.bf16 %v1815_v53, %v1814_v52  ;;  %v1816_v61 = vld [vmem:[#allocation9 + $0x310] sm:$0xff]  ;;  %v1272_v45 = vld [vmem:[#allocation9 + $0x158] sm:$0xff]  ;;  %v1273_v52 = vld [vmem:[#allocation9 + $0x160] sm:$0xff] }
 0x2c8   : > { %v7274_v59 = vmax.f32 %v972_v0, 0.0  ;;  %v959_v15 = vmul.f32 %v7231_v18, %v945_v9  ;;  %4978 = vmatmul.mubr.f32.gmra.mrb[2].mxu1 %v7255_v50  ;;  %5783 = vmatprep.subr.bf16.mxu0 %v5782_v58  ;;  %v5914_v18 = vpack.c.bf16 %v1682_v14, %v1681_v13  ;;  %v1265_v0 = vld [vmem:[#allocation9 + $0x120] sm:$0xff]  ;;  %v1266_v9 = vld [vmem:[#allocation9 + $0x128] sm:$0xff] }
 0x2c9   : > { %990 = vst [vmem:[#allocation2 + $0x61] sm:$0xff] %v7271_v11  ;;  %v975_v17 = vadd.f32 %v7237_v22, %v960_v12  ;;  %5909 = vmatpush3.bf16.msra.mxu1 %v5906_v49  ;;  %4802 = vmatmul.mubr.f32.gmra.mrb[10].mxu0 %v7259_v54  ;;  %v7296_v32 = vld [vmem:[#allocation2 + $0x12] sm:$0xff]  ;;  %v5938_v12 = vpack.c.bf16 %v1817_v55, %v1816_v61  ;;  %v7306_v13 = vld [vmem:[#allocation2 + $0x22] sm:$0xff] }
 0x2ca   : > { %989 = vst [vmem:[#allocation2 + $0x51] sm:$0xff] %v7274_v59  ;;  %v974_v21 = vadd.f32 %v7237_v22, %v959_v15  ;;  %4980 = vmatprep.mubr.f32.mxu1 %v7274_v59  ;;  %5911 = vmatprep.subr.bf16.mxu1 %v5910_v10  ;;  %v1011_v22 = vld [vmem:[#allocation9 + $0x50] sm:$0xff]  ;;  %v1262_v49 = vld [vmem:[#allocation9 + $0x108] sm:$0xff]  ;;  %v1818_v14 = vld [vmem:[#allocation9 + $0x320] sm:$0xff] }
 0x2cb   : > { %v7284_v23 = vmax.f32 %v975_v17, 0.0  ;;  %5785 = vmatpush3.bf16.msra.mxu0 %v5782_v58  ;;  %4804 = vmatprep.mubr.f32.mxu0 %v7255_v50  ;;  %v5794_v33 = vpack.c.bf16 %v1012_v28, %v1011_v22  ;;  %v5806_v56 = vpack.c.bf16 %v1262_v49, %v1261_v48  ;;  %v1264_v58 = vld [vmem:[#allocation9 + $0x118] sm:$0xff]  ;;  %v7300_v63 = vld [vmem:[#allocation2 + $0x10] sm:$0xff]  ;;  %v5814_v17 = vpack.c.bf16 %v1266_v9, %v1265_v0  ;;  %v1824_v48 = vld [vmem:[#allocation9 + $0x350] sm:$0xff] }
 0x2cc   : > { %v7287_v26 = vmax.f32 %v974_v21, 0.0  ;;  %4981 = vmatmul.mubr.f32.gmra.mrb[4].mxu1 %v7271_v11  ;;  %5787 = vmatprep.subr.bf16.mxu0 %v5786_v16  ;;  %v5810_v62 = vpack.c.bf16 %v1264_v58, %v1263_v57  ;;  %v1819_v15 = vld [vmem:[#allocation9 + $0x328] sm:$0xff]  ;;  %v1268_v21 = vld [vmem:[#allocation9 + $0x138] sm:$0xff]  ;;  %v1826_v57 = vld [vmem:[#allocation9 + $0x360] sm:$0xff] }
 0x2cd   : > { %992 = vst [vmem:[#allocation2 + $0x81] sm:$0xff] %v7284_v23  ;;  %5913 = vmatpush3.bf16.msra.mxu1 %v5910_v10  ;;  %4805 = vmatmul.mubr.f32.gmra.mrb[12].mxu0 %v7274_v59  ;;  %v7303_v10 = vld [vmem:[#allocation2 + $0x20] sm:$0xff]  ;;  %v7312_v19 = vld [vmem:[#allocation2 + $0x30] sm:$0xff]  ;;  %v5942_v24 = vpack.c.bf16 %v1819_v15, %v1818_v14  ;;  %v1275_v61 = vld [vmem:[#allocation9 + $0x170] sm:$0xff] }
 0x2ce   : > { %991 = vst [vmem:[#allocation2 + $0x71] sm:$0xff] %v7287_v26  ;;  %4983 = vmatprep.mubr.f32.mxu1 %v7287_v26  ;;  %5915 = vmatprep.subr.bf16.mxu1 %v5914_v18  ;;  %v7318_v25 = vld [vmem:[#allocation2 + $0x42] sm:$0xff]  ;;  %v1274_v53 = vld [vmem:[#allocation9 + $0x168] sm:$0xff]  ;;  %v1828_v0 = vld [vmem:[#allocation9 + $0x370] sm:$0xff] }
 0x2cf   : > { %5789 = vmatpush3.bf16.msra.mxu0 %v5786_v16  ;;  %4807 = vmatprep.mubr.f32.mxu0 %v7271_v11  ;;  %v7309_v16 = vld [vmem:[#allocation2 + $0x32] sm:$0xff]  ;;  %v1821_v22 = vld [vmem:[#allocation9 + $0x338] sm:$0xff]  ;;  %v1399_v14 = vld [vmem:[#allocation9 + $0x180] sm:$0xff] }
 0x2d0   : > { %4984 = vmatmul.mubr.f32.gmra.mrb[6].mxu1 %v7284_v23  ;;  %5791 = vmatprep.subr.bf16.mxu0 %v5790_v27  ;;  %v7330_v37 = vld [vmem:[#allocation2 + $0x62] sm:$0xff]  ;;  %v1827_v58 = vld [vmem:[#allocation9 + $0x368] sm:$0xff] }
 0x2d1   : > { %5917 = vmatpush3.bf16.msra.mxu1 %v5914_v18  ;;  %5018 = vmatprep.mubr.f32.mxu1 %v7296_v32  ;;  %v7315_v18 = vld [vmem:[#allocation2 + $0x40] sm:$0xff]  ;;  %v7321_v28 = vld [vmem:[#allocation2 + $0x52] sm:$0xff] }
 0x2d2   : > { %5919 = vmatprep.subr.bf16.mxu1 %v5918_v29  ;;  %4808 = vmatmul.mubr.f32.gmra.mrb[14].mxu0 %v7287_v26  ;;  %v7324_v30 = vld [vmem:[#allocation2 + $0x50] sm:$0xff]  ;;  %v1825_v49 = vld [vmem:[#allocation9 + $0x358] sm:$0xff] }
 0x2d3   : > { %5793 = vmatpush3.bf16.msra.mxu0 %v5790_v27  ;;  %4842 = vmatprep.mubr.f32.mxu0 %v993_v35  ;;  %v1820_v27 = vld [vmem:[#allocation9 + $0x330] sm:$0xff]  ;;  %v7327_v35 = vld [vmem:[#allocation2 + $0x60] sm:$0xff]  ;;  %v1400_v15 = vld [vmem:[#allocation9 + $0x188] sm:$0xff] }
 0x2d4   : > { %5795 = vmatprep.subr.bf16.mxu0 %v5794_v33  ;;  %v5946_v36 = vpack.c.bf16 %v1821_v22, %v1820_v27  ;;  %v1276_v55 = vld [vmem:[#allocation9 + $0x178] sm:$0xff]  ;;  %v1401_v27 = vld [vmem:[#allocation9 + $0x190] sm:$0xff] }
 0x2d5   : > { %5921 = vmatpush3.bf16.msra.mxu1 %v5918_v29  ;;  %v5818_v29 = vpack.c.bf16 %v1268_v21, %v1267_v20  ;;  %v7333_v40 = vld [vmem:[#allocation2 + $0x72] sm:$0xff]  ;;  %v1829_v9 = vld [vmem:[#allocation9 + $0x378] sm:$0xff]  ;;  %v1952_v20 = vld [vmem:[#allocation9 + $0x380] sm:$0xff] }
 0x2d6   : > { %5923 = vmatprep.subr.bf16.mxu1 %v5922_v38  ;;  %v7336_v43 = vld [vmem:[#allocation2 + $0x70] sm:$0xff]  ;;  %v1402_v22 = vld [vmem:[#allocation9 + $0x198] sm:$0xff] }
 0x2d7   : > { %5797 = vmatpush3.bf16.msra.mxu0 %v5794_v33  ;;  %v1270_v33 = vld [vmem:[#allocation9 + $0x148] sm:$0xff] }
 0x2d8   : > { %5799 = vmatprep.subr.bf16.mxu0 %v5798_v41  ;;  %v1953_v21 = vld [vmem:[#allocation9 + $0x388] sm:$0xff] }
 0x2d9   : > { %5925 = vmatpush3.bf16.msra.mxu1 %v5922_v38  ;;  %v1822_v38 = vld [vmem:[#allocation9 + $0x340] sm:$0xff] }
 0x2da   : > { %5927 = vmatprep.subr.bf16.mxu1 %v5926_v44  ;;  %v5950_v46 = vpack.c.bf16 %v1823_v39, %v1822_v38  ;;  %v1403_v38 = vld [vmem:[#allocation9 + $0x1a0] sm:$0xff]  ;;  %v1404_v39 = vld [vmem:[#allocation9 + $0x1a8] sm:$0xff] }
 0x2db   : > { %5801 = vmatpush3.bf16.msra.mxu0 %v5798_v41  ;;  %v5822_v41 = vpack.c.bf16 %v1270_v33, %v1269_v31  ;;  %v1954_v31 = vld [vmem:[#allocation9 + $0x390] sm:$0xff]  ;;  %v1955_v33 = vld [vmem:[#allocation9 + $0x398] sm:$0xff] }
 0x2dc   : > { %5803 = vmatprep.subr.bf16.mxu0 %v5802_v47 }
 0x2dd   : > { %5929 = vmatpush3.bf16.msra.mxu1 %v5926_v44  ;;  %v1271_v44 = vld [vmem:[#allocation9 + $0x150] sm:$0xff] }
 0x2de   : > { %5931 = vmatprep.subr.bf16.mxu1 %v5930_v51 }
 0x2df   : > { %5805 = vmatpush3.bf16.msra.mxu0 %v5802_v47  ;;  %v7339_v47 = vld [vmem:[#allocation2 + $0x82] sm:$0xff] }
 0x2e0   : > { %5807 = vmatprep.subr.bf16.mxu0 %v5806_v56 }
 0x2e1   : > { %5933 = vmatpush3.bf16.msra.mxu1 %v5930_v51  ;;  %v5826_v51 = vpack.c.bf16 %v1272_v45, %v1271_v44  ;;  %v1957_v44 = vld [vmem:[#allocation9 + $0x3a8] sm:$0xff]  ;;  %v5846_v45 = vpack.c.bf16 %v1404_v39, %v1403_v38  ;;  %v1967_v38 = vld [vmem:[#allocation9 + $0x3f8] sm:$0xff] }
 0x2e2   : > { %4843 = vmatmul.mubr.f32.vlgmr.msra.gmra.mrb[8].mxu0 %v7300_v63  ;;  %5935 = vmatprep.subr.bf16.mxu1 %v5934_v60 }
 0x2e3   : > { %4845 = vmatprep.mubr.f32.mxu0 %v7303_v10  ;;  %5809 = vmatpush3.bf16.msra.mxu0 %v5806_v56  ;;  %v5954_v56 = vpack.c.bf16 %v1825_v49, %v1824_v48  ;;  %v1406_v48 = vld [vmem:[#allocation9 + $0x1b8] sm:$0xff]  ;;  %v1958_v49 = vld [vmem:[#allocation9 + $0x3b0] sm:$0xff] }
 0x2e4   : > { %5019 = vmatmul.mubr.f32.vlgmr.msra.gmra.mrb[0].mxu1 %v7306_v13  ;;  %5811 = vmatprep.subr.bf16.mxu0 %v5810_v62 }
 0x2e5   : > { %5021 = vmatprep.mubr.f32.mxu1 %v7309_v16  ;;  %5937 = vmatpush3.bf16.msra.mxu1 %v5934_v60  ;;  %v5830_v60 = vpack.c.bf16 %v1274_v53, %v1273_v52  ;;  %v1407_v53 = vld [vmem:[#allocation9 + $0x1c0] sm:$0xff] }
 0x2e6   : > { %4846 = vmatmul.mubr.f32.gmra.mrb[10].mxu0 %v7312_v19  ;;  %5939 = vmatprep.subr.bf16.mxu1 %v5938_v12 }
 0x2e7   : > { %4848 = vmatprep.mubr.f32.mxu0 %v7315_v18  ;;  %5813 = vmatpush3.bf16.msra.mxu0 %v5810_v62  ;;  %v5958_v62 = vpack.c.bf16 %v1827_v58, %v1826_v57  ;;  %v1960_v58 = vld [vmem:[#allocation9 + $0x3c0] sm:$0xff] }
 0x2e8   : > { %5022 = vmatmul.mubr.f32.gmra.mrb[2].mxu1 %v7318_v25  ;;  %5815 = vmatprep.subr.bf16.mxu0 %v5814_v17 }
 0x2e9   : > { %5024 = vmatprep.mubr.f32.mxu1 %v7321_v28  ;;  %5941 = vmatpush3.bf16.msra.mxu1 %v5938_v12  ;;  %v5834_v12 = vpack.c.bf16 %v1276_v55, %v1275_v61  ;;  %v7354_v61 = vld [vmem:[#allocation2 + $0x80] sm:$0xff] }
 0x2ea   : > { %4849 = vmatmul.mubr.f32.gmra.mrb[12].mxu0 %v7324_v30  ;;  %5943 = vmatprep.subr.bf16.mxu1 %v5942_v24 }
 0x2eb   : > { %4851 = vmatprep.mubr.f32.mxu0 %v7327_v35  ;;  %5817 = vmatpush3.bf16.msra.mxu0 %v5814_v17  ;;  %v5962_v17 = vpack.c.bf16 %v1829_v9, %v1828_v0  ;;  %v1409_v0 = vld [vmem:[#allocation9 + $0x1d0] sm:$0xff]  ;;  %v1410_v9 = vld [vmem:[#allocation9 + $0x1d8] sm:$0xff] }
 0x2ec   : > { %5025 = vmatmul.mubr.f32.gmra.mrb[4].mxu1 %v7330_v37  ;;  %5819 = vmatprep.subr.bf16.mxu0 %v5818_v29 }
 0x2ed   : > { %5027 = vmatprep.mubr.f32.mxu1 %v7333_v40  ;;  %5945 = vmatpush3.bf16.msra.mxu1 %v5942_v24  ;;  %v5838_v24 = vpack.c.bf16 %v1400_v15, %v1399_v14  ;;  %v1962_v14 = vld [vmem:[#allocation9 + $0x3d0] sm:$0xff]  ;;  %v1963_v15 = vld [vmem:[#allocation9 + $0x3d8] sm:$0xff] }
 0x2ee   : > { %4852 = vmatmul.mubr.f32.gmra.mrb[14].mxu0 %v7336_v43  ;;  %5947 = vmatprep.subr.bf16.mxu1 %v5946_v36 }
 0x2ef   : > { %5821 = vmatpush3.bf16.msra.mxu0 %v5818_v29  ;;  %4886 = vmatprep.mubr.f32.mxu0 %v1252_v42  ;;  %v5966_v29 = vpack.c.bf16 %v1953_v21, %v1952_v20  ;;  %v1956_v42 = vld [vmem:[#allocation9 + $0x3a0] sm:$0xff]  ;;  %v1412_v21 = vld [vmem:[#allocation9 + $0x1e8] sm:$0xff] }
 0x2f0   : > { %5028 = vmatmul.mubr.f32.gmra.mrb[6].mxu1 %v7339_v47  ;;  %5823 = vmatprep.subr.bf16.mxu0 %v5822_v41  ;;  %v1411_v20 = vld [vmem:[#allocation9 + $0x1e0] sm:$0xff] }
 0x2f1   : > { %5949 = vmatpush3.bf16.msra.mxu1 %v5946_v36  ;;  %5062 = vmatprep.mubr.f32.mxu1 %v7303_v10  ;;  %v5842_v36 = vpack.c.bf16 %v1402_v22, %v1401_v27  ;;  %v1964_v27 = vld [vmem:[#allocation9 + $0x3e0] sm:$0xff]  ;;  %v1965_v22 = vld [vmem:[#allocation9 + $0x3e8] sm:$0xff] }
 0x2f2   : > { %5951 = vmatprep.subr.bf16.mxu1 %v5950_v46 }
 0x2f3   : > { %5825 = vmatpush3.bf16.msra.mxu0 %v5822_v41  ;;  %v5970_v41 = vpack.c.bf16 %v1955_v33, %v1954_v31  ;;  %v1413_v31 = vld [vmem:[#allocation9 + $0x1f0] sm:$0xff]  ;;  %v5990_v33 = vpack.c.bf16 %v1965_v22, %v1964_v27 }
 0x2f4   : > { %5827 = vmatprep.subr.bf16.mxu0 %v5826_v51 }
 0x2f5   : > { %5953 = vmatpush3.bf16.msra.mxu1 %v5950_v46  ;;  %v1405_v46 = vld [vmem:[#allocation9 + $0x1b0] sm:$0xff] }
 0x2f6   : > { %5955 = vmatprep.subr.bf16.mxu1 %v5954_v56  ;;  %v5850_v52 = vpack.c.bf16 %v1406_v48, %v1405_v46  ;;  %v2093_v46 = vld [vmem:[#allocation9 + $0x418] sm:$0xff] }
 0x2f7   : > { %5829 = vmatpush3.bf16.msra.mxu0 %v5826_v51  ;;  %v1959_v51 = vld [vmem:[#allocation9 + $0x3b8] sm:$0xff] }
 0x2f8   : > { %5831 = vmatprep.subr.bf16.mxu0 %v5830_v60  ;;  %v5978_v57 = vpack.c.bf16 %v1959_v51, %v1958_v49  ;;  %v2095_v49 = vld [vmem:[#allocation9 + $0x428] sm:$0xff] }
 0x2f9   : > { %5957 = vmatpush3.bf16.msra.mxu1 %v5954_v56  ;;  %v1408_v56 = vld [vmem:[#allocation9 + $0x1c8] sm:$0xff] }
 0x2fa   : > { %5959 = vmatprep.subr.bf16.mxu1 %v5958_v62  ;;  %v5854_v55 = vpack.c.bf16 %v1408_v56, %v1407_v53  ;;  %v2097_v53 = vld [vmem:[#allocation9 + $0x438] sm:$0xff] }
 0x2fb   : > { %5833 = vmatpush3.bf16.msra.mxu0 %v5830_v60  ;;  %v1961_v60 = vld [vmem:[#allocation9 + $0x3c8] sm:$0xff]  ;;  %v2105_v56 = vld [vmem:[#allocation9 + $0x478] sm:$0xff] }
 0x2fc   : > { %5835 = vmatprep.subr.bf16.mxu0 %v5834_v12 }
 0x2fd   : > { %5961 = vmatpush3.bf16.msra.mxu1 %v5958_v62  ;;  %v1812_v62 = vld [vmem:[#allocation2 + $0x90] sm:$0xff] }
 0x2fe   : > { %5963 = vmatprep.subr.bf16.mxu1 %v5962_v17 }
 0x2ff   : > { %5837 = vmatpush3.bf16.msra.mxu0 %v5834_v12  ;;  %v5982_v12 = vpack.c.bf16 %v1961_v60, %v1960_v58 }
 0x300   : > { %5839 = vmatprep.subr.bf16.mxu0 %v5838_v24 }
 0x301   : > { %5965 = vmatpush3.bf16.msra.mxu1 %v5962_v17  ;;  %v5858_v17 = vpack.c.bf16 %v1410_v9, %v1409_v0 }
 0x302   : > { %4887 = vmatmul.mubr.f32.vlgmr.msra.gmra.mrb[8].mxu0 %v7296_v32  ;;  %5967 = vmatprep.subr.bf16.mxu1 %v5966_v29  ;;  %v5974_v32 = vpack.c.bf16 %v1957_v44, %v1956_v42  ;;  %v2091_v42 = vld [vmem:[#allocation9 + $0x408] sm:$0xff] }
 0x303   : > { %4889 = vmatprep.mubr.f32.mxu0 %v7306_v13  ;;  %5841 = vmatpush3.bf16.msra.mxu0 %v5838_v24  ;;  %v5986_v24 = vpack.c.bf16 %v1963_v15, %v1962_v14 }
 0x304   : > { %5063 = vmatmul.mubr.f32.vlgmr.msra.gmra.mrb[0].mxu1 %v7312_v19  ;;  %5843 = vmatprep.subr.bf16.mxu0 %v5842_v36 }
 0x305   : > { %5065 = vmatprep.mubr.f32.mxu1 %v7315_v18  ;;  %5969 = vmatpush3.bf16.msra.mxu1 %v5966_v29  ;;  %v5862_v29 = vpack.c.bf16 %v1412_v21, %v1411_v20 }
 0x306   : > { %4890 = vmatmul.mubr.f32.gmra.mrb[10].mxu0 %v7309_v16  ;;  %5971 = vmatprep.subr.bf16.mxu1 %v5970_v41 }
 0x307   : > { %4892 = vmatprep.mubr.f32.mxu0 %v7318_v25  ;;  %5845 = vmatpush3.bf16.msra.mxu0 %v5842_v36  ;;  %v1966_v36 = vld [vmem:[#allocation9 + $0x3f0] sm:$0xff] }
 0x308   : > { %5066 = vmatmul.mubr.f32.gmra.mrb[2].mxu1 %v7324_v30  ;;  %5847 = vmatprep.subr.bf16.mxu0 %v5846_v45 }
 0x309   : > { %5068 = vmatprep.mubr.f32.mxu1 %v7327_v35  ;;  %5973 = vmatpush3.bf16.msra.mxu1 %v5970_v41  ;;  %v2090_v41 = vld [vmem:[#allocation9 + $0x400] sm:$0xff] }
 0x30a   : > { %4893 = vmatmul.mubr.f32.gmra.mrb[12].mxu0 %v7321_v28  ;;  %5975 = vmatprep.subr.bf16.mxu1 %v5974_v32  ;;  %v5998_v44 = vpack.c.bf16 %v2091_v42, %v2090_v41 }
 0x30b   : > { %4895 = vmatprep.mubr.f32.mxu0 %v7330_v37  ;;  %5849 = vmatpush3.bf16.msra.mxu0 %v5846_v45  ;;  %v2092_v45 = vld [vmem:[#allocation9 + $0x410] sm:$0xff] }
 0x30c   : > { %5069 = vmatmul.mubr.f32.gmra.mrb[4].mxu1 %v7336_v43  ;;  %5851 = vmatprep.subr.bf16.mxu0 %v5850_v52  ;;  %v6002_v48 = vpack.c.bf16 %v2093_v46, %v2092_v45 }
 0x30d   : > { %5071 = vmatprep.mubr.f32.mxu1 %v7354_v61  ;;  %5977 = vmatpush3.bf16.msra.mxu1 %v5974_v32  ;;  %v2094_v32 = vld [vmem:[#allocation9 + $0x420] sm:$0xff] }
 0x30e   : > { %4896 = vmatmul.mubr.f32.gmra.mrb[14].mxu0 %v7333_v40  ;;  %5979 = vmatprep.subr.bf16.mxu1 %v5978_v57  ;;  %v6006_v51 = vpack.c.bf16 %v2095_v49, %v2094_v32 }
 0x30f   : > { %5853 = vmatpush3.bf16.msra.mxu0 %v5850_v52  ;;  %4930 = vmatprep.mubr.f32.mxu0 %v7300_v63  ;;  %v1414_v63 = vld [vmem:[#allocation9 + $0x1f8] sm:$0xff]  ;;  %v2096_v52 = vld [vmem:[#allocation9 + $0x430] sm:$0xff] }
 0x310   : > { %5072 = vmatmul.mubr.f32.gmra.mrb[6].mxu1 %v1812_v62  ;;  %5855 = vmatprep.subr.bf16.mxu0 %v5854_v55  ;;  %v5866_v39 = vpack.c.bf16 %v1414_v63, %v1413_v31 }
 0x311   : > { %5981 = vmatpush3.bf16.msra.mxu1 %v5978_v57  ;;  %5106 = vmatprep.mubr.f32.mxu1 %v7246_v34  ;;  %v5994_v34 = vpack.c.bf16 %v1967_v38, %v1966_v36 }
 0x312   : > { %5983 = vmatprep.subr.bf16.mxu1 %v5982_v12 }
 0x313   : > { %5857 = vmatpush3.bf16.msra.mxu0 %v5854_v55 }
 0x314   : > { %5859 = vmatprep.subr.bf16.mxu0 %v5858_v17 }
 0x315   : > { %5985 = vmatpush3.bf16.msra.mxu1 %v5982_v12 }
 0x316   : > { %5987 = vmatprep.subr.bf16.mxu1 %v5986_v24 }
 0x317   : > { %5861 = vmatpush3.bf16.msra.mxu0 %v5858_v17 }
 0x318   : > { %5863 = vmatprep.subr.bf16.mxu0 %v5862_v29 }
 0x319   : > { %5989 = vmatpush3.bf16.msra.mxu1 %v5986_v24 }
 0x31a   : > { %5991 = vmatprep.subr.bf16.mxu1 %v5990_v33 }
 0x31b   : > { %5865 = vmatpush3.bf16.msra.mxu0 %v5862_v29 }
 0x31c   : > { %5867 = vmatprep.subr.bf16.mxu0 %v5866_v39 }
 0x31d   : > { %5993 = vmatpush3.bf16.msra.mxu1 %v5990_v33 }
 0x31e   : > { %5995 = vmatprep.subr.bf16.mxu1 %v5994_v34 }
 0x31f   : > { %5869 = vmatpush3.bf16.msra.mxu0 %v5866_v39 }
 0x321   : > { %5997 = vmatpush3.bf16.msra.mxu1 %v5994_v34 }
 0x322   : > { %4931 = vmatmul.mubr.f32.vlgmr.msra.gmra.mrb[8].mxu0 %v7303_v10  ;;  %5999 = vmatprep.subr.bf16.mxu1 %v5998_v44  ;;  %v2099_v10 = vld [vmem:[#allocation9 + $0x448] sm:$0xff] }
 0x323   : > { %4933 = vmatprep.mubr.f32.mxu0 %v7312_v19  ;;  %v1950_v19 = vld [vmem:[#allocation2 + $0x91] sm:$0xff] }
 0x324   : > { %5107 = vmatmul.mubr.f32.vlgmr.msra.gmra.mrb[0].mxu1 %v7259_v54  ;;  %v6010_v54 = vpack.c.bf16 %v2097_v53, %v2096_v52 }
 0x325   : > { %5109 = vmatprep.mubr.f32.mxu1 %v7255_v50  ;;  %6001 = vmatpush3.bf16.msra.mxu1 %v5998_v44  ;;  %v2098_v50 = vld [vmem:[#allocation9 + $0x440] sm:$0xff] }
 0x326   : > { %4934 = vmatmul.mubr.f32.gmra.mrb[10].mxu0 %v7315_v18  ;;  %6003 = vmatprep.subr.bf16.mxu1 %v6002_v48  ;;  %v2101_v18 = vld [vmem:[#allocation9 + $0x458] sm:$0xff] }
 0x327   : > { %4936 = vmatprep.mubr.f32.mxu0 %v7324_v30 }
 0x328   : > { %5110 = vmatmul.mubr.f32.gmra.mrb[2].mxu1 %v7274_v59  ;;  %v6014_v59 = vpack.c.bf16 %v2099_v10, %v2098_v50 }
 0x329   : > { %5112 = vmatprep.mubr.f32.mxu1 %v7271_v11  ;;  %6005 = vmatpush3.bf16.msra.mxu1 %v6002_v48  ;;  %v2100_v11 = vld [vmem:[#allocation9 + $0x450] sm:$0xff] }
 0x32a   : > { %4937 = vmatmul.mubr.f32.gmra.mrb[12].mxu0 %v7327_v35  ;;  %6007 = vmatprep.subr.bf16.mxu1 %v6006_v51  ;;  %v6018_v30 = vpack.c.bf16 %v2101_v18, %v2100_v11  ;;  %v2102_v35 = vld [vmem:[#allocation9 + $0x460] sm:$0xff] }
 0x32b   : > { %4939 = vmatprep.mubr.f32.mxu0 %v7336_v43  ;;  %v2103_v43 = vld [vmem:[#allocation9 + $0x468] sm:$0xff] }
 0x32c   : > { %5113 = vmatmul.mubr.f32.gmra.mrb[4].mxu1 %v7287_v26  ;;  %v6022_v26 = vpack.c.bf16 %v2103_v43, %v2102_v35 }
 0x32d   : > { %5115 = vmatprep.mubr.f32.mxu1 %v7284_v23  ;;  %6009 = vmatpush3.bf16.msra.mxu1 %v6006_v51  ;;  %v2104_v23 = vld [vmem:[#allocation9 + $0x470] sm:$0xff] }
 0x32e   : > { %4940 = vmatmul.mubr.f32.gmra.mrb[14].mxu0 %v7354_v61  ;;  %6011 = vmatprep.subr.bf16.mxu1 %v6010_v54  ;;  %v6026_v57 = vpack.c.bf16 %v2105_v56, %v2104_v23 }
 0x330   : > { %5116 = vmatmul.mubr.f32.gmra.mrb[6].mxu1 %v1950_v19 }
 0x331   : > { %6013 = vmatpush3.bf16.msra.mxu1 %v6010_v54  ;;  %5150 = vmatprep.mubr.f32.mxu1 %v7306_v13  ;;  %v2088_v13 = vld [vmem:[#allocation2 + $0x92] sm:$0xff] }
 0x332   : > { %6015 = vmatprep.subr.bf16.mxu1 %v6014_v59 }
 0x335   : > { %6017 = vmatpush3.bf16.msra.mxu1 %v6014_v59 }
 0x336   : > { %6019 = vmatprep.subr.bf16.mxu1 %v6018_v30 }
 0x339   : > { %6021 = vmatpush3.bf16.msra.mxu1 %v6018_v30 }
 0x33a   : > { %6023 = vmatprep.subr.bf16.mxu1 %v6022_v26 }
 0x33d   : > { %6025 = vmatpush3.bf16.msra.mxu1 %v6022_v26 }
 0x33e   : > { %6027 = vmatprep.subr.bf16.mxu1 %v6026_v57 }
 0x341   : > { %6029 = vmatpush3.bf16.msra.mxu1 %v6026_v57 }
 0x344   : > { %5151 = vmatmul.mubr.f32.vlgmr.msra.gmra.mrb[0].mxu1 %v7309_v16 }
 0x345   : > { %5153 = vmatprep.mubr.f32.mxu1 %v7318_v25 }
 0x348   : > { %5154 = vmatmul.mubr.f32.gmra.mrb[2].mxu1 %v7321_v28 }
 0x349   : > { %5156 = vmatprep.mubr.f32.mxu1 %v7330_v37 }
 0x34c   : > { %5157 = vmatmul.mubr.f32.gmra.mrb[4].mxu1 %v7333_v40 }
 0x34d   : > { %5159 = vmatprep.mubr.f32.mxu1 %v7339_v47 }
 0x350   : > { %5160 = vmatmul.mubr.f32.gmra.mrb[6].mxu1 %v2088_v13  ;;  %v2219_v13 = vld [vmem:[#allocation3 + $0x2] sm:$0x1] }
 0x3f5   : > { %v4932_v58 = vpop.f32.mrb[8].mxu0 }
 0x3f6   : > { %v1481_v60 = vpop.f32.mrb[9].mxu0 }
 0x3f9   : > { %v4935_v61 = vpop.f32.mrb[10].mxu0 }
 0x3fa   : > { %v1491_v55 = vpop.f32.mrb[11].mxu0 }
 0x3fd   : > { %v4938_v62 = vpop.f32.mrb[12].mxu0 }
 0x3fe   : > { %v1501_v0 = vpop.f32.mrb[13].mxu0 }
 0x401   : > { %v4941_v9 = vpop.f32.mrb[14].mxu0 }
 0x402   : > { %v1511_v16 = vpop.f32.mrb[15].mxu0 }
 0x417   : > { %v5152_v12 = vpop.f32.mrb[0].mxu1 }
 0x418   : > { %v6382_v25 = vadd.f32 %v5152_v12, %v4932_v58  ;;  %v2172_v14 = vpop.f32.mrb[1].mxu1 }
 0x419   : > { %v6383_v28 = vadd.f32 %v2172_v14, %v1481_v60 }
 0x41a   : > { %v2237_v15 = vmul.f32 %v6382_v25, %v6382_v25 }
 0x41b   : > { %v2220_v37 = vadd.f32 %v6383_v28, %v6382_v25  ;;  %v2236_v17 = vmul.f32 %v6383_v28, %v6383_v28  ;;  %v5155_v40 = vpop.f32.mrb[2].mxu1 }
 0x41c   : > { %v6384_v20 = vadd.f32 %v5155_v40, %v4935_v61  ;;  %v2182_v47 = vpop.f32.mrb[3].mxu1  ;;  %v2235_v61 = vld [vmem:[#allocation3 + $0x3] sm:$0x1] }
 0x41d   : > { %v2244_v21 = vadd.f32 %v2237_v15, %v2236_v17  ;;  %v6385_v24 = vadd.f32 %v2182_v47, %v1491_v55 }
 0x41e   : > { %v2239_v33 = vmul.f32 %v6384_v20, %v6384_v20 }
 0x41f   : > { %v2221_v27 = vadd.f32 %v6385_v24, %v2220_v37  ;;  %v2238_v22 = vmul.f32 %v6385_v24, %v6385_v24  ;;  %v5158_v29 = vpop.f32.mrb[4].mxu1 }
 0x420   : > { %v6386_v31 = vadd.f32 %v5158_v29, %v4938_v62  ;;  %v2192_v63 = vpop.f32.mrb[5].mxu1 }
 0x421   : > { %v2245_v36 = vadd.f32 %v2244_v21, %v2238_v22  ;;  %v6387_v38 = vadd.f32 %v2192_v63, %v1501_v0  ;;  %v2222_v39 = vadd.f32 %v6384_v20, %v2221_v27 }
 0x422   : > { %v2241_v48 = vmul.f32 %v6386_v31, %v6386_v31 }
 0x423   : > { %v2223_v34 = vadd.f32 %v6387_v38, %v2222_v39  ;;  %v2240_v41 = vmul.f32 %v6387_v38, %v6387_v38  ;;  %v2246_v42 = vadd.f32 %v2245_v36, %v2239_v33  ;;  %v5161_v44 = vpop.f32.mrb[6].mxu1 }
 0x424   : > { %v6388_v45 = vadd.f32 %v5161_v44, %v4941_v9  ;;  %v2202_v46 = vpop.f32.mrb[7].mxu1 }
 0x425   : > { %v2247_v32 = vadd.f32 %v2246_v42, %v2240_v41  ;;  %v6389_v49 = vadd.f32 %v2202_v46, %v1511_v16  ;;  %v2224_v51 = vadd.f32 %v6386_v31, %v2223_v34 }
 0x426   : > { %v2243_v50 = vmul.f32 %v6388_v45, %v6388_v45 }
 0x427   : > { %v2225_v52 = vadd.f32 %v6389_v49, %v2224_v51  ;;  %v2242_v53 = vmul.f32 %v6389_v49, %v6389_v49  ;;  %v2248_v54 = vadd.f32 %v2247_v32, %v2241_v48 }
 0x429   : > { %v2226_v10 = vadd.f32 %v6388_v45, %v2225_v52  ;;  %v2249_v19 = vadd.f32 %v2248_v54, %v2242_v53 }
 0x42b   : > { %v2227_v59 = vrot.slane %v2226_v10, 4  ;;  %v2250_v11 = vadd.f32 %v2249_v19, %v2243_v50 }
 0x42d   : > { %v2228_v18 = vadd.f32 %v2227_v59, %v2226_v10  ;;  %v2251_v30 = vrot.slane %v2250_v11, 4 }
 0x42f   : > { %v2229_v35 = vrot.slane %v2228_v18, 2  ;;  %v2252_v43 = vadd.f32 %v2251_v30, %v2250_v11 }
 0x431   : > { %v2230_v26 = vadd.f32 %v2229_v35, %v2228_v18  ;;  %v2253_v23 = vrot.slane %v2252_v43, 2 }
 0x433   : > { %v2231_v56 = vrot.slane %v2230_v26, 1  ;;  %v2254_v57 = vadd.f32 %v2253_v23, %v2252_v43 }
 0x435   : > { %v2232_v58 = vadd.f32 %v2231_v56, %v2230_v26  ;;  %v2255_v60 = vrot.slane %v2254_v57, 1 }
 0x437   : > { %v2233_v55 = vadd.f32 %v2232_v58, %v2219_v13  ;;  %v2256_v62 = vadd.f32 %v2255_v60, %v2254_v57 }
 0x439   : > { %2234 = vst [vmem:[#allocation3 + $0x2] sm:$0x1] %v2233_v55  ;;  %v2257_v0 = vadd.f32 %v2256_v62, %v2235_v61 }
 0x43b   : > { %2258 = vst [vmem:[#allocation3 + $0x3] sm:$0x1] %v2257_v0 }
 0x43c PF: > { %p4071_p11 = scmp.ne.s32.totalorder %s6840_s17, 2 }
 0x43d   : > { %v2263_v9 = vld [vmem:[#allocation7] sm:$0xff] (!%p4071_p11)  ;;  %v2264_v16 = vld [vmem:[#allocation7 + $0x8] sm:$0xff] (!%p4071_p11)  ;;  %v2265_v12 = vld [vmem:[#allocation7 + $0x10] sm:$0xff] (!%p4071_p11)  ;;  %5194 = vmatprep.mubr.f32.mxu0 (!%p4071_p11), %v7174_v1  ;;  %s7754_s3 = sld [smem:[#allocation19_spill]] (!%p4071_p11)  ;;  %s7755_s6 = sld [smem:[#allocation20_spill]] (!%p4071_p11) }
 0x43e   : > { %2262 = sbr.rel (%p4071_p11) target bundleno = 1748 (0x6d4), region = 92  ;;  %v6030_v25 = vpack.c.bf16 (!%p4071_p11), %v2264_v16, %v2263_v9  ;;  %v2266_v14 = vld [vmem:[#allocation7 + $0x18] sm:$0xff] (!%p4071_p11)  ;;  %v2267_v15 = vld [vmem:[#allocation7 + $0x20] sm:$0xff] (!%p4071_p11)  ;;  %v2268_v37 = vld [vmem:[#allocation7 + $0x28] sm:$0xff] (!%p4071_p11)  ;;  %s7756_s26 = sld [smem:[#allocation23_spill]] (!%p4071_p11) }
 0x43f   : > { %v6034_v28 = vpack.c.bf16 (!%p4071_p11), %v2266_v14, %v2265_v12  ;;  %v6038_v17 = vpack.c.bf16 (!%p4071_p11), %v2268_v37, %v2267_v15  ;;  %v2269_v40 = vld [vmem:[#allocation7 + $0x30] sm:$0xff] (!%p4071_p11)  ;;  %v2270_v20 = vld [vmem:[#allocation7 + $0x38] sm:$0xff] (!%p4071_p11)  ;;  %v2858_v47 = vld [vmem:[#allocation9 + $0x180] sm:$0xff] (!%p4071_p11)  ;;  %s7757_s10 = sld [smem:[#allocation21_spill]] (!%p4071_p11)  ;;  %s7758_s12 = sld [smem:[#allocation24_spill]] (!%p4071_p11) }
 0x440   : > { %6031 = vmatprep.subr.bf16.mxu0 (!%p4071_p11), %v6030_v25  ;;  %v2859_v21 = vld [vmem:[#allocation9 + $0x188] sm:$0xff] (!%p4071_p11)  ;;  %v2860_v27 = vld [vmem:[#allocation9 + $0x190] sm:$0xff] (!%p4071_p11)  ;;  %v2861_v22 = vld [vmem:[#allocation9 + $0x198] sm:$0xff] (!%p4071_p11)  ;;  %v6042_v63 = vpack.c.bf16 (!%p4071_p11), %v2270_v20, %v2269_v40 }
 0x441   : > { %6033 = vmatpush3.bf16.msra.mxu0 (!%p4071_p11), %v6030_v25  ;;  %v6158_v24 = vpack.c.bf16 (!%p4071_p11), %v2859_v21, %v2858_v47  ;;  %v6162_v29 = vpack.c.bf16 (!%p4071_p11), %v2861_v22, %v2860_v27  ;;  %v2862_v31 = vld [vmem:[#allocation9 + $0x1a0] sm:$0xff] (!%p4071_p11)  ;;  %v2863_v33 = vld [vmem:[#allocation9 + $0x1a8] sm:$0xff] (!%p4071_p11)  ;;  %v2864_v34 = vld [vmem:[#allocation9 + $0x1b0] sm:$0xff] (!%p4071_p11) }
 0x442   : > { %6035 = vmatprep.subr.bf16.mxu0 (!%p4071_p11), %v6034_v28  ;;  %v2271_v36 = vld [vmem:[#allocation7 + $0x40] sm:$0xff] (!%p4071_p11)  ;;  %v2272_v38 = vld [vmem:[#allocation7 + $0x48] sm:$0xff] (!%p4071_p11)  ;;  %v6166_v39 = vpack.c.bf16 (!%p4071_p11), %v2863_v33, %v2862_v31  ;;  %v2865_v41 = vld [vmem:[#allocation9 + $0x1b8] sm:$0xff] (!%p4071_p11) }
 0x443   : > { %6159 = vmatprep.subr.bf16.mxu1 (!%p4071_p11), %v6158_v24  ;;  %v6046_v42 = vpack.c.bf16 (!%p4071_p11), %v2272_v38, %v2271_v36  ;;  %v2273_v44 = vld [vmem:[#allocation7 + $0x50] sm:$0xff] (!%p4071_p11)  ;;  %v2274_v45 = vld [vmem:[#allocation7 + $0x58] sm:$0xff] (!%p4071_p11)  ;;  %v6170_v46 = vpack.c.bf16 (!%p4071_p11), %v2865_v41, %v2864_v34  ;;  %v2275_v32 = vld [vmem:[#allocation7 + $0x60] sm:$0xff] (!%p4071_p11) }
 0x444   : > { %6161 = vmatpush3.bf16.msra.mxu1 (!%p4071_p11), %v6158_v24  ;;  %v6050_v48 = vpack.c.bf16 (!%p4071_p11), %v2274_v45, %v2273_v44  ;;  %v2276_v49 = vld [vmem:[#allocation7 + $0x68] sm:$0xff] (!%p4071_p11)  ;;  %v2277_v52 = vld [vmem:[#allocation7 + $0x70] sm:$0xff] (!%p4071_p11)  ;;  %v2278_v53 = vld [vmem:[#allocation7 + $0x78] sm:$0xff] (!%p4071_p11) }
 0x445   : > { %6037 = vmatpush3.bf16.msra.mxu0 %v6034_v28  ;;  %6163 = vmatprep.subr.bf16.mxu1 %v6162_v29  ;;  %v6054_v51 = vpack.c.bf16 %v2276_v49, %v2275_v32  ;;  %v6058_v54 = vpack.c.bf16 %v2278_v53, %v2277_v52  ;;  %v2485_v50 = vld [vmem:[#allocation9 + $0x80] sm:$0xff]  ;;  %v2486_v10 = vld [vmem:[#allocation9 + $0x88] sm:$0xff]  ;;  %v2487_v59 = vld [vmem:[#allocation9 + $0x90] sm:$0xff]  ;;  %v2394_v32 = vlaneseq }
 0x446   : > { %6039 = vmatprep.subr.bf16.mxu0 %v6038_v17  ;;  %v6062_v19 = vpack.c.bf16 %v2486_v10, %v2485_v50  ;;  %v2488_v11 = vld [vmem:[#allocation9 + $0x98] sm:$0xff]  ;;  %v2489_v30 = vld [vmem:[#allocation9 + $0xa0] sm:$0xff]  ;;  %v2490_v35 = vld [vmem:[#allocation9 + $0xa8] sm:$0xff] }
 0x447   : > { %v6066_v18 = vpack.c.bf16 %v2488_v11, %v2487_v59  ;;  %v6070_v43 = vpack.c.bf16 %v2490_v35, %v2489_v30  ;;  %v2491_v26 = vld [vmem:[#allocation9 + $0xb0] sm:$0xff]  ;;  %v2492_v23 = vld [vmem:[#allocation9 + $0xb8] sm:$0xff]  ;;  %v2493_v57 = vld [vmem:[#allocation9 + $0xc0] sm:$0xff]  ;;  %v2395_v49 = vshrl.u32 %v2394_v32, 7 }
 0x448   : > { %6165 = vmatpush3.bf16.msra.mxu1 %v6162_v29  ;;  %v6074_v56 = vpack.c.bf16 %v2492_v23, %v2491_v26  ;;  %v2494_v13 = vld [vmem:[#allocation9 + $0xc8] sm:$0xff]  ;;  %v2495_v60 = vld [vmem:[#allocation9 + $0xd0] sm:$0xff]  ;;  %v2496_v61 = vld [vmem:[#allocation9 + $0xd8] sm:$0xff] }
 0x449   : > { %6041 = vmatpush3.bf16.msra.mxu0 %v6038_v17  ;;  %6167 = vmatprep.subr.bf16.mxu1 %v6166_v39  ;;  %v6078_v58 = vpack.c.bf16 %v2494_v13, %v2493_v57  ;;  %v6082_v55 = vpack.c.bf16 %v2496_v61, %v2495_v60  ;;  %v2497_v62 = vld [vmem:[#allocation9 + $0xe0] sm:$0xff]  ;;  %v2498_v0 = vld [vmem:[#allocation9 + $0xe8] sm:$0xff]  ;;  %v2499_v14 = vld [vmem:[#allocation9 + $0xf0] sm:$0xff]  ;;  %v7398_v53 = vsub.s32 0, %v2395_v49 }
 0x44a   : > { %6043 = vmatprep.subr.bf16.mxu0 %v6042_v63  ;;  %v2866_v9 = vld [vmem:[#allocation9 + $0x1c0] sm:$0xff]  ;;  %v2867_v16 = vld [vmem:[#allocation9 + $0x1c8] sm:$0xff]  ;;  %v6086_v12 = vpack.c.bf16 %v2498_v0, %v2497_v62  ;;  %v2500_v28 = vld [vmem:[#allocation9 + $0xf8] sm:$0xff] }
 0x44b   : > { %v6174_v25 = vpack.c.bf16 %v2867_v16, %v2866_v9  ;;  %v2868_v15 = vld [vmem:[#allocation9 + $0x1d0] sm:$0xff]  ;;  %v2869_v37 = vld [vmem:[#allocation9 + $0x1d8] sm:$0xff]  ;;  %v6090_v17 = vpack.c.bf16 %v2500_v28, %v2499_v14  ;;  %v2460_v20 = vld [vmem:[#allocation9] sm:$0xff] }
 0x44c   : > { %6169 = vmatpush3.bf16.msra.mxu1 %v6166_v39  ;;  %v6178_v40 = vpack.c.bf16 %v2869_v37, %v2868_v15  ;;  %v2461_v47 = vld [vmem:[#allocation9 + $0x8] sm:$0xff]  ;;  %v2870_v21 = vld [vmem:[#allocation9 + $0x1e0] sm:$0xff]  ;;  %v2872_v31 = vld [vmem:[#allocation9 + $0x1f0] sm:$0xff] }
 0x44d   : > { %6045 = vmatpush3.bf16.msra.mxu0 %v6042_v63  ;;  %6171 = vmatprep.subr.bf16.mxu1 %v6170_v46  ;;  %v2871_v24 = vld [vmem:[#allocation9 + $0x1e8] sm:$0xff]  ;;  %v7389_v27 = vpack.c.bf16 %v2461_v47, %v2460_v20  ;;  %v2476_v29 = vld [vmem:[#allocation2 + $0x1] sm:$0xff]  ;;  %v2384_v34 = vld [vmem:[#allocation3] sm:$0x1] }
 0x44e   : > { %6047 = vmatprep.subr.bf16.mxu0 %v6046_v42  ;;  %v6182_v22 = vpack.c.bf16 %v2871_v24, %v2870_v21  ;;  %v2873_v63 = vld [vmem:[#allocation9 + $0x1f8] sm:$0xff]  ;;  %v2996_v36 = vld [vmem:[#allocation9 + $0x200] sm:$0xff]  ;;  %v2997_v38 = vld [vmem:[#allocation9 + $0x208] sm:$0xff]  ;;  %v2385_v41 = vmul.f32 0.0078125, %v2384_v34 }
 0x44f   : > { %v6186_v33 = vpack.c.bf16 %v2873_v63, %v2872_v31  ;;  %v7392_v39 = vpack.c.bf16 %v2997_v38, %v2996_v36  ;;  %v2390_v52 = vld [vmem:[%s7754_s3] sm:$0x1]  ;;  %v2462_v13 = vld [vmem:[#allocation9 + $0x10] sm:$0xff]  ;;  %v2464_v15 = vld [vmem:[#allocation9 + $0x20] sm:$0xff]  ;;  %s7759_s3 = sld [smem:[#allocation22_spill]] }
 0x450   : > { %6173 = vmatpush3.bf16.msra.mxu1 %v6170_v46  ;;  %v2388_v45 = vmul.f32 %v2385_v41, %v2385_v41  ;;  %v2397_v50 = vrot.slane %v2385_v41, %v7398_v53  ;;  %v2465_v37 = vld [vmem:[#allocation9 + $0x28] sm:$0xff]  ;;  %v2466_v36 = vld [vmem:[#allocation9 + $0x30] sm:$0xff]  ;;  %v2467_v38 = vld [vmem:[#allocation9 + $0x38] sm:$0xff] }
 0x451   : > { %6049 = vmatpush3.bf16.msra.mxu0 %v6046_v42  ;;  %6175 = vmatprep.subr.bf16.mxu1 %v6174_v25  ;;  %v2386_v42 = vld [vmem:[#allocation3 + $0x1] sm:$0x1]  ;;  %v2998_v41 = vld [vmem:[#allocation9 + $0x210] sm:$0xff]  ;;  %v6106_v32 = vpack.c.bf16 %v2467_v38, %v2466_v36  ;;  %v3008_v36 = vld [vmem:[#allocation9 + $0x260] sm:$0xff] }
 0x452   : > { %6051 = vmatprep.subr.bf16.mxu0 %v6050_v48  ;;  %v2387_v44 = vmul.f32 0.0078125, %v2386_v42  ;;  %v2999_v42 = vld [vmem:[#allocation9 + $0x218] sm:$0xff]  ;;  %v3009_v38 = vld [vmem:[#allocation9 + $0x268] sm:$0xff] }
 0x454   : > { %6177 = vmatpush3.bf16.msra.mxu1 %v6174_v25  ;;  %v2389_v46 = vsub.f32 %v2387_v44, %v2388_v45 }
 0x455   : > { %6053 = vmatpush3.bf16.msra.mxu0 %v6050_v48  ;;  %6179 = vmatprep.subr.bf16.mxu1 %v6178_v40 }
 0x456   : > { %6055 = vmatprep.subr.bf16.mxu0 %v6054_v51  ;;  %v2391_v48 = vadd.f32 1e-05, %v2389_v46 }
 0x458   : > { %6181 = vmatpush3.bf16.msra.mxu1 %v6178_v40  ;;  %6626 = vrsqrt.f32 %v2391_v48 }
 0x459   : > { %6057 = vmatpush3.bf16.msra.mxu0 %v6054_v51  ;;  %6183 = vmatprep.subr.bf16.mxu1 %v6182_v22 }
 0x45a   : > { %6059 = vmatprep.subr.bf16.mxu0 %v6058_v54 }
 0x45c   : > { %6185 = vmatpush3.bf16.msra.mxu1 %v6182_v22 }
 0x45d   : > { %6061 = vmatpush3.bf16.msra.mxu0 %v6058_v54  ;;  %6187 = vmatprep.subr.bf16.mxu1 %v6186_v33 }
 0x45e   : > { %6063 = vmatprep.subr.bf16.mxu0 %v6062_v19 }
 0x460   : > { %5195 = vmatmul.mubr.f32.vlgmr.msra.gmra.mrb[0].mxu0 %v7177_v2  ;;  %6189 = vmatpush3.bf16.msra.mxu1 %v6186_v33 }
 0x461   : > { %5197 = vmatprep.mubr.f32.mxu0 %v7180_v3  ;;  %6065 = vmatpush3.bf16.msra.mxu0 %v6062_v19 }
 0x462   : > { %6067 = vmatprep.subr.bf16.mxu0 %v6066_v18  ;;  %6191 = vmatprep.subr.bf16.mxu1 %v7392_v39  ;;  %v6627_v51 = vpop.eup %6626 }
 0x463   : > { %v2393_v54 = vmul.f32 %v6627_v51, %v2390_v52  ;;  %v6194_v52 = vpack.c.bf16 %v2999_v42, %v2998_v41  ;;  %v2722_v41 = vld [vmem:[#allocation9 + $0x110] sm:$0xff]  ;;  %v2723_v42 = vld [vmem:[#allocation9 + $0x118] sm:$0xff] }
 0x464   : > { %5198 = vmatmul.mubr.f32.gmra.mrb[2].mxu0 %v7183_v4 }
 0x465   : > { %5200 = vmatprep.mubr.f32.mxu0 %v7186_v5  ;;  %6069 = vmatpush3.bf16.msra.mxu0 %v6066_v18  ;;  %v2410_v10 = vrot.slane %v2393_v54, %v7398_v53  ;;  %v7405_v18 = vld [vmem:[%s7755_s6] ss:$0 sm:$0xff]  ;;  %v2468_v54 = vld [vmem:[#allocation9 + $0x40] sm:$0xff] }
 0x466   : > { %6071 = vmatprep.subr.bf16.mxu0 %v6070_v43 }
 0x468   : > { %5201 = vmatmul.mubr.f32.gmra.mrb[4].mxu0 %v7189_v6 }
 0x469   : > { %5203 = vmatprep.mubr.f32.mxu0 %v7192_v7  ;;  %6073 = vmatpush3.bf16.msra.mxu0 %v6070_v43 }
 0x46a   : > { %6075 = vmatprep.subr.bf16.mxu0 %v6074_v56 }
 0x46c   : > { %5204 = vmatmul.mubr.f32.gmra.mrb[6].mxu0 %v7195_v8 }
 0x46d   : > { %6077 = vmatpush3.bf16.msra.mxu0 %v6074_v56  ;;  %5238 = vmatprep.mubr.f32.mxu0 %v2476_v29  ;;  %v6102_v29 = vpack.c.bf16 %v2465_v37, %v2464_v15 }
 0x46e   : > { %6079 = vmatprep.subr.bf16.mxu0 %v6078_v58 }
 0x471   : > { %6081 = vmatpush3.bf16.msra.mxu0 %v6078_v58  ;;  %v2463_v58 = vld [vmem:[#allocation9 + $0x18] sm:$0xff] }
 0x472   : > { %6083 = vmatprep.subr.bf16.mxu0 %v6082_v55 }
 0x475   : > { %6085 = vmatpush3.bf16.msra.mxu0 %v6082_v55 }
 0x476   : > { %6087 = vmatprep.subr.bf16.mxu0 %v6086_v12 }
 0x479   : > { %6089 = vmatpush3.bf16.msra.mxu0 %v6086_v12  ;;  %v6098_v12 = vpack.c.bf16 %v2463_v58, %v2462_v13  ;;  %v3002_v13 = vld [vmem:[#allocation9 + $0x230] sm:$0xff]  ;;  %v2452_v58 = vld [vmem:[#allocation2] sm:$0xff] }
 0x47a   : > { %6091 = vmatprep.subr.bf16.mxu0 %v6090_v17 }
 0x47d   : > { %6093 = vmatpush3.bf16.msra.mxu0 %v6090_v17 }
 0x47e   : > { %6095 = vmatprep.subr.bf16.mxu0 %v7389_v27 }
 0x533   : > { %v5196_v19 = vpop.f32.mrb[0].mxu0 }
 0x534   : > { %v2399_v59 = vsub.f32 %v5196_v19, %v2397_v50  ;;  %v2345_v11 = vpop.f32.mrb[1].mxu0 }
 0x535   : > { %v2398_v30 = vsub.f32 %v2345_v11, %v2397_v50  ;;  %v3001_v11 = vld [vmem:[#allocation9 + $0x228] sm:$0xff] }
 0x536   : > { %v2413_v35 = vmul.f32 %v2410_v10, %v2399_v59 }
 0x537   : > { %v2412_v43 = vmul.f32 %v2410_v10, %v2398_v30  ;;  %v5199_v26 = vpop.f32.mrb[2].mxu0 }
 0x538   : > { %v2428_v23 = vadd.f32 %v7405_v18, %v2413_v35  ;;  %v2401_v56 = vsub.f32 %v5199_v26, %v2397_v50  ;;  %v2355_v57 = vpop.f32.mrb[3].mxu0 }
 0x539   : > { %v2427_v60 = vadd.f32 %v7405_v18, %v2412_v43  ;;  %v2400_v61 = vsub.f32 %v2355_v57, %v2397_v50  ;;  %v2471_v57 = vld [vmem:[#allocation9 + $0x58] sm:$0xff] }
 0x53a   : > { %v7409_v55 = vmax.f32 %v2428_v23, 0.0  ;;  %v2415_v62 = vmul.f32 %v2410_v10, %v2401_v56  ;;  %v2470_v56 = vld [vmem:[#allocation9 + $0x50] sm:$0xff] }
 0x53b   : > { %v7411_v0 = vmax.f32 %v2427_v60, 0.0  ;;  %v2414_v9 = vmul.f32 %v2410_v10, %v2400_v61  ;;  %v5202_v16 = vpop.f32.mrb[4].mxu0  ;;  %v6114_v61 = vpack.c.bf16 %v2471_v57, %v2470_v56  ;;  %v2727_v56 = vld [vmem:[#allocation9 + $0x138] sm:$0xff]  ;;  %v3138_v57 = vld [vmem:[#allocation9 + $0x2a0] sm:$0xff] }
 0x53c   : > { %2445 = vst [vmem:[#allocation2 + $0x21] sm:$0xff] %v7409_v55  ;;  %v2430_v25 = vadd.f32 %v7405_v18, %v2415_v62  ;;  %v2403_v14 = vsub.f32 %v5202_v16, %v2397_v50  ;;  %v2365_v28 = vpop.f32.mrb[5].mxu0  ;;  %v2472_v16 = vld [vmem:[#allocation9 + $0x60] sm:$0xff] }
 0x53d   : > { %2444 = vst [vmem:[#allocation2 + $0x11] sm:$0xff] %v7411_v0  ;;  %v2429_v17 = vadd.f32 %v7405_v18, %v2414_v9  ;;  %v2402_v40 = vsub.f32 %v2365_v28, %v2397_v50  ;;  %5239 = vmatmul.mubr.f32.vlgmr.msra.gmra.mrb[8].mxu0 %v7411_v0 }
 0x53e   : > { %v7418_v20 = vmax.f32 %v2430_v25, 0.0  ;;  %v2417_v47 = vmul.f32 %v2410_v10, %v2403_v14  ;;  %6097 = vmatpush3.bf16.msra.mxu0 %v7389_v27  ;;  %5241 = vmatprep.mubr.f32.mxu0 %v7409_v55  ;;  %v3005_v25 = vld [vmem:[#allocation9 + $0x248] sm:$0xff] }
 0x53f   : > { %v7422_v21 = vmax.f32 %v2429_v17, 0.0  ;;  %v2416_v24 = vmul.f32 %v2410_v10, %v2402_v40  ;;  %v5205_v22 = vpop.f32.mrb[6].mxu0  ;;  %6099 = vmatprep.subr.bf16.mxu0 %v6098_v12  ;;  %v2473_v14 = vld [vmem:[#allocation9 + $0x68] sm:$0xff]  ;;  %v2474_v40 = vld [vmem:[#allocation9 + $0x70] sm:$0xff] }
 0x540   : > { %2447 = vst [vmem:[#allocation2 + $0x41] sm:$0xff] %v7418_v20  ;;  %v2432_v31 = vadd.f32 %v7405_v18, %v2417_v47  ;;  %v2405_v63 = vsub.f32 %v5205_v22, %v2397_v50  ;;  %v2375_v33 = vpop.f32.mrb[7].mxu0  ;;  %v6118_v17 = vpack.c.bf16 %v2473_v14, %v2472_v16  ;;  %v2475_v47 = vld [vmem:[#allocation9 + $0x78] sm:$0xff] }
 0x541   : > { %2446 = vst [vmem:[#allocation2 + $0x31] sm:$0xff] %v7422_v21  ;;  %v2431_v27 = vadd.f32 %v7405_v18, %v2416_v24  ;;  %v2404_v34 = vsub.f32 %v2375_v33, %v2397_v50  ;;  %5242 = vmatmul.mubr.f32.gmra.mrb[10].mxu0 %v7422_v21  ;;  %v2469_v50 = vld [vmem:[#allocation9 + $0x48] sm:$0xff]  ;;  %v3006_v24 = vld [vmem:[#allocation9 + $0x250] sm:$0xff]  ;;  %v3007_v22 = vld [vmem:[#allocation9 + $0x258] sm:$0xff] }
 0x542   : > { %v7429_v44 = vmax.f32 %v2432_v31, 0.0  ;;  %v2419_v45 = vmul.f32 %v2410_v10, %v2405_v63  ;;  %6101 = vmatpush3.bf16.msra.mxu0 %v6098_v12  ;;  %5244 = vmatprep.mubr.f32.mxu0 %v7418_v20  ;;  %v3004_v12 = vld [vmem:[#allocation9 + $0x240] sm:$0xff]  ;;  %v6210_v31 = vpack.c.bf16 %v3007_v22, %v3006_v24  ;;  %v2721_v33 = vld [vmem:[#allocation9 + $0x108] sm:$0xff] }
 0x543   : > { %v7432_v46 = vmax.f32 %v2431_v27, 0.0  ;;  %v2418_v48 = vmul.f32 %v2410_v10, %v2404_v34  ;;  %6103 = vmatprep.subr.bf16.mxu0 %v6102_v29  ;;  %v7441_v59 = vld [vmem:[#allocation2 + $0x20] sm:$0xff]  ;;  %v3000_v10 = vld [vmem:[#allocation9 + $0x220] sm:$0xff]  ;;  %v6206_v37 = vpack.c.bf16 %v3005_v25, %v3004_v12  ;;  %v6214_v34 = vpack.c.bf16 %v3009_v38, %v3008_v36  ;;  %v3140_v12 = vld [vmem:[#allocation9 + $0x2b0] sm:$0xff] }
 0x544   : > { %2449 = vst [vmem:[#allocation2 + $0x61] sm:$0xff] %v7429_v44  ;;  %v2434_v49 = vadd.f32 %v7405_v18, %v2419_v45  ;;  %v7436_v51 = vld [vmem:[#allocation2 + $0x10] sm:$0xff]  ;;  %v6198_v23 = vpack.c.bf16 %v3001_v11, %v3000_v10  ;;  %v2720_v63 = vld [vmem:[#allocation9 + $0x100] sm:$0xff]  ;;  %v3010_v45 = vld [vmem:[#allocation9 + $0x270] sm:$0xff] }
 0x545   : > { %2448 = vst [vmem:[#allocation2 + $0x51] sm:$0xff] %v7432_v46  ;;  %v2433_v19 = vadd.f32 %v7405_v18, %v2418_v48  ;;  %5370 = vmatprep.mubr.f32.mxu1 %v7436_v51  ;;  %5245 = vmatmul.mubr.f32.gmra.mrb[12].mxu0 %v7432_v46  ;;  %v6110_v18 = vpack.c.bf16 %v2469_v50, %v2468_v54  ;;  %v3011_v48 = vld [vmem:[#allocation9 + $0x278] sm:$0xff]  ;;  %v3134_v54 = vld [vmem:[#allocation9 + $0x280] sm:$0xff]  ;;  %v3135_v50 = vld [vmem:[#allocation9 + $0x288] sm:$0xff] }
 0x546   : > { %v7444_v30 = vmax.f32 %v2434_v49, 0.0  ;;  %5371 = vmatmul.mubr.f32.vlgmr.msra.gmra.mrb[0].mxu1 %v7441_v59  ;;  %6105 = vmatpush3.bf16.msra.mxu0 %v6102_v29  ;;  %v6122_v29 = vpack.c.bf16 %v2475_v47, %v2474_v40  ;;  %v6126_v27 = vpack.c.bf16 %v2721_v33, %v2720_v63  ;;  %v2724_v49 = vld [vmem:[#allocation9 + $0x120] sm:$0xff]  ;;  %v6222_v10 = vpack.c.bf16 %v3135_v50, %v3134_v54  ;;  %v3136_v11 = vld [vmem:[#allocation9 + $0x290] sm:$0xff]  ;;  %v3141_v25 = vld [vmem:[#allocation9 + $0x2b8] sm:$0xff] }
 0x547   : > { %v7447_v35 = vmax.f32 %v2433_v19, 0.0  ;;  %6193 = vmatpush3.bf16.msra.mxu1 %v7392_v39  ;;  %v7450_v43 = vld [vmem:[#allocation2 + $0x40] sm:$0xff]  ;;  %6107 = vmatprep.subr.bf16.mxu0 %v6106_v32  ;;  %v6234_v40 = vpack.c.bf16 %v3141_v25, %v3140_v12  ;;  %v3142_v47 = vld [vmem:[#allocation9 + $0x2c0] sm:$0xff]  ;;  %v3143_v24 = vld [vmem:[#allocation9 + $0x2c8] sm:$0xff] }
 0x548   : > { %2451 = vst [vmem:[#allocation2 + $0x81] sm:$0xff] %v7444_v30  ;;  %v7453_v26 = vld [vmem:[#allocation2 + $0x30] sm:$0xff]  ;;  %6195 = vmatprep.subr.bf16.mxu1 %v6194_v52  ;;  %5247 = vmatprep.mubr.f32.mxu0 %v7429_v44  ;;  %v3003_v39 = vld [vmem:[#allocation9 + $0x238] sm:$0xff]  ;;  %v6238_v63 = vpack.c.bf16 %v3143_v24, %v3142_v47  ;;  %v3144_v33 = vld [vmem:[#allocation9 + $0x2d0] sm:$0xff] }
 0x549   : > { %2450 = vst [vmem:[#allocation2 + $0x71] sm:$0xff] %v7447_v35  ;;  %5373 = vmatprep.mubr.f32.mxu1 %v7453_v26  ;;  %5248 = vmatmul.mubr.f32.gmra.mrb[14].mxu0 %v7447_v35  ;;  %v6202_v9 = vpack.c.bf16 %v3003_v39, %v3002_v13  ;;  %v3139_v13 = vld [vmem:[#allocation9 + $0x2a8] sm:$0xff]  ;;  %v3145_v36 = vld [vmem:[#allocation9 + $0x2d8] sm:$0xff]  ;;  %v3148_v54 = vld [vmem:[#allocation9 + $0x2f0] sm:$0xff] }
 0x54a   : > { %5374 = vmatmul.mubr.f32.gmra.mrb[2].mxu1 %v7450_v43  ;;  %6109 = vmatpush3.bf16.msra.mxu0 %v6106_v32  ;;  %v6218_v32 = vpack.c.bf16 %v3011_v48, %v3010_v45  ;;  %v6230_v16 = vpack.c.bf16 %v3139_v13, %v3138_v57  ;;  %v3146_v45 = vld [vmem:[#allocation9 + $0x2e0] sm:$0xff]  ;;  %v3147_v48 = vld [vmem:[#allocation9 + $0x2e8] sm:$0xff]  ;;  %v3149_v50 = vld [vmem:[#allocation9 + $0x2f8] sm:$0xff] }
 0x54b   : > { %6197 = vmatpush3.bf16.msra.mxu1 %v6194_v52  ;;  %v7460_v60 = vld [vmem:[#allocation2 + $0x60] sm:$0xff]  ;;  %6111 = vmatprep.subr.bf16.mxu0 %v6110_v18  ;;  %v2725_v52 = vld [vmem:[#allocation9 + $0x128] sm:$0xff]  ;;  %v3733_v13 = vld [vmem:[#allocation10 + $0x20] sm:$0xff] }
 0x54c   : > { %v7462_v62 = vld [vmem:[#allocation2 + $0x50] sm:$0xff]  ;;  %6199 = vmatprep.subr.bf16.mxu1 %v6198_v23  ;;  %5282 = vmatprep.mubr.f32.mxu0 %v2452_v58  ;;  %v6134_v19 = vpack.c.bf16 %v2725_v52, %v2724_v49  ;;  %v2728_v58 = vld [vmem:[#allocation9 + $0x140] sm:$0xff]  ;;  %v6246_v52 = vpack.c.bf16 %v3147_v48, %v3146_v45 }
 0x54d   : > { %5376 = vmatprep.mubr.f32.mxu1 %v7462_v62  ;;  %v3730_v49 = vld [vmem:[#allocation10 + $0x8] sm:$0xff]  ;;  %v7487_v57 = vld [vmem:[#allocation2 + $0x22] sm:$0xff] }
 0x54e   : > { %5377 = vmatmul.mubr.f32.gmra.mrb[4].mxu1 %v7460_v60  ;;  %6113 = vmatpush3.bf16.msra.mxu0 %v6110_v18  ;;  %v3137_v18 = vld [vmem:[#allocation9 + $0x298] sm:$0xff]  ;;  %v3278_v47 = vld [vmem:[#allocation9 + $0x328] sm:$0xff]  ;;  %v3281_v48 = vld [vmem:[#allocation9 + $0x340] sm:$0xff] }
 0x54f   : > { %6201 = vmatpush3.bf16.msra.mxu1 %v6198_v23  ;;  %v7466_v28 = vld [vmem:[#allocation2 + $0x80] sm:$0xff]  ;;  %6115 = vmatprep.subr.bf16.mxu0 %v6114_v61  ;;  %v2726_v23 = vld [vmem:[#allocation9 + $0x130] sm:$0xff] }
 0x550   : > { %v7468_v15 = vld [vmem:[#allocation2 + $0x70] sm:$0xff]  ;;  %6203 = vmatprep.subr.bf16.mxu1 %v6202_v9  ;;  %v6138_v39 = vpack.c.bf16 %v2727_v56, %v2726_v23  ;;  %v3273_v23 = vld [vmem:[#allocation9 + $0x300] sm:$0xff] }
 0x551   : > { %5379 = vmatprep.mubr.f32.mxu1 %v7468_v15  ;;  %v3274_v56 = vld [vmem:[#allocation9 + $0x308] sm:$0xff]  ;;  %v7493_v25 = vld [vmem:[#allocation2 + $0x42] sm:$0xff] }
 0x552   : > { %5380 = vmatmul.mubr.f32.gmra.mrb[6].mxu1 %v7466_v28  ;;  %6117 = vmatpush3.bf16.msra.mxu0 %v6114_v61  ;;  %v2729_v61 = vld [vmem:[#allocation9 + $0x148] sm:$0xff] }
 0x553   : > { %6205 = vmatpush3.bf16.msra.mxu1 %v6202_v9  ;;  %5414 = vmatprep.mubr.f32.mxu1 %v7411_v0  ;;  %v6130_v0 = vpack.c.bf16 %v2723_v42, %v2722_v41  ;;  %v2711_v9 = vld [vmem:[#allocation2 + $0x2] sm:$0xff]  ;;  %v6142_v14 = vpack.c.bf16 %v2729_v61, %v2728_v58  ;;  %v6242_v42 = vpack.c.bf16 %v3145_v36, %v3144_v33  ;;  %v3275_v61 = vld [vmem:[#allocation9 + $0x310] sm:$0xff] }
 0x554   : > { %6207 = vmatprep.subr.bf16.mxu1 %v6206_v37  ;;  %6119 = vmatprep.subr.bf16.mxu0 %v6118_v17  ;;  %v2735_v41 = vld [vmem:[#allocation9 + $0x178] sm:$0xff]  ;;  %v6254_v58 = vpack.c.bf16 %v3274_v56, %v3273_v23  ;;  %v3279_v36 = vld [vmem:[#allocation9 + $0x330] sm:$0xff]  ;;  %v3285_v56 = vld [vmem:[#allocation9 + $0x360] sm:$0xff] }
 0x556   : > { %6121 = vmatpush3.bf16.msra.mxu0 %v6118_v17  ;;  %v2731_v17 = vld [vmem:[#allocation9 + $0x158] sm:$0xff] }
 0x557   : > { %6209 = vmatpush3.bf16.msra.mxu1 %v6206_v37  ;;  %6123 = vmatprep.subr.bf16.mxu0 %v6122_v29  ;;  %v2730_v37 = vld [vmem:[#allocation9 + $0x150] sm:$0xff] }
 0x558   : > { %6211 = vmatprep.subr.bf16.mxu1 %v6210_v31  ;;  %v6146_v22 = vpack.c.bf16 %v2731_v17, %v2730_v37  ;;  %v3736_v37 = vld [vmem:[#allocation10 + $0x38] sm:$0xff] }
 0x55a   : > { %6125 = vmatpush3.bf16.msra.mxu0 %v6122_v29  ;;  %v2732_v29 = vld [vmem:[#allocation9 + $0x160] sm:$0xff] }
 0x55b   : > { %6213 = vmatpush3.bf16.msra.mxu1 %v6210_v31  ;;  %6127 = vmatprep.subr.bf16.mxu0 %v6126_v27  ;;  %v2733_v31 = vld [vmem:[#allocation9 + $0x168] sm:$0xff] }
 0x55c   : > { %6215 = vmatprep.subr.bf16.mxu1 %v6214_v34  ;;  %v6150_v38 = vpack.c.bf16 %v2733_v31, %v2732_v29  ;;  %v3737_v29 = vld [vmem:[#allocation10 + $0x40] sm:$0xff]  ;;  %v3738_v31 = vld [vmem:[#allocation10 + $0x48] sm:$0xff] }
 0x55d   : > { %5283 = vmatmul.mubr.f32.vlgmr.msra.gmra.mrb[8].mxu0 %v7436_v51  ;;  %v6226_v51 = vpack.c.bf16 %v3137_v18, %v3136_v11  ;;  %v3732_v11 = vld [vmem:[#allocation10 + $0x18] sm:$0xff]  ;;  %v6250_v18 = vpack.c.bf16 %v3149_v50, %v3148_v54 }
 0x55e   : > { %5285 = vmatprep.mubr.f32.mxu0 %v7441_v59  ;;  %6129 = vmatpush3.bf16.msra.mxu0 %v6126_v27  ;;  %v3125_v27 = vld [vmem:[#allocation2 + $0x12] sm:$0xff]  ;;  %v7512_v50 = vld [vmem:[#allocation2 + $0x82] sm:$0xff] }
 0x55f   : > { %6217 = vmatpush3.bf16.msra.mxu1 %v6214_v34  ;;  %6131 = vmatprep.subr.bf16.mxu0 %v6130_v0  ;;  %v2734_v34 = vld [vmem:[#allocation9 + $0x170] sm:$0xff] }
 0x560   : > { %6219 = vmatprep.subr.bf16.mxu1 %v6218_v32 }
 0x561   : > { %5286 = vmatmul.mubr.f32.gmra.mrb[10].mxu0 %v7453_v26 }
 0x562   : > { %5288 = vmatprep.mubr.f32.mxu0 %v7450_v43  ;;  %6133 = vmatpush3.bf16.msra.mxu0 %v6130_v0  ;;  %v6154_v0 = vpack.c.bf16 %v2735_v41, %v2734_v34  ;;  %v7506_v34 = vld [vmem:[#allocation2 + $0x72] sm:$0xff] }
 0x563   : > { %6221 = vmatpush3.bf16.msra.mxu1 %v6218_v32  ;;  %6135 = vmatprep.subr.bf16.mxu0 %v6134_v19  ;;  %v3729_v32 = vld [vmem:[#allocation10] sm:$0xff]  ;;  %v3739_v41 = vld [vmem:[#allocation10 + $0x50] sm:$0xff] }
 0x564   : > { %6223 = vmatprep.subr.bf16.mxu1 %v6222_v10 }
 0x565   : > { %5289 = vmatmul.mubr.f32.gmra.mrb[12].mxu0 %v7462_v62 }
 0x566   : > { %5415 = vmatmul.mubr.f32.vlgmr.msra.gmra.mrb[0].mxu1 %v7409_v55  ;;  %5291 = vmatprep.mubr.f32.mxu0 %v7460_v60 }
 0x567   : > { %5417 = vmatprep.mubr.f32.mxu1 %v7422_v21  ;;  %6225 = vmatpush3.bf16.msra.mxu1 %v6222_v10  ;;  %v3731_v10 = vld [vmem:[#allocation10 + $0x10] sm:$0xff] }
 0x568   : > { %6227 = vmatprep.subr.bf16.mxu1 %v6226_v51  ;;  %6137 = vmatpush3.bf16.msra.mxu0 %v6134_v19  ;;  %v6350_v19 = vpack.c.bf16 %v3730_v49, %v3729_v32  ;;  %v3741_v49 = vld [vmem:[#allocation10 + $0x60] sm:$0xff] }
 0x569   : > { %5292 = vmatmul.mubr.f32.gmra.mrb[14].mxu0 %v7468_v15  ;;  %6139 = vmatprep.subr.bf16.mxu0 %v6138_v39 }
 0x56a   : > { %5418 = vmatmul.mubr.f32.gmra.mrb[2].mxu1 %v7418_v20  ;;  %5326 = vmatprep.mubr.f32.mxu0 %v2711_v9  ;;  %v3276_v9 = vld [vmem:[#allocation9 + $0x318] sm:$0xff] }
 0x56b   : > { %5420 = vmatprep.mubr.f32.mxu1 %v7432_v46  ;;  %6229 = vmatpush3.bf16.msra.mxu1 %v6226_v51  ;;  %v6354_v51 = vpack.c.bf16 %v3732_v11, %v3731_v10  ;;  %v6258_v17 = vpack.c.bf16 %v3276_v9, %v3275_v61  ;;  %v3284_v10 = vld [vmem:[#allocation9 + $0x358] sm:$0xff]  ;;  %v3743_v11 = vld [vmem:[#allocation10 + $0x70] sm:$0xff] }
 0x56c   : > { %6231 = vmatprep.subr.bf16.mxu1 %v6230_v16  ;;  %6141 = vmatpush3.bf16.msra.mxu0 %v6138_v39  ;;  %v3734_v39 = vld [vmem:[#allocation10 + $0x28] sm:$0xff]  ;;  %v3288_v61 = vld [vmem:[#allocation9 + $0x378] sm:$0xff] }
 0x56d   : > { %6143 = vmatprep.subr.bf16.mxu0 %v6142_v14  ;;  %v6358_v12 = vpack.c.bf16 %v3734_v39, %v3733_v13 }
 0x56e   : > { %5421 = vmatmul.mubr.f32.gmra.mrb[4].mxu1 %v7429_v44 }
 0x56f   : > { %5423 = vmatprep.mubr.f32.mxu1 %v7447_v35  ;;  %6233 = vmatpush3.bf16.msra.mxu1 %v6230_v16  ;;  %v7490_v16 = vld [vmem:[#allocation2 + $0x32] sm:$0xff] }
 0x570   : > { %6235 = vmatprep.subr.bf16.mxu1 %v6234_v40  ;;  %6145 = vmatpush3.bf16.msra.mxu0 %v6142_v14  ;;  %v3735_v14 = vld [vmem:[#allocation10 + $0x30] sm:$0xff] }
 0x571   : > { %6147 = vmatprep.subr.bf16.mxu0 %v6146_v22  ;;  %v6362_v24 = vpack.c.bf16 %v3736_v37, %v3735_v14  ;;  %v3413_v37 = vld [vmem:[#allocation9 + $0x390] sm:$0xff] }
 0x572   : > { %5424 = vmatmul.mubr.f32.gmra.mrb[6].mxu1 %v7444_v30 }
 0x573   : > { %6237 = vmatpush3.bf16.msra.mxu1 %v6234_v40  ;;  %5458 = vmatprep.mubr.f32.mxu1 %v3125_v27  ;;  %v3277_v40 = vld [vmem:[#allocation9 + $0x320] sm:$0xff] }
 0x574   : > { %6239 = vmatprep.subr.bf16.mxu1 %v6238_v63  ;;  %6149 = vmatpush3.bf16.msra.mxu0 %v6146_v22  ;;  %v7498_v22 = vld [vmem:[#allocation2 + $0x52] sm:$0xff]  ;;  %v6262_v33 = vpack.c.bf16 %v3278_v47, %v3277_v40  ;;  %v3415_v47 = vld [vmem:[#allocation9 + $0x3a0] sm:$0xff] }
 0x575   : > { %6151 = vmatprep.subr.bf16.mxu0 %v6150_v38 }
 0x577   : > { %6241 = vmatpush3.bf16.msra.mxu1 %v6238_v63  ;;  %v7501_v63 = vld [vmem:[#allocation2 + $0x62] sm:$0xff] }
 0x578   : > { %6243 = vmatprep.subr.bf16.mxu1 %v6242_v42  ;;  %6153 = vmatpush3.bf16.msra.mxu0 %v6150_v38  ;;  %v3280_v38 = vld [vmem:[#allocation9 + $0x338] sm:$0xff] }
 0x579   : > { %6155 = vmatprep.subr.bf16.mxu0 %v6154_v0  ;;  %v6266_v45 = vpack.c.bf16 %v3280_v38, %v3279_v36  ;;  %v3426_v36 = vld [vmem:[#allocation9 + $0x3f8] sm:$0xff]  ;;  %v3549_v38 = vld [vmem:[#allocation9 + $0x400] sm:$0xff] }
 0x57b   : > { %6245 = vmatpush3.bf16.msra.mxu1 %v6242_v42  ;;  %v3740_v42 = vld [vmem:[#allocation10 + $0x58] sm:$0xff] }
 0x57c   : > { %6247 = vmatprep.subr.bf16.mxu1 %v6246_v52  ;;  %6157 = vmatpush3.bf16.msra.mxu0 %v6154_v0  ;;  %v3282_v0 = vld [vmem:[#allocation9 + $0x348] sm:$0xff]  ;;  %v6370_v32 = vpack.c.bf16 %v3740_v42, %v3739_v41  ;;  %v3551_v42 = vld [vmem:[#allocation9 + $0x410] sm:$0xff] }
 0x57d   : > { %6351 = vmatprep.subr.bf16.mxu0 %v6350_v19  ;;  %v6270_v54 = vpack.c.bf16 %v3282_v0, %v3281_v48  ;;  %v3553_v48 = vld [vmem:[#allocation9 + $0x420] sm:$0xff]  ;;  %v3554_v0 = vld [vmem:[#allocation9 + $0x428] sm:$0xff] }
 0x57f   : > { %6249 = vmatpush3.bf16.msra.mxu1 %v6246_v52  ;;  %5327 = vmatmul.mubr.f32.vlgmr.msra.gmra.mrb[8].mxu0 %v3125_v27  ;;  %v6366_v27 = vpack.c.bf16 %v3738_v31, %v3737_v29  ;;  %v3742_v52 = vld [vmem:[#allocation10 + $0x68] sm:$0xff]  ;;  %v3417_v29 = vld [vmem:[#allocation9 + $0x3b0] sm:$0xff]  ;;  %v3422_v31 = vld [vmem:[#allocation9 + $0x3d8] sm:$0xff] }
 0x580   : > { %6251 = vmatprep.subr.bf16.mxu1 %v6250_v18  ;;  %5329 = vmatprep.mubr.f32.mxu0 %v7487_v57 }
 0x581   : > { %6353 = vmatpush3.bf16.msra.mxu0 %v6350_v19  ;;  %v3283_v19 = vld [vmem:[#allocation9 + $0x350] sm:$0xff] }
 0x582   : > { %6355 = vmatprep.subr.bf16.mxu0 %v6354_v51  ;;  %v6274_v23 = vpack.c.bf16 %v3284_v10, %v3283_v19  ;;  %v3557_v19 = vld [vmem:[#allocation9 + $0x440] sm:$0xff]  ;;  %v3558_v10 = vld [vmem:[#allocation9 + $0x448] sm:$0xff] }
 0x583   : > { %6253 = vmatpush3.bf16.msra.mxu1 %v6250_v18  ;;  %5330 = vmatmul.mubr.f32.gmra.mrb[10].mxu0 %v7490_v16  ;;  %v3744_v18 = vld [vmem:[#allocation10 + $0x78] sm:$0xff] }
 0x584   : > { %6255 = vmatprep.subr.bf16.mxu1 %v6254_v58  ;;  %5332 = vmatprep.mubr.f32.mxu0 %v7493_v25  ;;  %v6378_v13 = vpack.c.bf16 %v3744_v18, %v3743_v11  ;;  %v3560_v11 = vld [vmem:[#allocation9 + $0x458] sm:$0xff]  ;;  %v3562_v18 = vld [vmem:[#allocation9 + $0x468] sm:$0xff] }
 0x585   : > { %6357 = vmatpush3.bf16.msra.mxu0 %v6354_v51  ;;  %v3286_v51 = vld [vmem:[#allocation9 + $0x368] sm:$0xff] }
 0x586   : > { %5459 = vmatmul.mubr.f32.vlgmr.msra.gmra.mrb[0].mxu1 %v7487_v57  ;;  %6359 = vmatprep.subr.bf16.mxu0 %v6358_v12  ;;  %v6278_v39 = vpack.c.bf16 %v3286_v51, %v3285_v56  ;;  %v3564_v56 = vld [vmem:[#allocation9 + $0x478] sm:$0xff] }
 0x587   : > { %5461 = vmatprep.mubr.f32.mxu1 %v7490_v16  ;;  %6257 = vmatpush3.bf16.msra.mxu1 %v6254_v58  ;;  %v3287_v58 = vld [vmem:[#allocation9 + $0x370] sm:$0xff] }
 0x588   : > { %6259 = vmatprep.subr.bf16.mxu1 %v6258_v17  ;;  %5333 = vmatmul.mubr.f32.gmra.mrb[12].mxu0 %v7498_v22  ;;  %v6282_v9 = vpack.c.bf16 %v3288_v61, %v3287_v58 }
 0x589   : > { %5335 = vmatprep.mubr.f32.mxu0 %v7501_v63  ;;  %6361 = vmatpush3.bf16.msra.mxu0 %v6358_v12  ;;  %v3412_v12 = vld [vmem:[#allocation9 + $0x388] sm:$0xff] }
 0x58a   : > { %5462 = vmatmul.mubr.f32.gmra.mrb[2].mxu1 %v7493_v25  ;;  %6363 = vmatprep.subr.bf16.mxu0 %v6362_v24 }
 0x58b   : > { %5464 = vmatprep.mubr.f32.mxu1 %v7498_v22  ;;  %6261 = vmatpush3.bf16.msra.mxu1 %v6258_v17  ;;  %v3414_v17 = vld [vmem:[#allocation9 + $0x398] sm:$0xff] }
 0x58c   : > { %6263 = vmatprep.subr.bf16.mxu1 %v6262_v33  ;;  %5336 = vmatmul.mubr.f32.gmra.mrb[14].mxu0 %v7506_v34  ;;  %v6290_v40 = vpack.c.bf16 %v3414_v17, %v3413_v37  ;;  %v3850_v17 = vld [vmem:[#allocation3 + $0x4] sm:$0x1] }
 0x58d   : > { %6365 = vmatpush3.bf16.msra.mxu0 %v6362_v24  ;;  %5634 = vmatprep.mubr.f32.mxu0 %v7174_v1  ;;  %v6374_v1 = vpack.c.bf16 %v3742_v52, %v3741_v49  ;;  %v3416_v24 = vld [vmem:[#allocation9 + $0x3a8] sm:$0xff]  ;;  %v3555_v49 = vld [vmem:[#allocation9 + $0x430] sm:$0xff]  ;;  %v3556_v52 = vld [vmem:[#allocation9 + $0x438] sm:$0xff] }
 0x58e   : > { %5465 = vmatmul.mubr.f32.gmra.mrb[4].mxu1 %v7501_v63  ;;  %6367 = vmatprep.subr.bf16.mxu0 %v6366_v27 }
 0x58f   : > { %5467 = vmatprep.mubr.f32.mxu1 %v7506_v34  ;;  %6265 = vmatpush3.bf16.msra.mxu1 %v6262_v33 }
 0x590   : > { %6267 = vmatprep.subr.bf16.mxu1 %v6266_v45 }
 0x591   : > { %6369 = vmatpush3.bf16.msra.mxu0 %v6366_v27  ;;  %v3550_v27 = vld [vmem:[#allocation9 + $0x408] sm:$0xff] }
 0x592   : > { %5468 = vmatmul.mubr.f32.gmra.mrb[6].mxu1 %v7512_v50  ;;  %6371 = vmatprep.subr.bf16.mxu0 %v6370_v32  ;;  %v6318_v41 = vpack.c.bf16 %v3550_v27, %v3549_v38 }
 0x593   : > { %6269 = vmatpush3.bf16.msra.mxu1 %v6266_v45  ;;  %5502 = vmatprep.mubr.f32.mxu1 %v7441_v59  ;;  %v3411_v59 = vld [vmem:[#allocation9 + $0x380] sm:$0xff]  ;;  %v3552_v45 = vld [vmem:[#allocation9 + $0x418] sm:$0xff] }
 0x594   : > { %6271 = vmatprep.subr.bf16.mxu1 %v6270_v54  ;;  %v6286_v14 = vpack.c.bf16 %v3412_v12, %v3411_v59 }
 0x595   : > { %6373 = vmatpush3.bf16.msra.mxu0 %v6370_v32  ;;  %v6326_v32 = vpack.c.bf16 %v3554_v0, %v3553_v48 }
 0x596   : > { %6375 = vmatprep.subr.bf16.mxu0 %v6374_v1 }
 0x597   : > { %6273 = vmatpush3.bf16.msra.mxu1 %v6270_v54  ;;  %v6330_v54 = vpack.c.bf16 %v3556_v52, %v3555_v49 }
 0x598   : > { %6275 = vmatprep.subr.bf16.mxu1 %v6274_v23 }
 0x599   : > { %6377 = vmatpush3.bf16.msra.mxu0 %v6374_v1  ;;  %v3559_v1 = vld [vmem:[#allocation9 + $0x450] sm:$0xff] }
 0x59a   : > { %6379 = vmatprep.subr.bf16.mxu0 %v6378_v13 }
 0x59b   : > { %6277 = vmatpush3.bf16.msra.mxu1 %v6274_v23 }
 0x59c   : > { %6279 = vmatprep.subr.bf16.mxu1 %v6278_v39 }
 0x59d   : > { %6381 = vmatpush3.bf16.msra.mxu0 %v6378_v13 }
 0x59f   : > { %6281 = vmatpush3.bf16.msra.mxu1 %v6278_v39 }
 0x5a0   : > { %6283 = vmatprep.subr.bf16.mxu1 %v6282_v9  ;;  %5635 = vmatmul.mubr.f32.vlgmr.msra.gmra.mrb[16].mxu0 %v7177_v2  ;;  %v6294_v2 = vpack.c.bf16 %v3416_v24, %v3415_v47  ;;  %v3678_v47 = vld [vmem:[#allocation3 + $0x2] sm:$0x1]  ;;  %v3852_v24 = vld [vmem:[#allocation3 + $0x5] sm:$0x1] }
 0x5a1   : > { %5637 = vmatprep.mubr.f32.mxu0 %v7180_v3  ;;  %v3418_v3 = vld [vmem:[#allocation9 + $0x3b8] sm:$0xff] }
 0x5a3   : > { %6285 = vmatpush3.bf16.msra.mxu1 %v6282_v9 }
 0x5a4   : > { %6287 = vmatprep.subr.bf16.mxu1 %v6286_v14  ;;  %5638 = vmatmul.mubr.f32.gmra.mrb[18].mxu0 %v7183_v4  ;;  %v6298_v4 = vpack.c.bf16 %v3418_v3, %v3417_v29  ;;  %v3853_v29 = vmul.f32 0.0078125, %v3852_v24 }
 0x5a5   : > { %5640 = vmatprep.mubr.f32.mxu0 %v7186_v5  ;;  %v3419_v5 = vld [vmem:[#allocation9 + $0x3c0] sm:$0xff] }
 0x5a6   : > { %5503 = vmatmul.mubr.f32.vlgmr.msra.gmra.mrb[0].mxu1 %v7453_v26 }
 0x5a7   : > { %5505 = vmatprep.mubr.f32.mxu1 %v7450_v43  ;;  %6289 = vmatpush3.bf16.msra.mxu1 %v6286_v14  ;;  %v3420_v43 = vld [vmem:[#allocation9 + $0x3c8] sm:$0xff] }
 0x5a8   : > { %6291 = vmatprep.subr.bf16.mxu1 %v6290_v40  ;;  %5641 = vmatmul.mubr.f32.gmra.mrb[20].mxu0 %v7189_v6  ;;  %v3271_v6 = vld [vmem:[#allocation2 + $0x90] sm:$0xff]  ;;  %v6302_v26 = vpack.c.bf16 %v3420_v43, %v3419_v5 }
 0x5a9   : > { %5643 = vmatprep.mubr.f32.mxu0 %v7192_v7  ;;  %v3421_v7 = vld [vmem:[#allocation9 + $0x3d0] sm:$0xff] }
 0x5aa   : > { %5506 = vmatmul.mubr.f32.gmra.mrb[2].mxu1 %v7462_v62  ;;  %v3423_v62 = vld [vmem:[#allocation9 + $0x3e0] sm:$0xff] }
 0x5ab   : > { %5508 = vmatprep.mubr.f32.mxu1 %v7460_v60  ;;  %6293 = vmatpush3.bf16.msra.mxu1 %v6290_v40  ;;  %v6306_v60 = vpack.c.bf16 %v3422_v31, %v3421_v7  ;;  %v3851_v40 = vmul.f32 0.0078125, %v3850_v17 }
 0x5ac   : > { %6295 = vmatprep.subr.bf16.mxu1 %v6294_v2  ;;  %5644 = vmatmul.mubr.f32.gmra.mrb[22].mxu0 %v7195_v8  ;;  %v3424_v8 = vld [vmem:[#allocation9 + $0x3e8] sm:$0xff] }
 0x5ad   : > { %v6310_v33 = vpack.c.bf16 %v3424_v8, %v3423_v62  ;;  %v3854_v3 = vmul.f32 %v3851_v40, %v3851_v40  ;;  %v3856_v62 = vld [vmem:[%s7756_s26] sm:$0x1] }
 0x5ae   : > { %5509 = vmatmul.mubr.f32.gmra.mrb[4].mxu1 %v7468_v15  ;;  %v3425_v15 = vld [vmem:[#allocation9 + $0x3f0] sm:$0xff] }
 0x5af   : > { %5511 = vmatprep.mubr.f32.mxu1 %v7466_v28  ;;  %6297 = vmatpush3.bf16.msra.mxu1 %v6294_v2  ;;  %v6314_v28 = vpack.c.bf16 %v3426_v36, %v3425_v15  ;;  %v3679_v2 = vmul.f32 0.0078125, %v3678_v47  ;;  %v3684_v36 = vld [vmem:[%s7757_s10] sm:$0x1] }
 0x5b0   : > { %6299 = vmatprep.subr.bf16.mxu1 %v6298_v4 }
 0x5b1   : > { %v3682_v43 = vmul.f32 %v3679_v2, %v3679_v2 }
 0x5b2   : > { %5512 = vmatmul.mubr.f32.gmra.mrb[6].mxu1 %v3271_v6  ;;  %v3855_v6 = vsub.f32 %v3853_v29, %v3854_v3 }
 0x5b3   : > { %6301 = vmatpush3.bf16.msra.mxu1 %v6298_v4  ;;  %5546 = vmatprep.mubr.f32.mxu1 %v7409_v55  ;;  %v6322_v55 = vpack.c.bf16 %v3552_v45, %v3551_v42  ;;  %v3680_v4 = vld [vmem:[#allocation3 + $0x3] sm:$0x1]  ;;  %v7574_v42 = vrot.slane %v3679_v2, %v7398_v53 }
 0x5b4   : > { %6303 = vmatprep.subr.bf16.mxu1 %v6302_v26  ;;  %v3681_v5 = vmul.f32 0.0078125, %v3680_v4  ;;  %v3857_v7 = vadd.f32 1e-05, %v3855_v6 }
 0x5b6   : > { %6628 = vrsqrt.f32 %v3857_v7 }
 0x5b7   : > { %6305 = vmatpush3.bf16.msra.mxu1 %v6302_v26  ;;  %v3683_v26 = vsub.f32 %v3681_v5, %v3682_v43 }
 0x5b8   : > { %6307 = vmatprep.subr.bf16.mxu1 %v6306_v60 }
 0x5b9   : > { %v3685_v31 = vadd.f32 1e-05, %v3683_v26 }
 0x5bb   : > { %6309 = vmatpush3.bf16.msra.mxu1 %v6306_v60  ;;  %6630 = vrsqrt.f32 %v3685_v31 }
 0x5bc   : > { %6311 = vmatprep.subr.bf16.mxu1 %v6310_v33 }
 0x5bf   : > { %6313 = vmatpush3.bf16.msra.mxu1 %v6310_v33  ;;  %v7563_v33 = vrot.slane %v3851_v40, %v7398_v53 }
 0x5c0   : > { %6315 = vmatprep.subr.bf16.mxu1 %v6314_v28  ;;  %v6629_v60 = vpop.eup %6628 }
 0x5c1   : > { %v3859_v8 = vmul.f32 %v6629_v60, %v3856_v62 }
 0x5c3   : > { %6317 = vmatpush3.bf16.msra.mxu1 %v6314_v28  ;;  %v7570_v27 = vrot.slane %v3859_v8, %v7398_v53 }
 0x5c4   : > { %6319 = vmatprep.subr.bf16.mxu1 %v6318_v41 }
 0x5c5   : > { %v6631_v15 = vpop.eup %6630 }
 0x5c6   : > { %5547 = vmatmul.mubr.f32.vlgmr.msra.gmra.mrb[0].mxu1 %v7422_v21  ;;  %v6334_v21 = vpack.c.bf16 %v3558_v10, %v3557_v19  ;;  %v3687_v28 = vmul.f32 %v6631_v15, %v3684_v36  ;;  %v7585_v19 = vld [vmem:[%s7758_s12] ss:$0 sm:$0xff] }
 0x5c7   : > { %5549 = vmatprep.mubr.f32.mxu1 %v7418_v20  ;;  %6321 = vmatpush3.bf16.msra.mxu1 %v6318_v41  ;;  %v3409_v20 = vld [vmem:[#allocation2 + $0x91] sm:$0xff] }
 0x5c8   : > { %6323 = vmatprep.subr.bf16.mxu1 %v6322_v55 }
 0x5ca   : > { %5550 = vmatmul.mubr.f32.gmra.mrb[2].mxu1 %v7432_v46  ;;  %v3561_v46 = vld [vmem:[#allocation9 + $0x460] sm:$0xff] }
 0x5cb   : > { %5552 = vmatprep.mubr.f32.mxu1 %v7429_v44  ;;  %6325 = vmatpush3.bf16.msra.mxu1 %v6322_v55  ;;  %v6338_v44 = vpack.c.bf16 %v3560_v11, %v3559_v1  ;;  %v6342_v23 = vpack.c.bf16 %v3562_v18, %v3561_v46 }
 0x5cc   : > { %6327 = vmatprep.subr.bf16.mxu1 %v6326_v32 }
 0x5ce   : > { %5553 = vmatmul.mubr.f32.gmra.mrb[4].mxu1 %v7447_v35  ;;  %v3563_v35 = vld [vmem:[#allocation9 + $0x470] sm:$0xff] }
 0x5cf   : > { %5555 = vmatprep.mubr.f32.mxu1 %v7444_v30  ;;  %6329 = vmatpush3.bf16.msra.mxu1 %v6326_v32  ;;  %v6346_v30 = vpack.c.bf16 %v3564_v56, %v3563_v35  ;;  %v7579_v32 = vrot.slane %v3687_v28, %v7398_v53  ;;  %v7594_v53 = vld [vmem:[%s7759_s3] ss:$0 sm:$0xff] }
 0x5d0   : > { %6331 = vmatprep.subr.bf16.mxu1 %v6330_v54 }
 0x5d2   : > { %5556 = vmatmul.mubr.f32.gmra.mrb[6].mxu1 %v3409_v20 }
 0x5d3   : > { %6333 = vmatpush3.bf16.msra.mxu1 %v6330_v54  ;;  %5590 = vmatprep.mubr.f32.mxu1 %v7487_v57  ;;  %v3547_v57 = vld [vmem:[#allocation2 + $0x92] sm:$0xff] }
 0x5d4   : > { %6335 = vmatprep.subr.bf16.mxu1 %v6334_v21 }
 0x5d7   : > { %6337 = vmatpush3.bf16.msra.mxu1 %v6334_v21 }
 0x5d8   : > { %6339 = vmatprep.subr.bf16.mxu1 %v6338_v44 }
 0x5db   : > { %6341 = vmatpush3.bf16.msra.mxu1 %v6338_v44 }
 0x5dc   : > { %6343 = vmatprep.subr.bf16.mxu1 %v6342_v23 }
 0x5df   : > { %6345 = vmatpush3.bf16.msra.mxu1 %v6342_v23 }
 0x5e0   : > { %6347 = vmatprep.subr.bf16.mxu1 %v6346_v30 }
 0x5e3   : > { %6349 = vmatpush3.bf16.msra.mxu1 %v6346_v30 }
 0x5e6   : > { %5591 = vmatmul.mubr.f32.vlgmr.msra.gmra.mrb[0].mxu1 %v7490_v16 }
 0x5e7   : > { %5593 = vmatprep.mubr.f32.mxu1 %v7493_v25 }
 0x5ea   : > { %5594 = vmatmul.mubr.f32.gmra.mrb[2].mxu1 %v7498_v22 }
 0x5eb   : > { %5596 = vmatprep.mubr.f32.mxu1 %v7501_v63 }
 0x5ee   : > { %5597 = vmatmul.mubr.f32.gmra.mrb[4].mxu1 %v7506_v34 }
 0x5ef   : > { %5599 = vmatprep.mubr.f32.mxu1 %v7512_v50 }
 0x5f2   : > { %5600 = vmatmul.mubr.f32.gmra.mrb[6].mxu1 %v3547_v57 }
 0x652   : > { %v5328_v51 = vpop.f32.mrb[8].mxu0 }
 0x653   : > { %v2802_v13 = vpop.f32.mrb[9].mxu0 }
 0x656   : > { %v5331_v39 = vpop.f32.mrb[10].mxu0 }
 0x657   : > { %v7543_v58 = vpop.f32.mrb[11].mxu0 }
 0x65b   : > { %v7545_v61 = vpop.f32.mrb[12].mxu0 }
 0x65c   : > { %v7547_v16 = vpop.f32.mrb[13].mxu0 }
 0x65f   : > { %v7549_v25 = vpop.f32.mrb[14].mxu0 }
 0x660   : > { %v7551_v22 = vpop.f32.mrb[15].mxu0 }
 0x673   : > { %v5636_v63 = vpop.f32.mrb[16].mxu0 }
 0x674   : > { %v3811_v9 = vpop.f32.mrb[17].mxu0  ;;  %v3865_v38 = vsub.f32 %v5636_v63, %v7563_v33 }
 0x675   : > { %v3864_v41 = vsub.f32 %v3811_v9, %v7563_v33 }
 0x676   : > { %v3879_v52 = vmul.f32 %v7570_v27, %v3865_v38 }
 0x677   : > { %v5639_v34 = vpop.f32.mrb[18].mxu0  ;;  %v3878_v10 = vmul.f32 %v7570_v27, %v3864_v41 }
 0x678   : > { %v3821_v59 = vpop.f32.mrb[19].mxu0  ;;  %v3867_v45 = vsub.f32 %v5639_v34, %v7563_v33  ;;  %v3894_v35 = vadd.f32 %v7585_v19, %v3879_v52 }
 0x679   : > { %v3866_v48 = vsub.f32 %v3821_v59, %v7563_v33 }
 0x67a   : > { %v3881_v21 = vmul.f32 %v7570_v27, %v3867_v45 }
 0x67b   : > { %v5642_v50 = vpop.f32.mrb[20].mxu0  ;;  %v3880_v46 = vmul.f32 %v7570_v27, %v3866_v48 }
 0x67c   : > { %v7553_v12 = vpop.f32.mrb[21].mxu0  ;;  %v3869_v1 = vsub.f32 %v5642_v50, %v7563_v33  ;;  %v3896_v34 = vadd.f32 %v7585_v19, %v3881_v21 }
 0x67d   : > { %v3868_v18 = vsub.f32 %v7553_v12, %v7563_v33 }
 0x67e   : > { %v3883_v59 = vmul.f32 %v7570_v27, %v3869_v1 }
 0x67f   : > { %v7555_v14 = vpop.f32.mrb[22].mxu0  ;;  %v3882_v40 = vmul.f32 %v7570_v27, %v3868_v18 }
 0x680   : > { %v7557_v37 = vpop.f32.mrb[23].mxu0  ;;  %v3871_v29 = vsub.f32 %v7555_v14, %v7563_v33 }
 0x681   : > { %v3870_v43 = vsub.f32 %v7557_v37, %v7563_v33  ;;  %v3897_v62 = vadd.f32 %v7585_v19, %v3882_v40 }
 0x682   : > { %v3885_v36 = vmul.f32 %v7570_v27, %v3871_v29 }
 0x683   : > { %v3884_v45 = vmul.f32 %v7570_v27, %v3870_v43 }
 0x685   : > { %v3899_v21 = vadd.f32 %v7585_v19, %v3884_v45 }
 0x6b9   : > { %v5592_v55 = vpop.f32.mrb[0].mxu1 }
 0x6ba   : > { %v6446_v0 = vadd.f32 %v5592_v55, %v5328_v51  ;;  %v3631_v49 = vpop.f32.mrb[1].mxu1  ;;  %v3893_v51 = vadd.f32 %v7585_v19, %v3878_v10 }
 0x6bb   : > { %v6447_v54 = vadd.f32 %v3631_v49, %v2802_v13 }
 0x6bc   : > { %v3693_v20 = vsub.f32 %v6446_v0, %v7574_v42 }
 0x6bd   : > { %v3692_v11 = vsub.f32 %v6447_v54, %v7574_v42  ;;  %v5595_v44 = vpop.f32.mrb[2].mxu1 }
 0x6be   : > { %v3707_v23 = vmul.f32 %v7579_v32, %v3693_v20  ;;  %v6448_v56 = vadd.f32 %v5595_v44, %v5331_v39  ;;  %v3641_v30 = vpop.f32.mrb[3].mxu1  ;;  %v3895_v39 = vadd.f32 %v7585_v19, %v3880_v46 }
 0x6bf   : > { %v3706_v57 = vmul.f32 %v7579_v32, %v3692_v11  ;;  %v6449_v13 = vadd.f32 %v3641_v30, %v7543_v58 }
 0x6c0   : > { %v3722_v63 = vadd.f32 %v7594_v53, %v3707_v23  ;;  %v3695_v9 = vsub.f32 %v6448_v56, %v7574_v42 }
 0x6c1   : > { %v3721_v50 = vadd.f32 %v7594_v53, %v3706_v57  ;;  %v3694_v12 = vsub.f32 %v6449_v13, %v7574_v42  ;;  %v5598_v17 = vpop.f32.mrb[4].mxu1 }
 0x6c2   : > { %v3902_v47 = vadd.f32 %v3894_v35, %v3722_v63  ;;  %v3709_v58 = vmul.f32 %v7579_v32, %v3695_v9  ;;  %v6450_v24 = vadd.f32 %v5598_v17, %v7545_v61  ;;  %v3651_v2 = vpop.f32.mrb[5].mxu1  ;;  %v3898_v61 = vadd.f32 %v7585_v19, %v3883_v59 }
 0x6c3   : > { %v3901_v3 = vadd.f32 %v3893_v51, %v3721_v50  ;;  %v3708_v4 = vmul.f32 %v7579_v32, %v3694_v12  ;;  %v6451_v5 = vadd.f32 %v3651_v2, %v7547_v16 }
 0x6c4   : > { %v3910_v6 = vmax.f32 %v3902_v47, 0.0  ;;  %v3724_v26 = vadd.f32 %v7594_v53, %v3709_v58  ;;  %v3697_v7 = vsub.f32 %v6450_v24, %v7574_v42 }
 0x6c5   : > { %v3909_v31 = vmax.f32 %v3901_v3, 0.0  ;;  %v3723_v60 = vadd.f32 %v7594_v53, %v3708_v4  ;;  %v3696_v14 = vsub.f32 %v6451_v5, %v7574_v42  ;;  %v5601_v8 = vpop.f32.mrb[6].mxu1 }
 0x6c6   : > { %3918 = vst [vmem:[%s7171_s27 + $0x8] sm:$0xff] %v3910_v6  ;;  %v3904_v16 = vadd.f32 %v3896_v34, %v3724_v26  ;;  %v3711_v37 = vmul.f32 %v7579_v32, %v3697_v7  ;;  %v6452_v33 = vadd.f32 %v5601_v8, %v7549_v25  ;;  %v3661_v15 = vpop.f32.mrb[7].mxu1 }
 0x6c7   : > { %3917 = vst [vmem:[%s7171_s27] sm:$0xff] %v3909_v31  ;;  %v3903_v28 = vadd.f32 %v3895_v39, %v3723_v60  ;;  %v3710_v38 = vmul.f32 %v7579_v32, %v3696_v14  ;;  %v6453_v41 = vadd.f32 %v3661_v15, %v7551_v22  ;;  %v3900_v22 = vadd.f32 %v7585_v19, %v3885_v36 }
 0x6c8   : > { %v3912_v55 = vmax.f32 %v3904_v16, 0.0  ;;  %v3726_v48 = vadd.f32 %v7594_v53, %v3711_v37  ;;  %v3699_v0 = vsub.f32 %v6452_v33, %v7574_v42 }
 0x6c9   : > { %v3911_v49 = vmax.f32 %v3903_v28, 0.0  ;;  %v3725_v25 = vadd.f32 %v7594_v53, %v3710_v38  ;;  %v3698_v52 = vsub.f32 %v6453_v41, %v7574_v42 }
 0x6ca   : > { %3920 = vst [vmem:[%s7171_s27 + $0x18] sm:$0xff] %v3912_v55  ;;  %v3906_v54 = vadd.f32 %v3898_v61, %v3726_v48  ;;  %v3713_v10 = vmul.f32 %v7579_v32, %v3699_v0 }
 0x6cb   : > { %3919 = vst [vmem:[%s7171_s27 + $0x10] sm:$0xff] %v3911_v49  ;;  %v3905_v27 = vadd.f32 %v3897_v62, %v3725_v25  ;;  %v3712_v20 = vmul.f32 %v7579_v32, %v3698_v52 }
 0x6cc   : > { %v3914_v1 = vmax.f32 %v3906_v54, 0.0  ;;  %v3728_v11 = vadd.f32 %v7594_v53, %v3713_v10 }
 0x6cd   : > { %v3913_v44 = vmax.f32 %v3905_v27, 0.0  ;;  %v3727_v42 = vadd.f32 %v7594_v53, %v3712_v20 }
 0x6ce   : > { %3922 = vst [vmem:[%s7171_s27 + $0x28] sm:$0xff] %v3914_v1  ;;  %v3908_v46 = vadd.f32 %v3900_v22, %v3728_v11 }
 0x6cf   : > { %3921 = vst [vmem:[%s7171_s27 + $0x20] sm:$0xff] %v3913_v44  ;;  %v3907_v18 = vadd.f32 %v3899_v21, %v3727_v42 }
 0x6d0   : > { %v3916_v23 = vmax.f32 %v3908_v46, 0.0 }
 0x6d1   : > { %v3915_v35 = vmax.f32 %v3907_v18, 0.0 }
 0x6d2   : > { %3924 = vst [vmem:[%s7171_s27 + $0x38] sm:$0xff] %v3916_v23 }
 0x6d3   : > { %3923 = vst [vmem:[%s7171_s27 + $0x30] sm:$0xff] %v3915_v35 }
 0x6d4 PF: > { %s4081_s28 = sshll.u32 %s6836_s16, 10  ;;  %s7760_s21 = sld [smem:[#allocation25_spill]] }
 0x6d5   : > { %s3939_s26 = sshll.u32 %s7171_s27, 4  ;;  %s3926_s23 = scalar_lea.sflag [#allocation6], %s7151_s5  ;;  %s7658_s26 = int_to_ptr.vmem [resolvable:$true] %s3939_s26 }
 0x6d6   : > { %s6746_s25 = scalar_lea.vmem %s7658_s26, 1024  ;;  %s6861_s10 = smov [#allocation12]  }
 0x6d7   : > { %p6747_p1 = scmp.ne.s32.totalorder %s7658_s26, %s6746_s25  ;;  %s6750_s13 = sshll.u32 %s6861_s10, 4  ;;  %s6751_s13 = int_to_ptr.vmem [resolvable:$false] %s6750_s13 }
 0x6d8   : > { %s6752_s16 = scalar_lea.vmem %s6751_s13, 2048  ;;  %p6753_p12 = scmp.lt.s32.totalorder %s7658_s26, %s6751_s13 }
 0x6d9   : > { %p6748_p2 = pnand %p6747_p1, %p7094_p7  ;;  %p6754_p13 = scmp.lt.s32.totalorder %s6752_s16, %s6746_s25 }
 0x6da   : > { %s7655_s24 = scalar_lea.hbm %s7760_s21, %s4081_s28 }
 0x6db   : > { %p6749_p8 = pneg %p6748_p2  ;;  %p6755_p4 = por %p6754_p13, %p6753_p12 }
 0x6dd   : > { %p6756_p9 = pnand %p6755_p4, %p6749_p8 }
 0x6df   : > { %6759 = shalt.err (!%p6756_p9)
}
 0x6e0   : > { %s6760_s27 = scalar_lea.hbm %s7655_s24, 1024  ;;  %s6764_s17 = scalar_lea.hbm %s7760_s21, 2048 }
 0x6e1   : > { %p6761_p6 = scmp.ne.s32.totalorder %s7655_s24, %s6760_s27  ;;  %p6765_p5 = scmp.lt.u32.totalorder %s7655_s24, %s7760_s21 }
 0x6e2   : > { %p6766_p10 = scmp.lt.u32.totalorder %s6764_s17, %s6760_s27  ;;  %p6768_p1 = scmp.lt.u32.totalorder %s6760_s27, %s7655_s24 }
 0x6e3   : > { %p6762_p0 = pnand %p6761_p6, %p7094_p7 }
 0x6e4   : > { %p6767_p11 = por %p6766_p10, %p6765_p5 }
 0x6e5   : > { %p6763_p3 = pneg %p6762_p0 }
 0x6e6   : > { %p6769_p2 = por %p6768_p1, %p6767_p11 }
 0x6e8   : > { %p6770_p8 = pnand %p6769_p2, %p6763_p3 }
 0x6ea   : > { %6773 = shalt.err (!%p6770_p8)
}
 0x6eb   : > { %s6862_s28 = smov 128   ;;  %s6863_s11 = smov 8  }
 0x6ec   : > { %6524 = dma.vmem_to_hbm [thread:$0]  (%p7094_p7), %s7658_s26, 1024, %s7655_s24, %s3926_s23, %s6862_s28, %s6862_s28, %s6863_s11  }
 0x6ed PF: > { %s7761_s6 = sld [smem:[#allocation17_spill]]  ;;  %s7762_s25 = sld [smem:[#allocation18_spill]] }
 0x6ee   : > { %p6551_p12 = scmp.ge.s32.totalorder %s6852_s20, 2 }
 0x6f3   : > { %s3954_s10 = sand.u32 1, %s7761_s6   ;;  %p7763_p13 = scmp.ne.s32.totalorder %s7762_s25, 0 }
 0x6f4   : > { %s3955_s13 = scalar_lea.sflag [#allocation6], %s3954_s10 }
 0x6f5   : > { %p6541_p4 = pnand %p6551_p12, %p7763_p13 }
 0x6f7   : > { %6819 = dma.done.wait (!%p6541_p4), %s3955_s13, 1024  }
 0x6f8   : > { %6821 = vsyncadd (!%p6541_p4), %s3955_s13, 4294966272  ;;  %s28_s20 = sadd.s32 1, %s6852_s20   ;;  %s7764_s13 = smov %s6828_s14 }
 0x6f9   : > { %p25_p9 = scmp.ge.s32.totalorder %s28_s20, 8   ;;  %s7765_s14 = smov %s6832_s15 }
 0x6fa   : > { %s7766_s15 = smov %s7101_s8  ;;  %s7767_s16 = smov %s6844_s18 }
 0x6fb   : > { %s7768_s17 = smov %s6848_s19  ;;  %s7769_s18 = smov %s7772_s9 }
 0x6fc   : > { %s7770_s19 = smov %s7776_s30  ;;  %27 = sbr.rel (!%p25_p9) target bundleno = 17 (0x11), region = 154 }
 0x703   :  { %3960 = vsyncpa [#allocation5], 1 }
 0x704   :  { %3962 = vsyncpa [#allocation5 + $0x1], 1 }
 0x705   :  { %3963 = vsyncpa [#allocation8], 1 }
 0x706   :  { %3964 = vsyncpa [#allocation11], 1 }
 0x707   :  { %3965 = vsyncpa [#allocation6], 1 }
 0x708   :  { %3967 = vsyncpa [#allocation6 + $0x1], 1 }

</bundles_post_ra>
